<compile_context>
chip_gen: v6e
topology: v6e:2x2x1
jax: 0.10.0
libtpu: 0.0.40
codegen_flags: <defaults>
</compile_context>

<pallas_src>
import functools

import jax
import jax.numpy as jnp
from jax.experimental import pallas as pl
from jax.experimental.pallas import tpu as pltpu


# ----------------------------------------------------------------------------
# Fused kernel: encoder (3x3 conv + ReLU) + all decoder heads, one image pair
# per grid step.
#
# Inputs per grid step (batch element b):
#   gl_ref / gr_ref : (1, n_flat, C_in) bf16  -- halo-padded, flattened NHWC img
#   w_enc_ref       : (9, C_in, C_enc) bf16   -- one (C_in, C_enc) slab per tap
#   b_enc_ref       : (1, C_enc) f32
#   w_dec_l/r_ref   : (C_enc, n_out) bf16     -- fused decoder weights
#   b_dec_ref       : (1, n_out) f32
# Output:
#   out_ref         : (1, n_pix, n_out) f32   -- [seg_left || seg_right || depth]
# n_pix = H * (W+2): each output row block contains 2 "junk" pad columns per
# image row which the wrapper drops; this keeps every in-kernel window a
# contiguous static 2-D slice.
# ----------------------------------------------------------------------------
def _fused_kernel(*refs, n_pix, row_stride, has_right):
    if has_right:
        (gl_ref, gr_ref, w_enc_ref, b_enc_ref,
         w_dec_l_ref, w_dec_r_ref, b_dec_ref, out_ref) = refs
    else:
        (gl_ref, w_enc_ref, b_enc_ref,
         w_dec_l_ref, b_dec_ref, out_ref) = refs

    c_enc = w_enc_ref.shape[-1]

    def encode(g_ref):
        g = g_ref[0]                                        # (n_flat, C_in) bf16
        acc = jnp.zeros((n_pix, c_enc), jnp.float32)
        # 3x3 conv == 9 accumulating matmuls over shifted halo windows.
        for k in range(9):
            dy, dx = divmod(k, 3)
            s = dy * row_stride + dx                        # static offset
            acc = acc + jnp.dot(g[s:s + n_pix, :], w_enc_ref[k],
                                preferred_element_type=jnp.float32)
        return jnp.maximum(acc + b_enc_ref[...], 0.0)       # bias + ReLU in f32

    # Left stream: fused (seg_left | zeros | depth) head.
    feat_l = encode(gl_ref).astype(w_dec_l_ref.dtype)
    dec = jnp.dot(feat_l, w_dec_l_ref[...],
                  preferred_element_type=jnp.float32)
    if has_right:
        # Right stream: fused (zeros | seg_right | zeros) head; accumulating
        # the two dots writes the channel-concatenated "seg" directly.
        feat_r = encode(gr_ref).astype(w_dec_r_ref.dtype)
        dec = dec + jnp.dot(feat_r, w_dec_r_ref[...],
                            preferred_element_type=jnp.float32)

    out_ref[0] = (dec + b_dec_ref[...]).astype(out_ref.dtype)


# ----------------------------------------------------------------------------
# Boundary layout helpers (one transpose in, one transpose out).
# ----------------------------------------------------------------------------
def _prep_input(x_nchw):
    """NCHW -> (B, (H+2)*(W+2) + 2, C) flattened halo-padded NHWC, bf16."""
    b, c, h, w = x_nchw.shape
    x = jnp.transpose(x_nchw, (0, 2, 3, 1))                 # NHWC once
    x = jnp.pad(x, ((0, 0), (1, 1), (1, 1), (0, 0)))        # 'same' halo
    x = x.reshape(b, (h + 2) * (w + 2), c)
    x = jnp.pad(x, ((0, 0), (1, 1), (0, 0)))                # corner-tap halo
    return x.astype(jnp.bfloat16)                           # half the DMA bytes


def _unflatten_nchw(y_flat, h, w):
    """(B, H*(W+2), C) -> NCHW (B, C, H, W), dropping the pad columns."""
    b, _, c = y_flat.shape
    wp = w + 2
    y = y_flat.reshape(b, h, wp, c)[:, :, 1:w + 1, :]
    return jnp.transpose(y, (0, 3, 1, 2))


# ----------------------------------------------------------------------------
# MultiTaskNetwork forward (matches the PyTorch module semantics).
# ----------------------------------------------------------------------------
def multi_task_forward(params, left, right=None):
    b, c_in, h, w = left.shape
    wp = w + 2
    n_pix = h * wp
    n_flat = (h + 2) * wp + 2

    # Encoder weights: torch OIHW (C_enc, C_in, 3, 3) -> (9, C_in, C_enc) bf16.
    enc_w = params["encoder"]["w"]
    c_enc = enc_w.shape[0]
    w_enc = jnp.transpose(enc_w, (2, 3, 1, 0)).reshape(9, c_in, c_enc)
    w_enc = w_enc.astype(jnp.bfloat16)
    b_enc = params["encoder"]["b"].reshape(1, c_enc).astype(jnp.float32)

    # 1x1 decoder weights: (C_out, C_in, 1, 1) -> (C_enc, C_out).
    w_seg_l = params["left_decoders"]["seg"]["w"][:, :, 0, 0].T
    b_seg_l = params["left_decoders"]["seg"]["b"]
    w_dep = params["left_decoders"]["depth"]["w"][:, :, 0, 0].T
    b_dep = params["left_decoders"]["depth"]["b"]
    n_seg = w_seg_l.shape[1]
    n_dep = w_dep.shape[1]

    has_right = (right is not None) and (len(params["right_decoders"]) > 0)

    gl = _prep_input(left)
    cparams = pltpu.CompilerParams(
        dimension_semantics=("parallel",),       # batch blocks -> both v7x TCs
        vmem_limit_bytes=32 * 1024 * 1024,
    )

    in_img_spec = pl.BlockSpec((1, n_flat, c_in), lambda i: (i, 0, 0))
    w_enc_spec = pl.BlockSpec((9, c_in, c_enc), lambda i: (0, 0, 0))
    b_enc_spec = pl.BlockSpec((1, c_enc), lambda i: (0, 0))

    if has_right:
        w_seg_r = params["right_decoders"]["seg"]["w"][:, :, 0, 0].T
        b_seg_r = params["right_decoders"]["seg"]["b"]
        n_seg_out = 2 * n_seg
        n_out = n_seg_out + n_dep
        z_seg = jnp.zeros((c_enc, n_seg), jnp.float32)
        z_dep = jnp.zeros((c_enc, n_dep), jnp.float32)
        w_dec_l = jnp.concatenate([w_seg_l, z_seg, w_dep], axis=1).astype(jnp.bfloat16)
        w_dec_r = jnp.concatenate([z_seg, w_seg_r, z_dep], axis=1).astype(jnp.bfloat16)
        b_dec = jnp.concatenate([b_seg_l, b_seg_r, b_dep]).reshape(1, n_out)
        b_dec = b_dec.astype(jnp.float32)
        gr = _prep_input(right)

        kernel = functools.partial(_fused_kernel, n_pix=n_pix, row_stride=wp,
                                   has_right=True)
        out_flat = pl.pallas_call(
            kernel,
            out_shape=jax.ShapeDtypeStruct((b, n_pix, n_out), jnp.float32),
            grid_spec=pltpu.PrefetchScalarGridSpec(
                num_scalar_prefetch=0,
                grid=(b,),
                in_specs=[
                    in_img_spec,
                    in_img_spec,
                    w_enc_spec,
                    b_enc_spec,
                    pl.BlockSpec((c_enc, n_out), lambda i: (0, 0)),
                    pl.BlockSpec((c_enc, n_out), lambda i: (0, 0)),
                    pl.BlockSpec((1, n_out), lambda i: (0, 0)),
                ],
                out_specs=pl.BlockSpec((1, n_pix, n_out), lambda i: (i, 0, 0)),
            ),
            compiler_params=cparams,
        )(gl, gr, w_enc, b_enc, w_dec_l, w_dec_r, b_dec)
    else:
        # right=None (or no right decoders): left decoders only, no concat.
        n_seg_out = n_seg
        n_out = n_seg + n_dep
        w_dec_l = jnp.concatenate([w_seg_l, w_dep], axis=1).astype(jnp.bfloat16)
        b_dec = jnp.concatenate([b_seg_l, b_dep]).reshape(1, n_out).astype(jnp.float32)

        kernel = functools.partial(_fused_kernel, n_pix=n_pix, row_stride=wp,
                                   has_right=False)
        out_flat = pl.pallas_call(
            kernel,
            out_shape=jax.ShapeDtypeStruct((b, n_pix, n_out), jnp.float32),
            grid_spec=pltpu.PrefetchScalarGridSpec(
                num_scalar_prefetch=0,
                grid=(b,),
                in_specs=[
                    in_img_spec,
                    w_enc_spec,
                    b_enc_spec,
                    pl.BlockSpec((c_enc, n_out), lambda i: (0, 0)),
                    pl.BlockSpec((1, n_out), lambda i: (0, 0)),
                ],
                out_specs=pl.BlockSpec((1, n_pix, n_out), lambda i: (i, 0, 0)),
            ),
            compiler_params=cparams,
        )(gl, w_enc, b_enc, w_dec_l, b_dec)

    seg_flat = out_flat[:, :, :n_seg_out]
    dep_flat = out_flat[:, :, n_seg_out:]
    return {"seg": _unflatten_nchw(seg_flat, h, w),
            "depth": _unflatten_nchw(dep_flat, h, w)}


# ----------------------------------------------------------------------------
# Pure-JAX reference (mirrors MultiTaskNetwork.forward) and param init.
# ----------------------------------------------------------------------------
def _ref_forward(params, left, right=None):
    def conv(x, w_oihw, bias, relu=False):
        y = jax.lax.conv_general_dilated(
            x, w_oihw, (1, 1), "SAME",
            dimension_numbers=("NCHW", "OIHW", "NCHW"))
        y = y + bias[None, :, None, None]
        return jnp.maximum(y, 0.0) if relu else y

    lf = conv(left, params["encoder"]["w"], params["encoder"]["b"], relu=True)
    outs = {k: conv(lf, p["w"], p["b"])
            for k, p in params["left_decoders"].items()}
    if right is not None and len(params["right_decoders"]) > 0:
        rf = conv(right, params["encoder"]["w"], params["encoder"]["b"], relu=True)
        for k, p in params["right_decoders"].items():
            if k in outs:
                outs[k] = jnp.concatenate([outs[k], conv(rf, p["w"], p["b"])],
                                          axis=1)
    return outs


def init_params(key, c_in=4, c_enc=32, c_seg=8, c_depth=1):
    ks = jax.random.split(key, 8)
    s = 0.1
    return {
        "encoder": {
            "w": s * jax.random.normal(ks[0], (c_enc, c_in, 3, 3), jnp.float32),
            "b": s * jax.random.normal(ks[1], (c_enc,), jnp.float32),
        },
        "left_decoders": {
            "seg": {"w": s * jax.random.normal(ks[2], (c_seg, c_enc, 1, 1), jnp.float32),
                    "b": s * jax.random.normal(ks[3], (c_seg,), jnp.float32)},
            "depth": {"w": s * jax.random.normal(ks[4], (c_depth, c_enc, 1, 1), jnp.float32),
                      "b": s * jax.random.normal(ks[5], (c_depth,), jnp.float32)},
        },
        "right_decoders": {
            "seg": {"w": s * jax.random.normal(ks[6], (c_seg, c_enc, 1, 1), jnp.float32),
                    "b": s * jax.random.normal(ks[7], (c_seg,), jnp.float32)},
        },
    }


if __name__ == "__main__":
    key = jax.random.PRNGKey(0)
    kp, kl, kr = jax.random.split(key, 3)
    B, C, H, W = 2, 4, 16, 16
    params = init_params(kp, c_in=C)
    left = jax.random.normal(kl, (B, C, H, W), jnp.float32)
    right = jax.random.normal(kr, (B, C, H, W), jnp.float32)

    # Stereo path (left + right, shared encoder, channel-concat "seg").
    outs = jax.block_until_ready(jax.jit(multi_task_forward)(params, left, right))
    assert outs["seg"].shape == (B, 16, H, W)      # 8 left + 8 right, cat dim=1
    assert outs["depth"].shape == (B, 1, H, W)

    ref = _ref_forward(params, left, right)
    for name in ("seg", "depth"):
        err = float(jnp.max(jnp.abs(outs[name] - ref[name])))
        assert err < 5e-2, (name, err)             # bf16-matmul tolerance

    # Mono path (right=None): left decoders only, no concat.
    outs_m = jax.block_until_ready(jax.jit(multi_task_forward)(params, left))
    ref_m = _ref_forward(params, left, None)
    assert outs_m["seg"].shape == (B, 8, H, W)
    assert outs_m["depth"].shape == (B, 1, H, W)
    for name in ("seg", "depth"):
        err = float(jnp.max(jnp.abs(outs_m[name] - ref_m[name])))
        assert err < 5e-2, (name, err)

    print("KERNEL_OK")
</pallas_src>

<mosaic_0001>
module attributes {stable_mosaic.version = 11 : i64} {
  func.func @_fused_kernel(%arg0: i32, %arg1: memref<1x326x4xbf16, #tpu.memory_space<vmem>>, %arg2: memref<1x326x4xbf16, #tpu.memory_space<vmem>>, %arg3: memref<9x4x32xbf16, #tpu.memory_space<vmem>>, %arg4: memref<1x32xf32, #tpu.memory_space<vmem>>, %arg5: memref<32x17xbf16, #tpu.memory_space<vmem>>, %arg6: memref<32x17xbf16, #tpu.memory_space<vmem>>, %arg7: memref<1x17xf32, #tpu.memory_space<vmem>>, %arg8: memref<1x288x17xf32, #tpu.memory_space<vmem>>) attributes {dimension_semantics = [#tpu.dimension_semantics<parallel>], iteration_bounds = array<i64: 2>, scalar_prefetch = 0 : i64, scratch_operands = 0 : i64, tpu.core_type = #tpu.core_type<tc>, window_params = [{transform_indices = @transform_0, window_bounds = array<i64: 1, 326, 4>}, {transform_indices = @transform_1, window_bounds = array<i64: 1, 326, 4>}, {pipeline_mode = #tpu.pipeline_mode<synchronous>, transform_indices = @transform_2, window_bounds = array<i64: 9, 4, 32>}, {pipeline_mode = #tpu.pipeline_mode<synchronous>, transform_indices = @transform_3, window_bounds = array<i64: 1, 32>}, {pipeline_mode = #tpu.pipeline_mode<synchronous>, transform_indices = @transform_4, window_bounds = array<i64: 32, 17>}, {pipeline_mode = #tpu.pipeline_mode<synchronous>, transform_indices = @transform_5, window_bounds = array<i64: 32, 17>}, {pipeline_mode = #tpu.pipeline_mode<synchronous>, transform_indices = @transform_6, window_bounds = array<i64: 1, 17>}, {transform_indices = @transform_7, window_bounds = array<i64: 1, 288, 17>}]} {
    %c0 = arith.constant 0 : index
    %c0_0 = arith.constant 0 : index
    %c0_1 = arith.constant 0 : index
    %0 = vector.load %arg1[%c0, %c0_0, %c0_1] : memref<1x326x4xbf16, #tpu.memory_space<vmem>>, vector<1x326x4xbf16>
    %1 = vector.shape_cast %0 : vector<1x326x4xbf16> to vector<326x4xbf16>
    %cst = arith.constant 0.000000e+00 : f32
    %2 = vector.broadcast %cst : f32 to vector<288x32xf32>
    %3 = vector.extract_strided_slice %1 {offsets = [0, 0], sizes = [288, 4], strides = [1, 1]} : vector<326x4xbf16> to vector<288x4xbf16>
    %c0_2 = arith.constant 0 : index
    %c0_3 = arith.constant 0 : index
    %c0_4 = arith.constant 0 : index
    %4 = vector.load %arg3[%c0_2, %c0_3, %c0_4] : memref<9x4x32xbf16, #tpu.memory_space<vmem>>, vector<1x4x32xbf16>
    %5 = vector.shape_cast %4 : vector<1x4x32xbf16> to vector<4x32xbf16>
    %cst_5 = arith.constant dense<0.000000e+00> : vector<288x32xf32>
    %6 = tpu.matmul %3, %5, %cst_5 {dimension_numbers = #tpu.dot_dimension_numbers<[1], [0], [0], [1], [0, 0, 1, 1], [], []>} : vector<288x4xbf16>, vector<4x32xbf16>, vector<288x32xf32> -> vector<288x32xf32>
    %7 = arith.addf %2, %6 : vector<288x32xf32>
    %8 = vector.extract_strided_slice %1 {offsets = [1, 0], sizes = [288, 4], strides = [1, 1]} : vector<326x4xbf16> to vector<288x4xbf16>
    %c1 = arith.constant 1 : index
    %c0_6 = arith.constant 0 : index
    %c0_7 = arith.constant 0 : index
    %9 = vector.load %arg3[%c1, %c0_6, %c0_7] : memref<9x4x32xbf16, #tpu.memory_space<vmem>>, vector<1x4x32xbf16>
    %10 = vector.shape_cast %9 : vector<1x4x32xbf16> to vector<4x32xbf16>
    %cst_8 = arith.constant dense<0.000000e+00> : vector<288x32xf32>
    %11 = tpu.matmul %8, %10, %cst_8 {dimension_numbers = #tpu.dot_dimension_numbers<[1], [0], [0], [1], [0, 0, 1, 1], [], []>} : vector<288x4xbf16>, vector<4x32xbf16>, vector<288x32xf32> -> vector<288x32xf32>
    %12 = arith.addf %7, %11 : vector<288x32xf32>
    %13 = vector.extract_strided_slice %1 {offsets = [2, 0], sizes = [288, 4], strides = [1, 1]} : vector<326x4xbf16> to vector<288x4xbf16>
    %c2 = arith.constant 2 : index
    %c0_9 = arith.constant 0 : index
    %c0_10 = arith.constant 0 : index
    %14 = vector.load %arg3[%c2, %c0_9, %c0_10] : memref<9x4x32xbf16, #tpu.memory_space<vmem>>, vector<1x4x32xbf16>
    %15 = vector.shape_cast %14 : vector<1x4x32xbf16> to vector<4x32xbf16>
    %cst_11 = arith.constant dense<0.000000e+00> : vector<288x32xf32>
    %16 = tpu.matmul %13, %15, %cst_11 {dimension_numbers = #tpu.dot_dimension_numbers<[1], [0], [0], [1], [0, 0, 1, 1], [], []>} : vector<288x4xbf16>, vector<4x32xbf16>, vector<288x32xf32> -> vector<288x32xf32>
    %17 = arith.addf %12, %16 : vector<288x32xf32>
    %18 = vector.extract_strided_slice %1 {offsets = [18, 0], sizes = [288, 4], strides = [1, 1]} : vector<326x4xbf16> to vector<288x4xbf16>
    %c3 = arith.constant 3 : index
    %c0_12 = arith.constant 0 : index
    %c0_13 = arith.constant 0 : index
    %19 = vector.load %arg3[%c3, %c0_12, %c0_13] : memref<9x4x32xbf16, #tpu.memory_space<vmem>>, vector<1x4x32xbf16>
    %20 = vector.shape_cast %19 : vector<1x4x32xbf16> to vector<4x32xbf16>
    %cst_14 = arith.constant dense<0.000000e+00> : vector<288x32xf32>
    %21 = tpu.matmul %18, %20, %cst_14 {dimension_numbers = #tpu.dot_dimension_numbers<[1], [0], [0], [1], [0, 0, 1, 1], [], []>} : vector<288x4xbf16>, vector<4x32xbf16>, vector<288x32xf32> -> vector<288x32xf32>
    %22 = arith.addf %17, %21 : vector<288x32xf32>
    %23 = vector.extract_strided_slice %1 {offsets = [19, 0], sizes = [288, 4], strides = [1, 1]} : vector<326x4xbf16> to vector<288x4xbf16>
    %c4 = arith.constant 4 : index
    %c0_15 = arith.constant 0 : index
    %c0_16 = arith.constant 0 : index
    %24 = vector.load %arg3[%c4, %c0_15, %c0_16] : memref<9x4x32xbf16, #tpu.memory_space<vmem>>, vector<1x4x32xbf16>
    %25 = vector.shape_cast %24 : vector<1x4x32xbf16> to vector<4x32xbf16>
    %cst_17 = arith.constant dense<0.000000e+00> : vector<288x32xf32>
    %26 = tpu.matmul %23, %25, %cst_17 {dimension_numbers = #tpu.dot_dimension_numbers<[1], [0], [0], [1], [0, 0, 1, 1], [], []>} : vector<288x4xbf16>, vector<4x32xbf16>, vector<288x32xf32> -> vector<288x32xf32>
    %27 = arith.addf %22, %26 : vector<288x32xf32>
    %28 = vector.extract_strided_slice %1 {offsets = [20, 0], sizes = [288, 4], strides = [1, 1]} : vector<326x4xbf16> to vector<288x4xbf16>
    %c5 = arith.constant 5 : index
    %c0_18 = arith.constant 0 : index
    %c0_19 = arith.constant 0 : index
    %29 = vector.load %arg3[%c5, %c0_18, %c0_19] : memref<9x4x32xbf16, #tpu.memory_space<vmem>>, vector<1x4x32xbf16>
    %30 = vector.shape_cast %29 : vector<1x4x32xbf16> to vector<4x32xbf16>
    %cst_20 = arith.constant dense<0.000000e+00> : vector<288x32xf32>
    %31 = tpu.matmul %28, %30, %cst_20 {dimension_numbers = #tpu.dot_dimension_numbers<[1], [0], [0], [1], [0, 0, 1, 1], [], []>} : vector<288x4xbf16>, vector<4x32xbf16>, vector<288x32xf32> -> vector<288x32xf32>
    %32 = arith.addf %27, %31 : vector<288x32xf32>
    %33 = vector.extract_strided_slice %1 {offsets = [36, 0], sizes = [288, 4], strides = [1, 1]} : vector<326x4xbf16> to vector<288x4xbf16>
    %c6 = arith.constant 6 : index
    %c0_21 = arith.constant 0 : index
    %c0_22 = arith.constant 0 : index
    %34 = vector.load %arg3[%c6, %c0_21, %c0_22] : memref<9x4x32xbf16, #tpu.memory_space<vmem>>, vector<1x4x32xbf16>
    %35 = vector.shape_cast %34 : vector<1x4x32xbf16> to vector<4x32xbf16>
    %cst_23 = arith.constant dense<0.000000e+00> : vector<288x32xf32>
    %36 = tpu.matmul %33, %35, %cst_23 {dimension_numbers = #tpu.dot_dimension_numbers<[1], [0], [0], [1], [0, 0, 1, 1], [], []>} : vector<288x4xbf16>, vector<4x32xbf16>, vector<288x32xf32> -> vector<288x32xf32>
    %37 = arith.addf %32, %36 : vector<288x32xf32>
    %38 = vector.extract_strided_slice %1 {offsets = [37, 0], sizes = [288, 4], strides = [1, 1]} : vector<326x4xbf16> to vector<288x4xbf16>
    %c7 = arith.constant 7 : index
    %c0_24 = arith.constant 0 : index
    %c0_25 = arith.constant 0 : index
    %39 = vector.load %arg3[%c7, %c0_24, %c0_25] : memref<9x4x32xbf16, #tpu.memory_space<vmem>>, vector<1x4x32xbf16>
    %40 = vector.shape_cast %39 : vector<1x4x32xbf16> to vector<4x32xbf16>
    %cst_26 = arith.constant dense<0.000000e+00> : vector<288x32xf32>
    %41 = tpu.matmul %38, %40, %cst_26 {dimension_numbers = #tpu.dot_dimension_numbers<[1], [0], [0], [1], [0, 0, 1, 1], [], []>} : vector<288x4xbf16>, vector<4x32xbf16>, vector<288x32xf32> -> vector<288x32xf32>
    %42 = arith.addf %37, %41 : vector<288x32xf32>
    %43 = vector.extract_strided_slice %1 {offsets = [38, 0], sizes = [288, 4], strides = [1, 1]} : vector<326x4xbf16> to vector<288x4xbf16>
    %c8 = arith.constant 8 : index
    %c0_27 = arith.constant 0 : index
    %c0_28 = arith.constant 0 : index
    %44 = vector.load %arg3[%c8, %c0_27, %c0_28] : memref<9x4x32xbf16, #tpu.memory_space<vmem>>, vector<1x4x32xbf16>
    %45 = vector.shape_cast %44 : vector<1x4x32xbf16> to vector<4x32xbf16>
    %cst_29 = arith.constant dense<0.000000e+00> : vector<288x32xf32>
    %46 = tpu.matmul %43, %45, %cst_29 {dimension_numbers = #tpu.dot_dimension_numbers<[1], [0], [0], [1], [0, 0, 1, 1], [], []>} : vector<288x4xbf16>, vector<4x32xbf16>, vector<288x32xf32> -> vector<288x32xf32>
    %47 = arith.addf %42, %46 : vector<288x32xf32>
    %c0_30 = arith.constant 0 : index
    %c0_31 = arith.constant 0 : index
    %48 = vector.load %arg4[%c0_30, %c0_31] : memref<1x32xf32, #tpu.memory_space<vmem>>, vector<1x32xf32>
    %49 = vector.broadcast %48 : vector<1x32xf32> to vector<288x32xf32>
    %50 = arith.addf %47, %49 : vector<288x32xf32>
    %cst_32 = arith.constant 0.000000e+00 : f32
    %51 = vector.broadcast %cst_32 : f32 to vector<288x32xf32>
    %52 = arith.maximumf %50, %51 : vector<288x32xf32>
    %53 = arith.truncf %52 : vector<288x32xf32> to vector<288x32xbf16>
    %c0_33 = arith.constant 0 : index
    %c0_34 = arith.constant 0 : index
    %54 = vector.load %arg5[%c0_33, %c0_34] : memref<32x17xbf16, #tpu.memory_space<vmem>>, vector<32x17xbf16>
    %cst_35 = arith.constant dense<0.000000e+00> : vector<288x17xf32>
    %55 = tpu.matmul %53, %54, %cst_35 {dimension_numbers = #tpu.dot_dimension_numbers<[1], [0], [0], [1], [0, 0, 1, 1], [], []>} : vector<288x32xbf16>, vector<32x17xbf16>, vector<288x17xf32> -> vector<288x17xf32>
    %c0_36 = arith.constant 0 : index
    %c0_37 = arith.constant 0 : index
    %c0_38 = arith.constant 0 : index
    %56 = vector.load %arg2[%c0_36, %c0_37, %c0_38] : memref<1x326x4xbf16, #tpu.memory_space<vmem>>, vector<1x326x4xbf16>
    %57 = vector.shape_cast %56 : vector<1x326x4xbf16> to vector<326x4xbf16>
    %cst_39 = arith.constant 0.000000e+00 : f32
    %58 = vector.broadcast %cst_39 : f32 to vector<288x32xf32>
    %59 = vector.extract_strided_slice %57 {offsets = [0, 0], sizes = [288, 4], strides = [1, 1]} : vector<326x4xbf16> to vector<288x4xbf16>
    %c0_40 = arith.constant 0 : index
    %c0_41 = arith.constant 0 : index
    %c0_42 = arith.constant 0 : index
    %60 = vector.load %arg3[%c0_40, %c0_41, %c0_42] : memref<9x4x32xbf16, #tpu.memory_space<vmem>>, vector<1x4x32xbf16>
    %61 = vector.shape_cast %60 : vector<1x4x32xbf16> to vector<4x32xbf16>
    %cst_43 = arith.constant dense<0.000000e+00> : vector<288x32xf32>
    %62 = tpu.matmul %59, %61, %cst_43 {dimension_numbers = #tpu.dot_dimension_numbers<[1], [0], [0], [1], [0, 0, 1, 1], [], []>} : vector<288x4xbf16>, vector<4x32xbf16>, vector<288x32xf32> -> vector<288x32xf32>
    %63 = arith.addf %58, %62 : vector<288x32xf32>
    %64 = vector.extract_strided_slice %57 {offsets = [1, 0], sizes = [288, 4], strides = [1, 1]} : vector<326x4xbf16> to vector<288x4xbf16>
    %c1_44 = arith.constant 1 : index
    %c0_45 = arith.constant 0 : index
    %c0_46 = arith.constant 0 : index
    %65 = vector.load %arg3[%c1_44, %c0_45, %c0_46] : memref<9x4x32xbf16, #tpu.memory_space<vmem>>, vector<1x4x32xbf16>
    %66 = vector.shape_cast %65 : vector<1x4x32xbf16> to vector<4x32xbf16>
    %cst_47 = arith.constant dense<0.000000e+00> : vector<288x32xf32>
    %67 = tpu.matmul %64, %66, %cst_47 {dimension_numbers = #tpu.dot_dimension_numbers<[1], [0], [0], [1], [0, 0, 1, 1], [], []>} : vector<288x4xbf16>, vector<4x32xbf16>, vector<288x32xf32> -> vector<288x32xf32>
    %68 = arith.addf %63, %67 : vector<288x32xf32>
    %69 = vector.extract_strided_slice %57 {offsets = [2, 0], sizes = [288, 4], strides = [1, 1]} : vector<326x4xbf16> to vector<288x4xbf16>
    %c2_48 = arith.constant 2 : index
    %c0_49 = arith.constant 0 : index
    %c0_50 = arith.constant 0 : index
    %70 = vector.load %arg3[%c2_48, %c0_49, %c0_50] : memref<9x4x32xbf16, #tpu.memory_space<vmem>>, vector<1x4x32xbf16>
    %71 = vector.shape_cast %70 : vector<1x4x32xbf16> to vector<4x32xbf16>
    %cst_51 = arith.constant dense<0.000000e+00> : vector<288x32xf32>
    %72 = tpu.matmul %69, %71, %cst_51 {dimension_numbers = #tpu.dot_dimension_numbers<[1], [0], [0], [1], [0, 0, 1, 1], [], []>} : vector<288x4xbf16>, vector<4x32xbf16>, vector<288x32xf32> -> vector<288x32xf32>
    %73 = arith.addf %68, %72 : vector<288x32xf32>
    %74 = vector.extract_strided_slice %57 {offsets = [18, 0], sizes = [288, 4], strides = [1, 1]} : vector<326x4xbf16> to vector<288x4xbf16>
    %c3_52 = arith.constant 3 : index
    %c0_53 = arith.constant 0 : index
    %c0_54 = arith.constant 0 : index
    %75 = vector.load %arg3[%c3_52, %c0_53, %c0_54] : memref<9x4x32xbf16, #tpu.memory_space<vmem>>, vector<1x4x32xbf16>
    %76 = vector.shape_cast %75 : vector<1x4x32xbf16> to vector<4x32xbf16>
    %cst_55 = arith.constant dense<0.000000e+00> : vector<288x32xf32>
    %77 = tpu.matmul %74, %76, %cst_55 {dimension_numbers = #tpu.dot_dimension_numbers<[1], [0], [0], [1], [0, 0, 1, 1], [], []>} : vector<288x4xbf16>, vector<4x32xbf16>, vector<288x32xf32> -> vector<288x32xf32>
    %78 = arith.addf %73, %77 : vector<288x32xf32>
    %79 = vector.extract_strided_slice %57 {offsets = [19, 0], sizes = [288, 4], strides = [1, 1]} : vector<326x4xbf16> to vector<288x4xbf16>
    %c4_56 = arith.constant 4 : index
    %c0_57 = arith.constant 0 : index
    %c0_58 = arith.constant 0 : index
    %80 = vector.load %arg3[%c4_56, %c0_57, %c0_58] : memref<9x4x32xbf16, #tpu.memory_space<vmem>>, vector<1x4x32xbf16>
    %81 = vector.shape_cast %80 : vector<1x4x32xbf16> to vector<4x32xbf16>
    %cst_59 = arith.constant dense<0.000000e+00> : vector<288x32xf32>
    %82 = tpu.matmul %79, %81, %cst_59 {dimension_numbers = #tpu.dot_dimension_numbers<[1], [0], [0], [1], [0, 0, 1, 1], [], []>} : vector<288x4xbf16>, vector<4x32xbf16>, vector<288x32xf32> -> vector<288x32xf32>
    %83 = arith.addf %78, %82 : vector<288x32xf32>
    %84 = vector.extract_strided_slice %57 {offsets = [20, 0], sizes = [288, 4], strides = [1, 1]} : vector<326x4xbf16> to vector<288x4xbf16>
    %c5_60 = arith.constant 5 : index
    %c0_61 = arith.constant 0 : index
    %c0_62 = arith.constant 0 : index
    %85 = vector.load %arg3[%c5_60, %c0_61, %c0_62] : memref<9x4x32xbf16, #tpu.memory_space<vmem>>, vector<1x4x32xbf16>
    %86 = vector.shape_cast %85 : vector<1x4x32xbf16> to vector<4x32xbf16>
    %cst_63 = arith.constant dense<0.000000e+00> : vector<288x32xf32>
    %87 = tpu.matmul %84, %86, %cst_63 {dimension_numbers = #tpu.dot_dimension_numbers<[1], [0], [0], [1], [0, 0, 1, 1], [], []>} : vector<288x4xbf16>, vector<4x32xbf16>, vector<288x32xf32> -> vector<288x32xf32>
    %88 = arith.addf %83, %87 : vector<288x32xf32>
    %89 = vector.extract_strided_slice %57 {offsets = [36, 0], sizes = [288, 4], strides = [1, 1]} : vector<326x4xbf16> to vector<288x4xbf16>
    %c6_64 = arith.constant 6 : index
    %c0_65 = arith.constant 0 : index
    %c0_66 = arith.constant 0 : index
    %90 = vector.load %arg3[%c6_64, %c0_65, %c0_66] : memref<9x4x32xbf16, #tpu.memory_space<vmem>>, vector<1x4x32xbf16>
    %91 = vector.shape_cast %90 : vector<1x4x32xbf16> to vector<4x32xbf16>
    %cst_67 = arith.constant dense<0.000000e+00> : vector<288x32xf32>
    %92 = tpu.matmul %89, %91, %cst_67 {dimension_numbers = #tpu.dot_dimension_numbers<[1], [0], [0], [1], [0, 0, 1, 1], [], []>} : vector<288x4xbf16>, vector<4x32xbf16>, vector<288x32xf32> -> vector<288x32xf32>
    %93 = arith.addf %88, %92 : vector<288x32xf32>
    %94 = vector.extract_strided_slice %57 {offsets = [37, 0], sizes = [288, 4], strides = [1, 1]} : vector<326x4xbf16> to vector<288x4xbf16>
    %c7_68 = arith.constant 7 : index
    %c0_69 = arith.constant 0 : index
    %c0_70 = arith.constant 0 : index
    %95 = vector.load %arg3[%c7_68, %c0_69, %c0_70] : memref<9x4x32xbf16, #tpu.memory_space<vmem>>, vector<1x4x32xbf16>
    %96 = vector.shape_cast %95 : vector<1x4x32xbf16> to vector<4x32xbf16>
    %cst_71 = arith.constant dense<0.000000e+00> : vector<288x32xf32>
    %97 = tpu.matmul %94, %96, %cst_71 {dimension_numbers = #tpu.dot_dimension_numbers<[1], [0], [0], [1], [0, 0, 1, 1], [], []>} : vector<288x4xbf16>, vector<4x32xbf16>, vector<288x32xf32> -> vector<288x32xf32>
    %98 = arith.addf %93, %97 : vector<288x32xf32>
    %99 = vector.extract_strided_slice %57 {offsets = [38, 0], sizes = [288, 4], strides = [1, 1]} : vector<326x4xbf16> to vector<288x4xbf16>
    %c8_72 = arith.constant 8 : index
    %c0_73 = arith.constant 0 : index
    %c0_74 = arith.constant 0 : index
    %100 = vector.load %arg3[%c8_72, %c0_73, %c0_74] : memref<9x4x32xbf16, #tpu.memory_space<vmem>>, vector<1x4x32xbf16>
    %101 = vector.shape_cast %100 : vector<1x4x32xbf16> to vector<4x32xbf16>
    %cst_75 = arith.constant dense<0.000000e+00> : vector<288x32xf32>
    %102 = tpu.matmul %99, %101, %cst_75 {dimension_numbers = #tpu.dot_dimension_numbers<[1], [0], [0], [1], [0, 0, 1, 1], [], []>} : vector<288x4xbf16>, vector<4x32xbf16>, vector<288x32xf32> -> vector<288x32xf32>
    %103 = arith.addf %98, %102 : vector<288x32xf32>
    %c0_76 = arith.constant 0 : index
    %c0_77 = arith.constant 0 : index
    %104 = vector.load %arg4[%c0_76, %c0_77] : memref<1x32xf32, #tpu.memory_space<vmem>>, vector<1x32xf32>
    %105 = vector.broadcast %104 : vector<1x32xf32> to vector<288x32xf32>
    %106 = arith.addf %103, %105 : vector<288x32xf32>
    %cst_78 = arith.constant 0.000000e+00 : f32
    %107 = vector.broadcast %cst_78 : f32 to vector<288x32xf32>
    %108 = arith.maximumf %106, %107 : vector<288x32xf32>
    %109 = arith.truncf %108 : vector<288x32xf32> to vector<288x32xbf16>
    %c0_79 = arith.constant 0 : index
    %c0_80 = arith.constant 0 : index
    %110 = vector.load %arg6[%c0_79, %c0_80] : memref<32x17xbf16, #tpu.memory_space<vmem>>, vector<32x17xbf16>
    %cst_81 = arith.constant dense<0.000000e+00> : vector<288x17xf32>
    %111 = tpu.matmul %109, %110, %cst_81 {dimension_numbers = #tpu.dot_dimension_numbers<[1], [0], [0], [1], [0, 0, 1, 1], [], []>} : vector<288x32xbf16>, vector<32x17xbf16>, vector<288x17xf32> -> vector<288x17xf32>
    %112 = arith.addf %55, %111 : vector<288x17xf32>
    %c0_82 = arith.constant 0 : index
    %c0_83 = arith.constant 0 : index
    %113 = vector.load %arg7[%c0_82, %c0_83] : memref<1x17xf32, #tpu.memory_space<vmem>>, vector<1x17xf32>
    %114 = vector.broadcast %113 : vector<1x17xf32> to vector<288x17xf32>
    %115 = arith.addf %112, %114 : vector<288x17xf32>
    %c0_84 = arith.constant 0 : index
    %c0_85 = arith.constant 0 : index
    %c0_86 = arith.constant 0 : index
    %116 = vector.load %arg8[%c0_84, %c0_85, %c0_86] : memref<1x288x17xf32, #tpu.memory_space<vmem>>, vector<1x288x17xf32>
    %117 = vector.shape_cast %116 : vector<1x288x17xf32> to vector<288x17xf32>
    %118 = vector.shape_cast %115 : vector<288x17xf32> to vector<1x288x17xf32>
    tpu.vector_store %arg8[%c0_84, %c0_85, %c0_86], %118 {strides = array<i32>} : memref<1x288x17xf32, #tpu.memory_space<vmem>>, vector<1x288x17xf32>,
    return
  }
  func.func @transform_0(%arg0: i32) -> (i32, i32, i32) {
    %c0_i32 = arith.constant 0 : i32
    %c0_i32_0 = arith.constant 0 : i32
    %c0_i32_1 = arith.constant 0 : i32
    return %arg0, %c0_i32, %c0_i32_0 : i32, i32, i32
  }
  func.func @transform_1(%arg0: i32) -> (i32, i32, i32) {
    %c0_i32 = arith.constant 0 : i32
    %c0_i32_0 = arith.constant 0 : i32
    %c0_i32_1 = arith.constant 0 : i32
    return %arg0, %c0_i32, %c0_i32_0 : i32, i32, i32
  }
  func.func @transform_2(%arg0: i32) -> (i32, i32, i32) {
    %c0_i32 = arith.constant 0 : i32
    %c0_i32_0 = arith.constant 0 : i32
    %c0_i32_1 = arith.constant 0 : i32
    %c0_i32_2 = arith.constant 0 : i32
    return %c0_i32, %c0_i32_0, %c0_i32_1 : i32, i32, i32
  }
  func.func @transform_3(%arg0: i32) -> (i32, i32) {
    %c0_i32 = arith.constant 0 : i32
    %c0_i32_0 = arith.constant 0 : i32
    %c0_i32_1 = arith.constant 0 : i32
    return %c0_i32, %c0_i32_0 : i32, i32
  }
  func.func @transform_4(%arg0: i32) -> (i32, i32) {
    %c0_i32 = arith.constant 0 : i32
    %c0_i32_0 = arith.constant 0 : i32
    %c0_i32_1 = arith.constant 0 : i32
    return %c0_i32, %c0_i32_0 : i32, i32
  }
  func.func @transform_5(%arg0: i32) -> (i32, i32) {
    %c0_i32 = arith.constant 0 : i32
    %c0_i32_0 = arith.constant 0 : i32
    %c0_i32_1 = arith.constant 0 : i32
    return %c0_i32, %c0_i32_0 : i32, i32
  }
  func.func @transform_6(%arg0: i32) -> (i32, i32) {
    %c0_i32 = arith.constant 0 : i32
    %c0_i32_0 = arith.constant 0 : i32
    %c0_i32_1 = arith.constant 0 : i32
    return %c0_i32, %c0_i32_0 : i32, i32
  }
  func.func @transform_7(%arg0: i32) -> (i32, i32, i32) {
    %c0_i32 = arith.constant 0 : i32
    %c0_i32_0 = arith.constant 0 : i32
    %c0_i32_1 = arith.constant 0 : i32
    return %arg0, %c0_i32, %c0_i32_0 : i32, i32, i32
  }
}

</mosaic_0001>

<bundles_post_ra>
// kernel: multi_task_forward.1
= control target key start
LH: loop header
LB: loop body
LE: loop exit
PB: predicated region body
PF: predicated region fallthrough
CT: control target
= control target key end

     0   :  { %s8525_s24 = smov 0   ;;  %s11438_s0 = inlined_call_operand.vmem [shape: bf16[2,326,4], index: 0, kind: input, shape index: {}]   ;;  %s11439_s1 = inlined_call_operand.vmem [shape: bf16[2,326,4], index: 1, kind: input, shape index: {}]   ;;  %s11440_s2 = inlined_call_operand.vmem [shape: bf16[9,4,32], index: 2, kind: input, shape index: {}]   ;;  %s11441_s3 = inlined_call_operand.vmem [shape: f32[1,32], index: 3, kind: input, shape index: {}]   ;;  %s11442_s4 = inlined_call_operand.vmem [shape: bf16[32,17], index: 4, kind: input, shape index: {}]   ;;  %s11443_s5 = inlined_call_operand.vmem [shape: bf16[32,17], index: 5, kind: input, shape index: {}]   ;;  %s11444_s6 = inlined_call_operand.vmem [shape: f32[1,17], index: 6, kind: input, shape index: {}]   ;;  %s11445_s7 = inlined_call_operand.vmem [shape: f32[2,288,17], index: 7, kind: output, shape index: {}]  }
   0x1 LB: > { %s6781_s25 = sadd.s32 4294967295, %s8483_s24   ;;  %p6785_p0 = scmp.ge.s32.totalorder %s8483_s24, 1  ;;  %s8483_s24 = sphi %s8525_s24, %s17_s24  }
   0x2   : > { %p247_p1 = scmp.lt.s32.totalorder %s8483_s24, 3 }
   0x4   : > { %p248_p2 = pnand %p6785_p0, %p247_p1 }
   0x6   : > { %251 = sbr.rel (%p248_p2) target bundleno = 1080 (0x438), region = 48 }
   0xb   : > { %v341_v0 = vld [vmem:[%s11440_s2] sm:$0x3]  ;;  %vm641_vm0 = vcmask 1041408   ;;  %p284_p3 = scmp.lt.s32.totalorder %s6781_s25, 1  ;;  %v8543_v2 = vld [vmem:[%s11440_s2 + $0x2] sm:$0x3] }
   0xc   : > { %8358 = vmatprep.subr.msk.bf16.mxu1 %vm641_vm0, %v341_v0  ;;  %v8538_v1 = vsel %vm641_vm0, %v341_v0, 0  ;;  %8357 = vmatprep.subr.msk.bf16.mxu0 %vm641_vm0, %v8543_v2  ;;  %v8552_v3 = vsel %vm641_vm0, %v8543_v2, 0  ;;  %v6845_v4 = vld [vmem:[%s11440_s2 + $0x4] sm:$0x3]  ;;  %v6864_v5 = vld [vmem:[%s11440_s2 + $0x6] sm:$0x3] }
   0xd   : > { %11595 = vst [vmem:[#allocation2_spill] sm:$0xff] %v8538_v1  ;;  %7632 = vmatpush3.bf16.msra.mxu1 %v8538_v1  ;;  %s11931_s25 = smov (!%p284_p3, %s6781_s25), 1  ;;  %11596 = vst [vmem:[#allocation3_spill] sm:$0xff] %v8552_v3  ;;  %7594 = vmatpush3.bf16.msra.mxu0 %v8552_v3  ;;  %vm586_vm1 = vcmask 31744   ;;  %vm437_vm2 = vsmask.f32 7424 }
   0xe   : > { %8360 = vmatprep.subr.msk.bf16.mxu1 %vm641_vm0, %v6864_v5  ;;  %s8375_s11 = smul.u32 164, %s11931_s25  ;;  %8359 = vmatprep.subr.msk.bf16.mxu0 %vm641_vm0, %v6845_v4  ;;  %v8577_v7 = vld [vmem:[%s11440_s2 + $0xa] sm:$0x3]  ;;  %v8583_v9 = vsel %vm641_vm0, %v6864_v5, 0  ;;  %v8616_v22 = vsel %vm641_vm0, %v6845_v4, 0  ;;  %vm1040_vm3 = vcmask 1046528  }
   0xf   : > { %11597 = vst [vmem:[#allocation4_spill] sm:$0xff] %v8583_v9  ;;  %11598 = vst [vmem:[#allocation5_spill] sm:$0xff] %v8616_v22  ;;  %v8647_v35 = vld [vmem:[%s11440_s2 + $0x8] sm:$0x3]  ;;  %vm1942_vm4 = vcmask 1045504   ;;  %vm2844_vm7 = vcmask 1044480  }
  0x10   : > { %s8569_s14 = scalar_lea.vmem %s11438_s0, %s8375_s11  ;;  %s8718_s21 = scalar_lea.vmem %s11439_s1, %s8375_s11  ;;  %vm1584_vm5 = vsmask.f32 6400  ;;  %vm2486_vm6 = vsmask.f32 5376  ;;  %vm6159_vm8 = vcmask 261120   ;;  %vm6677_vm9 = vcmask 138240  }
  0x11   : > { %v8572_v6 = vld [vmem:[%s8569_s14] sm:$0xff]   ;;  %v8580_v8 = vld [vmem:[%s8569_s14 + $0x8] sm:$0xff]   ;;  %v8594_v14 = vld [vmem:[%s8569_s14 + $0x10] sm:$0xff]   ;;  %s8376_s15 = smul.u32 288, %s11931_s25 }
  0x12   : > { %7633 = vmatprep.mubr.msk.bf16.mxu1 %vm586_vm1, %v8572_v6  ;;  %v439_v10 = vshrl.u32 %v8572_v6, 16  ;;  %v441_v11 = vshll.u32 %v8572_v6, 16  ;;  %v446_v12 = vshll.u32 %v8580_v8, 16  ;;  %v450_v13 = vshrl.u32 %v8580_v8, 16  ;;  %v8597_v15 = vld [vmem:[%s8569_s14 + $0x18] sm:$0xff]   ;;  %v8601_v17 = vld [vmem:[%s8569_s14 + $0x20] sm:$0xff]  }
  0x13   : > { %7634 = vmatmul.mubr.msk.bf16.vlgmr.msra.gmra.mxu1 %vm586_vm1, %v8580_v8  ;;  %v8606_v19 = vshll.u32 %v8594_v14, 16  ;;  %v8611_v20 = vshrl.u32 %v8594_v14, 16  ;;  %v8619_v23 = vshll.u32 %v8597_v15, 16  ;;  %v8622_v24 = vshll.u32 %v8601_v17, 16  ;;  %v8625_v25 = vld [vmem:[%s8569_s14 + $0x28] sm:$0xff]   ;;  %v8652_v37 = vld [vmem:[%s8569_s14 + $0x30] sm:$0xff]   ;;  %s11307_s19 = scalar_lea.vmem %s11445_s7, %s8376_s15 }
  0x14   : > { %v443_v16 = vrot.slane %v441_v11, 1  ;;  %7708 = vmatpush3.bf16.msra.mxu1 %v8583_v9  ;;  %v448_v18 = vrot.slane %v446_v12, 1  ;;  %7637 = vmatprep.mubr.msk.bf16.mxu1 %vm586_vm1, %v8594_v14  ;;  %v8631_v28 = vshrl.u32 %v8597_v15, 16  ;;  %v8636_v31 = vshrl.u32 %v8601_v17, 16  ;;  %v8665_v42 = vld [vmem:[%s8569_s14 + $0x38] sm:$0xff]   ;;  %v8686_v50 = vld [vmem:[%s8569_s14 + $0x40] sm:$0xff]  }
  0x15   : > { %8362 = vmatprep.subr.msk.bf16.mxu1 %vm641_vm0, %v8577_v7  ;;  %v456_v27 = vrot.slane %v8606_v19, 1  ;;  %v464_v30 = vrot.slane %v8619_v23, 1  ;;  %v8639_v32 = vshll.u32 %v8625_v25, 16  ;;  %v472_v36 = vrot.slane %v8622_v24, 1  ;;  %v8697_v54 = vld [vmem:[%s8569_s14 + $0x48] sm:$0xff]   ;;  %v8723_v62 = vld [vmem:[%s8569_s14 + $0x50] sm:$0xff]  }
  0x16   : > { %v444_v21 = vor.u32 %v443_v16, %v439_v10  ;;  %v452_v26 = vor.u32 %v450_v13, %v448_v18  ;;  %v8670_v43 = vshll.u32 %v8652_v37, 16  ;;  %v8674_v45 = vshrl.u32 %v8625_v25, 16  ;;  %v8734_v5 = vld [vmem:[%s8569_s14 + $0x58] sm:$0xff]   ;;  %v8851_v9 = vld [vmem:[%s8569_s14 + $0x90] sm:$0xf] }
  0x17   : > { %v460_v34 = vor.u32 %v8611_v20, %v456_v27  ;;  %v468_v39 = vor.u32 %v8631_v28, %v464_v30  ;;  %v476_v40 = vor.u32 %v8636_v31, %v472_v36  ;;  %v480_v41 = vrot.slane %v8639_v32, 1 }
  0x18   : > { %v449_v29 = vsel %vm437_vm2, %v444_v21, %v448_v18  ;;  %v457_v33 = vsel %vm437_vm2, %v452_v26, %v456_v27  ;;  %v8678_v47 = vshrl.u32 %v8652_v37, 16  ;;  %v8681_v48 = vshll.u32 %v8665_v42, 16 }
  0x19   : > { %7595 = vmatprep.mubr.msk.bf16.mxu0 %vm586_vm1, %v449_v29  ;;  %v465_v38 = vsel %vm437_vm2, %v460_v34, %v464_v30  ;;  %v473_v44 = vsel %vm437_vm2, %v468_v39, %v472_v36  ;;  %v481_v46 = vsel %vm437_vm2, %v476_v40, %v480_v41  ;;  %v488_v49 = vrot.slane %v8670_v43, 1  ;;  %v8753_v29 = vld [vmem:[%s8569_s14 + $0x60] sm:$0xff]   ;;  %v8764_v36 = vld [vmem:[%s8569_s14 + $0x68] sm:$0xff]  }
  0x1a   : > { %7596 = vmatmul.mubr.msk.bf16.vlgmr.msra.gmra.mxu0 %vm586_vm1, %v457_v33  ;;  %v484_v51 = vor.u32 %v8674_v45, %v480_v41  ;;  %v496_v53 = vrot.slane %v8681_v48, 1  ;;  %v8700_v55 = vshll.u32 %v8686_v50, 16  ;;  %v8704_v57 = vshrl.u32 %v8665_v42, 16 }
  0x1b   : > { %7670 = vmatpush3.bf16.msra.mxu0 %v8616_v22  ;;  %7638 = vmatmul.mubr.msk.bf16.gmra.mxu1 %vm586_vm1, %v8597_v15  ;;  %v492_v52 = vor.u32 %v8678_v47, %v488_v49  ;;  %v8708_v59 = vshrl.u32 %v8686_v50, 16  ;;  %v8711_v60 = vshll.u32 %v8697_v54, 16  ;;  %v8737_v10 = vshll.u32 %v8723_v62, 16 }
  0x1c   : > { %7599 = vmatprep.mubr.msk.bf16.mxu0 %vm586_vm1, %v465_v38  ;;  %7641 = vmatprep.mubr.msk.bf16.mxu1 %vm586_vm1, %v8601_v17  ;;  %v489_v56 = vsel %vm437_vm2, %v484_v51, %v488_v49  ;;  %v504_v61 = vrot.slane %v8700_v55, 1  ;;  %v500_v63 = vor.u32 %v8704_v57, %v496_v53  ;;  %v8741_v16 = vshrl.u32 %v8697_v54, 16 }
  0x1d   : > { %8361 = vmatprep.subr.msk.bf16.mxu0 %vm641_vm0, %v8647_v35  ;;  %v497_v58 = vsel %vm437_vm2, %v492_v52, %v496_v53  ;;  %v512_v4 = vrot.slane %v8711_v60, 1  ;;  %v8745_v21 = vshrl.u32 %v8723_v62, 16  ;;  %v8748_v26 = vshll.u32 %v8734_v5, 16  ;;  %v8791_v52 = vld [vmem:[%s8569_s14 + $0x70] sm:$0xff]  }
  0x1e   : > { %v508_v0 = vor.u32 %v8708_v59, %v504_v61  ;;  %v505_v11 = vsel %vm437_vm2, %v500_v63, %v504_v61  ;;  %v520_v27 = vrot.slane %v8737_v10, 1  ;;  %v8768_v38 = vrot.slane %v446_v12, 2  ;;  %v8804_v61 = vld [vmem:[%s8569_s14 + $0x78] sm:$0xff]  }
  0x1f   : > { %v516_v30 = vor.u32 %v8741_v16, %v512_v4  ;;  %v528_v34 = vrot.slane %v8748_v26, 1  ;;  %v8771_v39 = vshll.u32 %v8753_v29, 16  ;;  %v8775_v41 = vshrl.u32 %v8734_v5, 16 }
  0x20   : > { %v513_v18 = vsel %vm437_vm2, %v508_v0, %v512_v4  ;;  %v524_v33 = vor.u32 %v8745_v21, %v520_v27  ;;  %v8782_v49 = vshll.u32 %v8764_v36, 16  ;;  %v8786_v12 = vrot.slane %v450_v13, 1 }
  0x21   : > { %v521_v40 = vsel %vm437_vm2, %v516_v30, %v520_v27  ;;  %v536_v51 = vrot.slane %v8771_v39, 1  ;;  %v8807_v63 = vshll.u32 %v8791_v52, 16  ;;  %v8811_v4 = vshrl.u32 %v8764_v36, 16 }
  0x22   : > { %7600 = vmatmul.mubr.msk.bf16.gmra.mxu0 %vm586_vm1, %v473_v44  ;;  %v529_v44 = vsel %vm437_vm2, %v524_v33, %v528_v34  ;;  %11599 = vst [vmem:[#allocation6_spill] sm:$0xff] %v8782_v49  ;;  %v8818_v27 = vshll.u32 %v8804_v61, 16  ;;  %v8823_v33 = vld [vmem:[%s8569_s14 + $0x80] sm:$0xff]   ;;  %v1042_v22 = vrot.slane %v8580_v8, 1  ;;  %v1044_v3 = vrot.slane %v8594_v14, 1 }
  0x23   : > { %7642 = vmatmul.mubr.msk.bf16.gmra.mxu1 %vm586_vm1, %v8625_v25  ;;  %7603 = vmatprep.mubr.msk.bf16.mxu0 %vm586_vm1, %v481_v46  ;;  %v8779_v46 = vshrl.u32 %v8753_v29, 16  ;;  %11600 = vst [vmem:[#allocation7_spill] sm:$0xff] %v8807_v63  ;;  %v552_v30 = vrot.slane %v8807_v63, 1 }
  0x24   : > { %7645 = vmatprep.mubr.msk.bf16.mxu1 %vm586_vm1, %v8652_v37  ;;  %11602 = vst [vmem:[#allocation9_spill] sm:$0xff] %v8818_v27 }
  0x25   : > { %v540_v13 = vor.u32 %v8779_v46, %v536_v51 }
  0x2a   : > { %7604 = vmatmul.mubr.msk.bf16.gmra.mxu0 %vm586_vm1, %v489_v56  ;;  %v532_v56 = vor.u32 %v8775_v41, %v528_v34 }
  0x2b   : > { %7646 = vmatmul.mubr.msk.bf16.gmra.mxu1 %vm586_vm1, %v8665_v42  ;;  %7607 = vmatprep.mubr.msk.bf16.mxu0 %vm586_vm1, %v497_v58  ;;  %v544_v58 = vrot.slane %v8782_v49, 1 }
  0x2c   : > { %7649 = vmatprep.mubr.msk.bf16.mxu1 %vm586_vm1, %v8686_v50  ;;  %v537_v0 = vsel %vm437_vm2, %v532_v56, %v536_v51  ;;  %v8834_v51 = vld [vmem:[%s8569_s14 + $0x88] sm:$0xff]   ;;  %v8837_v56 = vshll.u32 %v8823_v33, 16 }
  0x2d   : > { %v548_v34 = vor.u32 %v8811_v4, %v544_v58  ;;  %v8848_v53 = vshll.u32 %v8834_v51, 16 }
  0x2e   : > { %11603 = vst [vmem:[#allocation10_spill] sm:$0xff] %v8837_v56  ;;  %v568_v1 = vrot.slane %v8837_v56, 1 }
  0x2f   : > { %11606 = vst [vmem:[#allocation13_spill] sm:$0xff] %v8848_v53 }
  0x32   : > { %7608 = vmatmul.mubr.msk.bf16.gmra.mxu0 %vm586_vm1, %v505_v11  ;;  %v545_v11 = vsel %vm437_vm2, %v540_v13, %v544_v58  ;;  %v553_v13 = vsel %vm437_vm2, %v548_v34, %v552_v30  ;;  %v8845_v58 = vshrl.u32 %v8823_v33, 16  ;;  %v8861_v34 = vcombine.low %v8851_v9, %v8851_v9 }
  0x33   : > { %7650 = vmatmul.mubr.msk.bf16.gmra.mxu1 %vm586_vm1, %v8697_v54  ;;  %7611 = vmatprep.mubr.msk.bf16.mxu0 %vm586_vm1, %v513_v18  ;;  %v8815_v18 = vshrl.u32 %v8791_v52, 16 }
  0x34   : > { %7653 = vmatprep.mubr.msk.bf16.mxu1 %vm586_vm1, %v8723_v62  ;;  %11605 = vst [vmem:[#allocation12_spill] sm:$0xff] %v8845_v58  ;;  %v582_v56 = vshll.u32 %v8861_v34, 16 }
  0x35   : > { %11601 = vst [vmem:[#allocation8_spill] sm:$0xff] %v8815_v18 }
  0x3a   : > { %7612 = vmatmul.mubr.msk.bf16.gmra.mxu0 %vm586_vm1, %v521_v40  ;;  %v556_v40 = vor.u32 %v8815_v18, %v552_v30 }
  0x3b   : > { %7654 = vmatmul.mubr.msk.bf16.gmra.mxu1 %vm586_vm1, %v8734_v5  ;;  %7615 = vmatprep.mubr.msk.bf16.mxu0 %vm586_vm1, %v529_v44  ;;  %v560_v44 = vrot.slane %v8818_v27, 1 }
  0x3c   : > { %7657 = vmatprep.mubr.msk.bf16.mxu1 %vm586_vm1, %v8753_v29 }
  0x42   : > { %7616 = vmatmul.mubr.msk.bf16.gmra.mxu0 %vm586_vm1, %v537_v0  ;;  %v8841_v0 = vshrl.u32 %v8804_v61, 16 }
  0x43   : > { %7658 = vmatmul.mubr.msk.bf16.gmra.mxu1 %vm586_vm1, %v8764_v36  ;;  %7619 = vmatprep.mubr.msk.bf16.mxu0 %vm586_vm1, %v545_v11  ;;  %v561_v11 = vsel %vm437_vm2, %v556_v40, %v560_v44  ;;  %v572_v40 = vor.u32 %v8845_v58, %v568_v1  ;;  %v584_v58 = vrot.slane %v582_v56, 1  ;;  %v1056_v56 = vrot.slane %v8686_v50, 1 }
  0x44   : > { %7661 = vmatprep.mubr.msk.bf16.mxu1 %vm586_vm1, %v8791_v52  ;;  %11604 = vst [vmem:[#allocation11_spill] sm:$0xff] %v8841_v0  ;;  %v564_v30 = vor.u32 %v8841_v0, %v560_v44  ;;  %v8871_v44 = vshrl.u32 %v8834_v51, 16  ;;  %v1045_v0 = vsel %vm1040_vm3, %v1042_v22, %v1044_v3 }
  0x46   : > { %11607 = vst [vmem:[#allocation14_spill] sm:$0xff] %v8871_v44 }
  0x4a   : > { %7620 = vmatmul.mubr.msk.bf16.gmra.mxu0 %vm586_vm1, %v553_v13  ;;  %v576_v13 = vrot.slane %v8848_v53, 1 }
  0x4b   : > { %7662 = vmatmul.mubr.msk.bf16.gmra.mxu1 %vm586_vm1, %v8804_v61  ;;  %7623 = vmatprep.mubr.msk.bf16.mxu0 %vm586_vm1, %v561_v11  ;;  %v569_v11 = vsel %vm437_vm2, %v564_v30, %v568_v1  ;;  %v1046_v1 = vrot.slane %v8597_v15, 1  ;;  %v1041_v30 = vrot.slane %v8572_v6, 1  ;;  %v8897_v6 = vld [vmem:[%s11440_s2 + $0xe] sm:$0x3] }
  0x4c   : > { %7665 = vmatprep.mubr.msk.bf16.mxu1 %vm586_vm1, %v8823_v33  ;;  %v577_v27 = vsel %vm437_vm2, %v572_v40, %v576_v13  ;;  %v580_v53 = vor.u32 %v8871_v44, %v576_v13  ;;  %v1048_v40 = vrot.slane %v8601_v17, 1  ;;  %v1058_v13 = vrot.slane %v8697_v54, 1 }
  0x4d   : > { %v1043_v18 = vsel %vm1040_vm3, %v1041_v30, %v1042_v22  ;;  %v8909_v22 = vsel %vm641_vm0, %v8647_v35, 0  ;;  %v1054_v35 = vrot.slane %v8665_v42, 1 }
  0x4e   : > { %v585_v63 = vsel %vm437_vm2, %v580_v53, %v584_v58  ;;  %v1049_v49 = vsel %vm1040_vm3, %v1046_v1, %v1048_v40  ;;  %11609 = vst [vmem:[#allocation16_spill] sm:$0xff] %v8909_v22  ;;  %v1059_v30 = vsel %vm1040_vm3, %v1056_v56, %v1058_v13 }
  0x4f   : > { %v1057_v58 = vsel %vm1040_vm3, %v1054_v35, %v1056_v56 }
  0x52   : > { %7624 = vmatmul.mubr.msk.bf16.gmra.mxu0 %vm586_vm1, %v569_v11  ;;  %v1047_v11 = vsel %vm1040_vm3, %v1044_v3, %v1046_v1  ;;  %v1050_v3 = vrot.slane %v8625_v25, 1  ;;  %v1060_v1 = vrot.slane %v8723_v62, 1 }
  0x53   : > { %7666 = vmatmul.mubr.msk.bf16.gmra.mxu1 %vm586_vm1, %v8834_v51  ;;  %7627 = vmatprep.mubr.msk.bf16.mxu0 %vm586_vm1, %v577_v27  ;;  %v8891_v27 = vsel %vm641_vm0, %v8577_v7, 0  ;;  %v1052_v7 = vrot.slane %v8652_v37, 1 }
  0x54   : > { %7709 = vmatprep.mubr.msk.bf16.mxu1 %vm586_vm1, %v1045_v0  ;;  %11608 = vst [vmem:[#allocation15_spill] sm:$0xff] %v8891_v27  ;;  %v1051_v53 = vsel %vm1040_vm3, %v1048_v40, %v1050_v3  ;;  %v1061_v40 = vsel %vm1040_vm3, %v1058_v13, %v1060_v1  ;;  %v337_v13 = vld [vmem:[%s8569_s14 + $0x94] sm:$0xf] }
  0x5a   : > { %7628 = vmatmul.mubr.msk.bf16.gmra.mxu0 %vm586_vm1, %v585_v63  ;;  %v1053_v63 = vsel %vm1040_vm3, %v1050_v3, %v1052_v7 }
  0x5b   : > { %7710 = vmatmul.mubr.msk.bf16.vlgmr.msra.gmra.mxu1 %vm586_vm1, %v1047_v11  ;;  %7671 = vmatprep.mubr.msk.bf16.mxu0 %vm586_vm1, %v1043_v18  ;;  %v8917_v18 = vld [vmem:[%s11440_s2 + $0xc] sm:$0x3] }
  0x5c   : > { %7713 = vmatprep.mubr.msk.bf16.mxu1 %vm586_vm1, %v1049_v49  ;;  %7784 = vmatpush3.bf16.msra.mxu1 %v8891_v27  ;;  %v1589_v27 = vrot.slane %v8606_v19, 2 }
  0x5d   : > { %8364 = vmatprep.subr.msk.bf16.mxu1 %vm641_vm0, %v8897_v6 }
  0x62   : > { %7672 = vmatmul.mubr.msk.bf16.vlgmr.msra.gmra.mxu0 %vm586_vm1, %v1045_v0  ;;  %v1055_v0 = vsel %vm1040_vm3, %v1052_v7, %v1054_v35 }
  0x63   : > { %7746 = vmatpush3.bf16.msra.mxu0 %v8909_v22  ;;  %7714 = vmatmul.mubr.msk.bf16.gmra.mxu1 %vm586_vm1, %v1051_v53 }
  0x64   : > { %7675 = vmatprep.mubr.msk.bf16.mxu0 %vm586_vm1, %v1047_v11  ;;  %7717 = vmatprep.mubr.msk.bf16.mxu1 %vm586_vm1, %v1053_v63  ;;  %v1064_v11 = vrot.slane %v8753_v29, 1 }
  0x65   : > { %8363 = vmatprep.subr.msk.bf16.mxu0 %vm641_vm0, %v8917_v18 }
  0x6a   : > { %7676 = vmatmul.mubr.msk.bf16.gmra.mxu0 %vm586_vm1, %v1049_v49  ;;  %v1062_v49 = vrot.slane %v8734_v5, 1 }
  0x6b   : > { %7718 = vmatmul.mubr.msk.bf16.gmra.mxu1 %vm586_vm1, %v1055_v0  ;;  %7679 = vmatprep.mubr.msk.bf16.mxu0 %vm586_vm1, %v1051_v53  ;;  %v1066_v53 = vrot.slane %v8764_v36, 1 }
  0x6c   : > { %7721 = vmatprep.mubr.msk.bf16.mxu1 %vm586_vm1, %v1057_v58  ;;  %v1063_v3 = vsel %vm1040_vm3, %v1060_v1, %v1062_v49  ;;  %v1065_v7 = vsel %vm1040_vm3, %v1062_v49, %v1064_v11 }
  0x6d   : > { %v1067_v35 = vsel %vm1040_vm3, %v1064_v11, %v1066_v53 }
  0x72   : > { %7680 = vmatmul.mubr.msk.bf16.gmra.mxu0 %vm586_vm1, %v1053_v63  ;;  %v1068_v63 = vrot.slane %v8791_v52, 1 }
  0x73   : > { %7722 = vmatmul.mubr.msk.bf16.gmra.mxu1 %vm586_vm1, %v1059_v30  ;;  %7683 = vmatprep.mubr.msk.bf16.mxu0 %vm586_vm1, %v1055_v0  ;;  %v1070_v0 = vrot.slane %v8804_v61, 1 }
  0x74   : > { %7725 = vmatprep.mubr.msk.bf16.mxu1 %vm586_vm1, %v1061_v40  ;;  %v1069_v56 = vsel %vm1040_vm3, %v1066_v53, %v1068_v63 }
  0x75   : > { %v1071_v1 = vsel %vm1040_vm3, %v1068_v63, %v1070_v0 }
  0x7a   : > { %7684 = vmatmul.mubr.msk.bf16.gmra.mxu0 %vm586_vm1, %v1057_v58  ;;  %v1072_v58 = vrot.slane %v8823_v33, 1 }
  0x7b   : > { %7726 = vmatmul.mubr.msk.bf16.gmra.mxu1 %vm586_vm1, %v1063_v3  ;;  %7687 = vmatprep.mubr.msk.bf16.mxu0 %vm586_vm1, %v1059_v30  ;;  %v8962_v30 = vcombine.low %v8851_v9, %v337_v13  ;;  %v1588_v13 = vrot.slane %v8611_v20, 1 }
  0x7c   : > { %7729 = vmatprep.mubr.msk.bf16.mxu1 %vm586_vm1, %v1065_v7  ;;  %v1073_v49 = vsel %vm1040_vm3, %v1070_v0, %v1072_v58  ;;  %v1944_v0 = vrot.slane %v8594_v14, 2 }
  0x7d   : > { %11610 = vst [vmem:[#allocation17_spill] sm:$0xff] %v8962_v30  ;;  %v1356_v11 = vrot.slane %v8962_v30, 1  ;;  %v1590_v14 = vor.u32 %v1589_v27, %v1588_v13 }
  0x82   : > { %7688 = vmatmul.mubr.msk.bf16.gmra.mxu0 %vm586_vm1, %v1061_v40  ;;  %v1074_v40 = vrot.slane %v8834_v51, 1 }
  0x83   : > { %7730 = vmatmul.mubr.msk.bf16.gmra.mxu1 %vm586_vm1, %v1067_v35  ;;  %7691 = vmatprep.mubr.msk.bf16.mxu0 %vm586_vm1, %v1063_v3  ;;  %v8972_v3 = vld [vmem:[%s8569_s14 + $0x98] sm:$0xf] }
  0x84   : > { %7733 = vmatprep.mubr.msk.bf16.mxu1 %vm586_vm1, %v1069_v56  ;;  %11611 = vst [vmem:[#allocation18_spill] sm:$0xff] %v8972_v3  ;;  %v1075_v53 = vsel %vm1040_vm3, %v1072_v58, %v1074_v40  ;;  %v8977_v9 = vcombine.low %v8972_v3, %v8972_v3 }
  0x86   : > { %v1358_v63 = vrot.slane %v8977_v9, 1 }
  0x88   : > { %v1359_v58 = vsel %vm1040_vm3, %v1356_v11, %v1358_v63  ;;  %v1948_v63 = vrot.slane %v8601_v17, 2 }
  0x8a   : > { %7692 = vmatmul.mubr.msk.bf16.gmra.mxu0 %vm586_vm1, %v1065_v7  ;;  %v1357_v7 = vsel %vm1040_vm3, %v1074_v40, %v1356_v11  ;;  %v11468_v11 = vshrl.u32 %v8962_v30, 16 }
  0x8b   : > { %7734 = vmatmul.mubr.msk.bf16.gmra.mxu1 %vm586_vm1, %v1071_v1  ;;  %7695 = vmatprep.mubr.msk.bf16.mxu0 %vm586_vm1, %v1067_v35  ;;  %v1943_v35 = vrot.slane %v8580_v8, 2  ;;  %v1946_v8 = vrot.slane %v8597_v15, 2  ;;  %v1593_v15 = vrot.slane %v8619_v23, 2 }
  0x8c   : > { %7737 = vmatprep.mubr.msk.bf16.mxu1 %vm586_vm1, %v1073_v49 }
  0x8d   : > { %v9008_v27 = vsel %vm1942_vm4, %v1944_v0, %v1946_v8 }
  0x92   : > { %7696 = vmatmul.mubr.msk.bf16.gmra.mxu0 %vm586_vm1, %v1069_v56  ;;  %v1945_v56 = vsel %vm1942_vm4, %v1943_v35, %v1944_v0  ;;  %v1592_v35 = vrot.slane %v8631_v28, 1  ;;  %v1952_v0 = vrot.slane %v8652_v37, 2  ;;  %v1605_v37 = vrot.slane %v8670_v43, 2 }
  0x93   : > { %7738 = vmatmul.mubr.msk.bf16.gmra.mxu1 %vm586_vm1, %v1075_v53  ;;  %7699 = vmatprep.mubr.msk.bf16.mxu0 %vm586_vm1, %v1071_v1  ;;  %v1076_v1 = vrot.slane %v8861_v34, 1 }
  0x94   : > { %7741 = vmatprep.mubr.msk.bf16.mxu1 %vm586_vm1, %v1357_v7  ;;  %v11467_v7 = vshll.u32 %v8962_v30, 16 }
  0x95   : > { %v1077_v34 = vsel %vm1040_vm3, %v1074_v40, %v1076_v1  ;;  %v9021_v40 = vsel %vm641_vm0, %v8897_v6, 0  ;;  %v1596_v1 = vrot.slane %v8636_v31, 1 }
  0x96   : > { %11614 = vst [vmem:[#allocation20_spill] sm:$0xff] %v9021_v40 }
  0x9a   : > { %7700 = vmatmul.mubr.msk.bf16.gmra.mxu0 %vm586_vm1, %v1073_v49  ;;  %v2550_v49 = vrot.slane %v11468_v11, 2  ;;  %v11621_v11 = vld [vmem:[#allocation7_spill] sm:$0xff] }
  0x9b   : > { %7742 = vmatmul.mubr.msk.bf16.gmra.mxu1 %vm586_vm1, %v1359_v58  ;;  %7703 = vmatprep.mubr.msk.bf16.mxu0 %vm586_vm1, %v1075_v53  ;;  %v2551_v53 = vrot.slane %v11467_v7, 3  ;;  %v11612_v58 = vor.u32 %v8768_v38, %v8786_v12  ;;  %v1597_v7 = vrot.slane %v8622_v24, 2  ;;  %v1594_v38 = vor.u32 %v1593_v15, %v1592_v35 }
  0x9c   : > { %7785 = vmatprep.mubr.msk.bf16.mxu1 %vm586_vm1, %v1945_v56  ;;  %v9017_v56 = vsel %vm1942_vm4, %v1946_v8, %v1948_v63  ;;  %v1950_v12 = vrot.slane %v8625_v25, 2 }
  0x9d   : > { %v1591_v17 = vsel %vm1584_vm5, %v11612_v58, %v1590_v14  ;;  %v9014_v13 = vor.u32 %v2551_v53, %v2550_v49  ;;  %v1598_v6 = vor.u32 %v1597_v7, %v1596_v1  ;;  %v1595_v8 = vsel %vm1584_vm5, %v1590_v14, %v1594_v38  ;;  %v9056_v14 = vld [vmem:[%s11440_s2 + $0x10] sm:$0x3] }
  0x9e   : > { %v1600_v49 = vrot.slane %v8674_v45, 1  ;;  %v1601_v53 = vrot.slane %v8639_v32, 2  ;;  %v9044_v25 = vsel %vm1942_vm4, %v1948_v63, %v1950_v12  ;;  %v1604_v7 = vrot.slane %v8678_v47, 1 }
  0x9f   : > { %11613 = vst [vmem:[#allocation19_spill] sm:$0xff] %v9014_v13  ;;  %v1599_v35 = vsel %vm1584_vm5, %v1594_v38, %v1598_v6  ;;  %v1954_v63 = vrot.slane %v8665_v42, 2  ;;  %v1956_v58 = vrot.slane %v8686_v50, 2  ;;  %v1608_v1 = vrot.slane %v8704_v57, 1  ;;  %v11627_v13 = vld [vmem:[#allocation10_spill] sm:$0xff] }
  0xa0   : > { %v1606_v15 = vor.u32 %v1605_v37, %v1604_v7  ;;  %v1609_v38 = vrot.slane %v8681_v48, 2  ;;  %v1613_v42 = vrot.slane %v8700_v55, 2  ;;  %v1960_v7 = vrot.slane %v8723_v62, 2 }
  0xa1   : > { %v9078_v50 = vsel %vm1942_vm4, %v1954_v63, %v1956_v58 }
  0xa2   : > { %7704 = vmatmul.mubr.msk.bf16.gmra.mxu0 %vm586_vm1, %v1077_v34  ;;  %v9041_v34 = vsel %vm641_vm0, %v8917_v18, 0  ;;  %v1602_v18 = vor.u32 %v1601_v53, %v1600_v49  ;;  %v1612_v49 = vrot.slane %v8708_v59, 1 }
  0xa3   : > { %7786 = vmatmul.mubr.msk.bf16.vlgmr.msra.gmra.mxu1 %vm586_vm1, %v9008_v27  ;;  %7747 = vmatprep.mubr.msk.bf16.mxu0 %vm586_vm1, %v1591_v17  ;;  %11615 = vst [vmem:[#allocation21_spill] sm:$0xff] %v9041_v34 }
  0xa4   : > { %7789 = vmatprep.mubr.msk.bf16.mxu1 %vm586_vm1, %v9017_v56  ;;  %7860 = vmatpush3.bf16.msra.mxu1 %v9021_v40  ;;  %v1603_v17 = vsel %vm1584_vm5, %v1598_v6, %v1602_v18  ;;  %v1610_v6 = vor.u32 %v1609_v38, %v1608_v1  ;;  %v1614_v53 = vor.u32 %v1613_v42, %v1612_v49  ;;  %v1620_v1 = vrot.slane %v8745_v21, 1 }
  0xa5   : > { %8366 = vmatprep.subr.msk.bf16.mxu1 %vm641_vm0, %v8543_v2  ;;  %v9050_v2 = vsel %vm1942_vm4, %v1950_v12, %v1952_v0  ;;  %v9072_v12 = vsel %vm1942_vm4, %v1952_v0, %v1954_v63  ;;  %v1958_v0 = vrot.slane %v8697_v54, 2  ;;  %v1621_v38 = vrot.slane %v8737_v10, 2 }
  0xa6   : > { %v1611_v37 = vsel %vm1584_vm5, %v1606_v15, %v1610_v6  ;;  %v1624_v42 = vrot.slane %v8775_v41, 1  ;;  %v1637_v40 = vrot.slane %v11621_v11, 2 }
  0xa7   : > { %v9092_v63 = vsel %vm1942_vm4, %v1956_v58, %v1958_v0  ;;  %v9098_v54 = vsel %vm1942_vm4, %v1958_v0, %v1960_v7  ;;  %v1622_v58 = vor.u32 %v1621_v38, %v1620_v1  ;;  %v1632_v38 = vrot.slane %v8811_v4, 1 }
  0xaa   : > { %7748 = vmatmul.mubr.msk.bf16.vlgmr.msra.gmra.mxu0 %vm586_vm1, %v1595_v8  ;;  %v1607_v8 = vsel %vm1584_vm5, %v1602_v18, %v1606_v15  ;;  %v1617_v18 = vrot.slane %v8711_v60, 2  ;;  %v1962_v15 = vrot.slane %v8734_v5, 2 }
  0xab   : > { %7822 = vmatpush3.bf16.msra.mxu0 %v9041_v34  ;;  %7790 = vmatmul.mubr.msk.bf16.gmra.mxu1 %vm586_vm1, %v9044_v25  ;;  %v11624_v34 = vld [vmem:[#allocation9_spill] sm:$0xff] }
  0xac   : > { %7751 = vmatprep.mubr.msk.bf16.mxu0 %vm586_vm1, %v1599_v35  ;;  %7793 = vmatprep.mubr.msk.bf16.mxu1 %vm586_vm1, %v9050_v2  ;;  %v1616_v35 = vrot.slane %v8741_v16, 1  ;;  %v9112_v0 = vsel %vm1942_vm4, %v1960_v7, %v1962_v15 }
  0xad   : > { %8365 = vmatprep.subr.msk.bf16.mxu0 %vm641_vm0, %v9056_v14  ;;  %11616 = vst [vmem:[#allocation22_spill] sm:$0xff] %v9112_v0 }
  0xae   : > { %v1618_v62 = vor.u32 %v1617_v18, %v1616_v35  ;;  %v1628_v35 = vrot.slane %v8779_v46, 1  ;;  %v1629_v18 = vrot.slane %v8771_v39, 2 }
  0xb0   : > { %v1619_v49 = vsel %vm1584_vm5, %v1614_v53, %v1618_v62  ;;  %v1630_v7 = vor.u32 %v1629_v18, %v1628_v35  ;;  %v1972_v35 = vrot.slane %v8823_v33, 2 }
  0xb2   : > { %7752 = vmatmul.mubr.msk.bf16.gmra.mxu0 %vm586_vm1, %v1603_v17  ;;  %v1615_v17 = vsel %vm1584_vm5, %v1610_v6, %v1614_v53  ;;  %v1625_v6 = vrot.slane %v8748_v26, 2  ;;  %v1966_v53 = vrot.slane %v8764_v36, 2 }
  0xb3   : > { %7794 = vmatmul.mubr.msk.bf16.gmra.mxu1 %vm586_vm1, %v9072_v12  ;;  %7755 = vmatprep.mubr.msk.bf16.mxu0 %vm586_vm1, %v1607_v8  ;;  %v1964_v8 = vrot.slane %v8753_v29, 2 }
  0xb4   : > { %7797 = vmatprep.mubr.msk.bf16.mxu1 %vm586_vm1, %v9078_v50  ;;  %v1626_v29 = vor.u32 %v1625_v6, %v1624_v42  ;;  %v11620_v42 = vld [vmem:[#allocation8_spill] sm:$0xff] }
  0xb5   : > { %v9118_v5 = vsel %vm1942_vm4, %v1962_v15, %v1964_v8  ;;  %v1636_v6 = vrot.slane %v11620_v42, 1 }
  0xb6   : > { %11617 = vst [vmem:[#allocation23_spill] sm:$0xff] %v9118_v5  ;;  %v1627_v1 = vsel %vm1584_vm5, %v1622_v58, %v1626_v29 }
  0xba   : > { %7756 = vmatmul.mubr.msk.bf16.gmra.mxu0 %vm586_vm1, %v1611_v37  ;;  %v1623_v37 = vsel %vm1584_vm5, %v1618_v62, %v1622_v58  ;;  %v11618_v62 = vld [vmem:[#allocation6_spill] sm:$0xff]  ;;  %v1970_v58 = vrot.slane %v8804_v61, 2 }
  0xbb   : > { %7798 = vmatmul.mubr.msk.bf16.gmra.mxu1 %vm586_vm1, %v9092_v63  ;;  %7759 = vmatprep.mubr.msk.bf16.mxu0 %vm586_vm1, %v1615_v17  ;;  %v1968_v17 = vrot.slane %v8791_v52, 2  ;;  %v1633_v15 = vrot.slane %v11618_v62, 2 }
  0xbc   : > { %7801 = vmatprep.mubr.msk.bf16.mxu1 %vm586_vm1, %v9098_v54  ;;  %v9158_v61 = vsel %vm1942_vm4, %v1970_v58, %v1972_v35 }
  0xbd   : > { %v9138_v36 = vsel %vm1942_vm4, %v1966_v53, %v1968_v17  ;;  %v1634_v52 = vor.u32 %v1633_v15, %v1632_v38  ;;  %v9152_v22 = vsel %vm1942_vm4, %v1968_v17, %v1970_v58  ;;  %v11626_v38 = vld [vmem:[#allocation12_spill] sm:$0xff] }
  0xbe   : > { %11622 = vst [vmem:[#allocation8_spill] sm:$0xff] %v9138_v36  ;;  %11625 = vst [vmem:[#allocation7_spill] sm:$0xff] %v9152_v22  ;;  %v1644_v15 = vrot.slane %v11626_v38, 1 }
  0xbf   : > { %v1635_v18 = vsel %vm1584_vm5, %v1630_v7, %v1634_v52 }
  0xc2   : > { %7760 = vmatmul.mubr.msk.bf16.gmra.mxu0 %vm586_vm1, %v1619_v49  ;;  %v9132_v49 = vsel %vm1942_vm4, %v1964_v8, %v1966_v53  ;;  %v1638_v8 = vor.u32 %v1637_v40, %v1636_v6  ;;  %v9168_v6 = vrot.slane %v8962_v30, 2 }
  0xc3   : > { %7802 = vmatmul.mubr.msk.bf16.gmra.mxu1 %vm586_vm1, %v9112_v0  ;;  %7763 = vmatprep.mubr.msk.bf16.mxu0 %vm586_vm1, %v1623_v37  ;;  %11619 = vst [vmem:[#allocation6_spill] sm:$0xff] %v9132_v49  ;;  %v1631_v37 = vsel %vm1584_vm5, %v1626_v29, %v1630_v7  ;;  %v11623_v29 = vld [vmem:[#allocation11_spill] sm:$0xff]  ;;  %v1974_v7 = vrot.slane %v8834_v51, 2 }
  0xc4   : > { %7805 = vmatprep.mubr.msk.bf16.mxu1 %vm586_vm1, %v9118_v5  ;;  %v1640_v53 = vrot.slane %v11623_v29, 1  ;;  %11628 = vst [vmem:[#allocation11_spill] sm:$0xff] %v9158_v61 }
  0xca   : > { %7764 = vmatmul.mubr.msk.bf16.gmra.mxu0 %vm586_vm1, %v1627_v1  ;;  %v1641_v1 = vrot.slane %v11624_v34, 2 }
  0xcb   : > { %7806 = vmatmul.mubr.msk.bf16.gmra.mxu1 %vm586_vm1, %v9132_v49  ;;  %7767 = vmatprep.mubr.msk.bf16.mxu0 %vm586_vm1, %v1631_v37  ;;  %v1639_v37 = vsel %vm1584_vm5, %v1634_v52, %v1638_v8  ;;  %v9172_v49 = vsel %vm1942_vm4, %v1972_v35, %v1974_v7  ;;  %v2487_v35 = vrot.slane %v8611_v20, 2  ;;  %v1662_v20 = vshrl.u32 %v8977_v9, 16 }
  0xcc   : > { %7809 = vmatprep.mubr.msk.bf16.mxu1 %vm586_vm1, %v9138_v36  ;;  %v1645_v36 = vrot.slane %v11627_v13, 2  ;;  %v1642_v40 = vor.u32 %v1641_v1, %v1640_v53  ;;  %11629 = vst [vmem:[#allocation9_spill] sm:$0xff] %v9172_v49  ;;  %v9179_v1 = vsel %vm1942_vm4, %v1974_v7, %v9168_v6  ;;  %v2488_v13 = vrot.slane %v8606_v19, 3 }
  0xcd   : > { %11631 = vst [vmem:[#allocation24_spill] sm:$0xff] %v9179_v1  ;;  %v1665_v19 = vshll.u32 %v8977_v9, 16 }
  0xce   : > { %v1646_v17 = vor.u32 %v1645_v36, %v1644_v15  ;;  %v11632_v36 = vshrl.u32 %v8962_v30, 16 }
  0xcf   : > { %v1667_v3 = vrot.slane %v1665_v19, 2 }
  0xd0   : > { %v1647_v51 = vsel %vm1584_vm5, %v1642_v40, %v1646_v17  ;;  %v1655_v15 = vrot.slane %v11632_v36, 1 }
  0xd2   : > { %7768 = vmatmul.mubr.msk.bf16.gmra.mxu0 %vm586_vm1, %v1635_v18  ;;  %v1643_v18 = vsel %vm1584_vm5, %v1638_v8, %v1642_v40 }
  0xd3   : > { %v7635_v33 = vpop.f32.mrf.mxu1  ;;  %7810 = vmatmul.mubr.msk.bf16.gmra.mxu1 %vm586_vm1, %v9152_v22  ;;  %7771 = vmatprep.mubr.msk.bf16.mxu0 %vm586_vm1, %v1639_v37  ;;  %v1648_v22 = vrot.slane %v8871_v44, 1  ;;  %v11630_v37 = vld [vmem:[#allocation13_spill] sm:$0xff]  ;;  %v2490_v44 = vrot.slane %v8631_v28, 2 }
  0xd4   : > { %7813 = vmatprep.mubr.msk.bf16.mxu1 %vm586_vm1, %v9158_v61  ;;  %v1649_v53 = vrot.slane %v11630_v37, 2  ;;  %v11633_v61 = vshll.u32 %v8962_v30, 16  ;;  %v2491_v37 = vrot.slane %v8619_v23, 3  ;;  %v1978_v23 = vrot.slane %v8977_v9, 2 }
  0xd5   : > { %v895_v52 = vpop.f32.mrf.mxu1 }
  0xd6   : > { %v1658_v5 = vrot.slane %v11633_v61, 2  ;;  %v1650_v61 = vor.u32 %v1649_v53, %v1648_v22  ;;  %v2492_v30 = vor.u32 %v2491_v37, %v2490_v44 }
  0xd7   : > { %v7636_v58 = vpop.f32.mrf.mxu1 }
  0xd8   : > { %v1659_v28 = vor.u32 %v1658_v5, %v1655_v15  ;;  %v1651_v53 = vsel %vm1584_vm5, %v1646_v17, %v1650_v61  ;;  %v2494_v5 = vrot.slane %v8636_v31, 2  ;;  %v2499_v17 = vrot.slane %v8639_v32, 3 }
  0xd9   : > { %v898_v8 = vpop.f32.mrf.mxu1 }
  0xda   : > { %v7597_v40 = vpop.f32.mrf.mxu0  ;;  %7772 = vmatmul.mubr.msk.bf16.gmra.mxu0 %vm586_vm1, %v1643_v18  ;;  %v1660_v9 = vsel %vm1584_vm5, %v1650_v61, %v1659_v28 }
  0xdb   : > { %v9190_v7 = vadd.f32 %v7635_v33, %v7597_v40  ;;  %v7639_v38 = vpop.f32.mrf.mxu1  ;;  %7814 = vmatmul.mubr.msk.bf16.gmra.mxu1 %vm586_vm1, %v9172_v49  ;;  %7775 = vmatprep.mubr.msk.bf16.mxu0 %vm586_vm1, %v1647_v51  ;;  %v2489_v40 = vor.u32 %v2488_v13, %v2487_v35  ;;  %v2495_v13 = vrot.slane %v8622_v24, 3 }
  0xdc   : > { %v679_v36 = vpop.f32.mrf.mxu0  ;;  %7817 = vmatprep.mubr.msk.bf16.mxu1 %vm586_vm1, %v9179_v1  ;;  %v1979_v1 = vsel %vm1942_vm4, %v9168_v6, %v1978_v23  ;;  %v2502_v23 = vrot.slane %v8678_v47, 2 }
  0xdd   : > { %11634 = vst [vmem:[#allocation25_spill] sm:$0xff] %v9190_v7  ;;  %v9200_v33 = vadd.f32 %v895_v52, %v679_v36  ;;  %v911_v18 = vpop.f32.mrf.mxu1  ;;  %v1664_v7 = vrot.slane %v1662_v20, 1 }
  0xde   : > { %v7598_v49 = vpop.f32.mrf.mxu0 }
  0xdf   : > { %v9202_v51 = vadd.f32 %v7636_v58, %v7598_v49  ;;  %v7640_v22 = vpop.f32.mrf.mxu1  ;;  %v2493_v49 = vsel %vm2486_vm6, %v2489_v40, %v2492_v30  ;;  %v2498_v58 = vrot.slane %v8674_v45, 2  ;;  %v1668_v24 = vor.u32 %v1667_v3, %v1664_v7 }
  0xe0   : > { %v682_v0 = vpop.f32.mrf.mxu0  ;;  %v2503_v3 = vrot.slane %v8670_v43, 3 }
  0xe1   : > { %v9210_v44 = vadd.f32 %v898_v8, %v682_v0  ;;  %v914_v52 = vpop.f32.mrf.mxu1  ;;  %v2496_v0 = vor.u32 %v2495_v13, %v2494_v5  ;;  %v2500_v61 = vor.u32 %v2499_v17, %v2498_v58 }
  0xe2   : > { %v7601_v37 = vpop.f32.mrf.mxu0  ;;  %7776 = vmatmul.mubr.msk.bf16.gmra.mxu0 %vm586_vm1, %v1651_v53  ;;  %v2506_v53 = vrot.slane %v8704_v57, 2  ;;  %v2504_v47 = vor.u32 %v2503_v3, %v2502_v23 }
  0xe3   : > { %v9216_v15 = vadd.f32 %v7639_v38, %v7601_v37  ;;  %v7643_v35 = vpop.f32.mrf.mxu1  ;;  %7818 = vmatmul.mubr.msk.bf16.gmra.mxu1 %vm586_vm1, %v1979_v1  ;;  %7779 = vmatprep.mubr.msk.bf16.mxu0 %vm586_vm1, %v1660_v9  ;;  %v1669_v38 = vsel %vm1584_vm5, %v1659_v28, %v1668_v24  ;;  %v2497_v1 = vsel %vm2486_vm6, %v2492_v30, %v2496_v0  ;;  %v11635_v30 = vld [vmem:[#allocation3_spill] sm:$0xff]  ;;  %v9252_v37 = vsel %vm641_vm0, %v9056_v14, 0 }
  0xe4   : > { %v695_v31 = vpop.f32.mrf.mxu0  ;;  %7861 = vmatprep.mubr.msk.bf16.mxu1 %vm586_vm1, %v2493_v49  ;;  %11636 = vst [vmem:[#allocation3_spill] sm:$0xff] %v9252_v37  ;;  %v2510_v24 = vrot.slane %v8708_v59, 2 }
  0xe5   : > { %v9221_v8 = vadd.f32 %v911_v18, %v695_v31  ;;  %v927_v45 = vpop.f32.mrf.mxu1  ;;  %v2501_v18 = vsel %vm2486_vm6, %v2496_v0, %v2500_v61  ;;  %v2511_v31 = vrot.slane %v8700_v55, 3 }
  0xe6   : > { %v7602_v32 = vpop.f32.mrf.mxu0 }
  0xe7   : > { %v9223_v20 = vadd.f32 %v7640_v22, %v7602_v32  ;;  %v7644_v19 = vpop.f32.mrf.mxu1  ;;  %v2507_v22 = vrot.slane %v8681_v48, 3 }
  0xe8   : > { %v698_v36 = vpop.f32.mrf.mxu0 }
  0xe9   : > { %v9229_v7 = vadd.f32 %v914_v52, %v698_v36  ;;  %v930_v40 = vpop.f32.mrf.mxu1  ;;  %v2508_v13 = vor.u32 %v2507_v22, %v2506_v53  ;;  %v8435_v52 = vld [vmem:[%s11440_s2 + $0x4] sm:$0x3]  ;;  %v2518_v53 = vrot.slane %v8745_v21, 2  ;;  %v2519_v22 = vrot.slane %v8737_v10, 3 }
  0xea   : > { %v7605_v9 = vpop.f32.mrf.mxu0  ;;  %7780 = vmatmul.mubr.msk.bf16.gmra.mxu0 %vm586_vm1, %v1669_v38  ;;  %v2515_v38 = vrot.slane %v8711_v60, 3 }
  0xeb   : > { %v9235_v28 = vadd.f32 %v7643_v35, %v7605_v9  ;;  %v7647_v5 = vpop.f32.mrf.mxu1  ;;  %7862 = vmatmul.mubr.msk.bf16.vlgmr.msra.gmra.mxu1 %vm586_vm1, %v2497_v1  ;;  %7823 = vmatprep.mubr.msk.bf16.mxu0 %vm586_vm1, %v9008_v27  ;;  %v2505_v35 = vsel %vm2486_vm6, %v2500_v61, %v2504_v47  ;;  %v2509_v32 = vsel %vm2486_vm6, %v2504_v47, %v2508_v13  ;;  %v2522_v47 = vrot.slane %v8775_v41, 2 }
  0xec   : > { %v711_v43 = vpop.f32.mrf.mxu0  ;;  %7865 = vmatprep.mubr.msk.bf16.mxu1 %vm586_vm1, %v2501_v18  ;;  %7936 = vmatpush3.bf16.msra.mxu1 %v11635_v30  ;;  %v2523_v30 = vrot.slane %v8748_v26, 3  ;;  %v2520_v21 = vor.u32 %v2519_v22, %v2518_v53 }
  0xed   : > { %v9242_v57 = vadd.f32 %v927_v45, %v711_v43  ;;  %v943_v48 = vpop.f32.mrf.mxu1  ;;  %8368 = vmatprep.subr.msk.bf16.mxu1 %vm641_vm0, %v8435_v52 }
  0xee   : > { %v7606_v49 = vpop.f32.mrf.mxu0  ;;  %v2524_v26 = vor.u32 %v2523_v30, %v2522_v47 }
  0xef   : > { %v9248_v58 = vadd.f32 %v7644_v19, %v7606_v49  ;;  %v7648_v27 = vpop.f32.mrf.mxu1  ;;  %v2514_v19 = vrot.slane %v8741_v16, 2  ;;  %v2512_v16 = vor.u32 %v2511_v31, %v2510_v24  ;;  %v2526_v31 = vrot.slane %v8779_v46, 2 }
  0xf0   : > { %v714_v17 = vpop.f32.mrf.mxu0 }
  0xf1   : > { %v9257_v0 = vadd.f32 %v930_v40, %v714_v17  ;;  %v946_v45 = vpop.f32.mrf.mxu1  ;;  %v2516_v1 = vor.u32 %v2515_v38, %v2514_v19  ;;  %v2525_v19 = vsel %vm2486_vm6, %v2520_v21, %v2524_v26  ;;  %v2530_v38 = vrot.slane %v8811_v4, 2 }
  0xf2   : > { %v7609_v36 = vpop.f32.mrf.mxu0  ;;  %7824 = vmatmul.mubr.msk.bf16.vlgmr.msra.gmra.mxu0 %vm586_vm1, %v9017_v56  ;;  %v8436_v56 = vld [vmem:[%s11440_s2] sm:$0x3] }
  0xf3   : > { %v9264_v14 = vadd.f32 %v7647_v5, %v7609_v36  ;;  %7898 = vmatpush3.bf16.msra.mxu0 %v9252_v37  ;;  %v7651_v59 = vpop.f32.mrf.mxu1  ;;  %7866 = vmatmul.mubr.msk.bf16.gmra.mxu1 %vm586_vm1, %v2505_v35  ;;  %v2517_v43 = vsel %vm2486_vm6, %v2512_v16, %v2516_v1  ;;  %v2521_v24 = vsel %vm2486_vm6, %v2516_v1, %v2520_v21  ;;  %v2531_v36 = vrot.slane %v11618_v62, 3 }
  0xf4   : > { %v727_v55 = vpop.f32.mrf.mxu0  ;;  %7827 = vmatprep.mubr.msk.bf16.mxu0 %vm586_vm1, %v9044_v25  ;;  %7869 = vmatprep.mubr.msk.bf16.mxu1 %vm586_vm1, %v2509_v32  ;;  %v2513_v25 = vsel %vm2486_vm6, %v2508_v13, %v2512_v16 }
  0xf5   : > { %v9271_v61 = vadd.f32 %v943_v48, %v727_v55  ;;  %v959_v60 = vpop.f32.mrf.mxu1  ;;  %8367 = vmatprep.subr.msk.bf16.mxu0 %vm641_vm0, %v8436_v56  ;;  %v2532_v62 = vor.u32 %v2531_v36, %v2530_v38 }
  0xf6   : > { %v7610_v23 = vpop.f32.mrf.mxu0 }
  0xf7   : > { %v9277_v3 = vadd.f32 %v7648_v27, %v7610_v23  ;;  %v7652_v40 = vpop.f32.mrf.mxu1 }
  0xf8   : > { %v730_v18 = vpop.f32.mrf.mxu0 }
  0xf9   : > { %v9282_v9 = vadd.f32 %v946_v45, %v730_v18  ;;  %v962_v5 = vpop.f32.mrf.mxu1  ;;  %v2527_v45 = vrot.slane %v8771_v39, 3  ;;  %v2534_v18 = vrot.slane %v11620_v42, 2  ;;  %v11637_v42 = vld [vmem:[#allocation22_spill] sm:$0xff] }
  0xfa   : > { %v7613_v48 = vpop.f32.mrf.mxu0  ;;  %7828 = vmatmul.mubr.msk.bf16.gmra.mxu0 %vm586_vm1, %v9050_v2 }
  0xfb   : > { %v9289_v52 = vadd.f32 %v7651_v59, %v7613_v48  ;;  %v7655_v13 = vpop.f32.mrf.mxu1  ;;  %7870 = vmatmul.mubr.msk.bf16.gmra.mxu1 %vm586_vm1, %v2513_v25  ;;  %7831 = vmatprep.mubr.msk.bf16.mxu0 %vm586_vm1, %v9072_v12  ;;  %v2528_v46 = vor.u32 %v2527_v45, %v2526_v31  ;;  %v11640_v31 = vld [vmem:[#allocation12_spill] sm:$0xff] }
  0xfc   : > { %v743_v10 = vpop.f32.mrf.mxu0  ;;  %7873 = vmatprep.mubr.msk.bf16.mxu1 %vm586_vm1, %v2517_v43  ;;  %v2539_v43 = vrot.slane %v11624_v34, 3  ;;  %v2542_v45 = vrot.slane %v11640_v31, 2 }
  0xfd   : > { %v9295_v49 = vadd.f32 %v959_v60, %v743_v10  ;;  %v975_v41 = vpop.f32.mrf.mxu1  ;;  %v2533_v22 = vsel %vm2486_vm6, %v2528_v46, %v2532_v62  ;;  %v339_v10 = vld [vmem:[%s8569_s14 + $0x9c] sm:$0xf] }
  0xfe   : > { %v7614_v27 = vpop.f32.mrf.mxu0 }
  0xff   : > { %v9297_v17 = vadd.f32 %v7652_v40, %v7614_v27  ;;  %v7656_v2 = vpop.f32.mrf.mxu1  ;;  %v2529_v40 = vsel %vm2486_vm6, %v2524_v26, %v2528_v46  ;;  %v11638_v27 = vld [vmem:[#allocation18_spill] sm:$0xff]  ;;  %v11643_v46 = vld [vmem:[#allocation13_spill] sm:$0xff] }
 0x100   : > { %v746_v35 = vpop.f32.mrf.mxu0 }
 0x101   : > { %v9302_v12 = vadd.f32 %v962_v5, %v746_v35  ;;  %v978_v32 = vpop.f32.mrf.mxu1  ;;  %v2538_v5 = vrot.slane %v11623_v29, 2 }
 0x102   : > { %v7617_v59 = vpop.f32.mrf.mxu0  ;;  %7832 = vmatmul.mubr.msk.bf16.gmra.mxu0 %vm586_vm1, %v9078_v50 }
 0x103   : > { %v9309_v55 = vadd.f32 %v7655_v13, %v7617_v59  ;;  %v7659_v16 = vpop.f32.mrf.mxu1  ;;  %7874 = vmatmul.mubr.msk.bf16.gmra.mxu1 %vm586_vm1, %v2521_v24  ;;  %7835 = vmatprep.mubr.msk.bf16.mxu0 %vm586_vm1, %v9092_v63  ;;  %v2535_v63 = vrot.slane %v11621_v11, 3  ;;  %v2540_v21 = vor.u32 %v2539_v43, %v2538_v5 }
 0x104   : > { %v759_v39 = vpop.f32.mrf.mxu0  ;;  %7877 = vmatprep.mubr.msk.bf16.mxu1 %vm586_vm1, %v2525_v19 }
 0x105   : > { %v9315_v60 = vadd.f32 %v975_v41, %v759_v39  ;;  %v991_v4 = vpop.f32.mrf.mxu1  ;;  %v2536_v13 = vor.u32 %v2535_v63, %v2534_v18 }
 0x106   : > { %v7618_v1 = vpop.f32.mrf.mxu0 }
 0x107   : > { %v9317_v56 = vadd.f32 %v7656_v2, %v7618_v1  ;;  %v7660_v50 = vpop.f32.mrf.mxu1  ;;  %v9341_v2 = vcombine.low %v11638_v27, %v339_v10  ;;  %v2537_v24 = vsel %vm2486_vm6, %v2532_v62, %v2536_v13  ;;  %v2541_v59 = vsel %vm2486_vm6, %v2536_v13, %v2540_v21 }
 0x108   : > { %v762_v23 = vpop.f32.mrf.mxu0 }
 0x109   : > { %v9322_v25 = vadd.f32 %v978_v32, %v762_v23  ;;  %v994_v53 = vpop.f32.mrf.mxu1  ;;  %11639 = vst [vmem:[#allocation22_spill] sm:$0xff] %v9341_v2  ;;  %v11641_v32 = vld [vmem:[#allocation10_spill] sm:$0xff] }
 0x10a   : > { %v7621_v47 = vpop.f32.mrf.mxu0  ;;  %7836 = vmatmul.mubr.msk.bf16.gmra.mxu0 %vm586_vm1, %v9098_v54  ;;  %v2543_v19 = vrot.slane %v11641_v32, 3 }
 0x10b   : > { %v9329_v30 = vadd.f32 %v7659_v16, %v7621_v47  ;;  %v7663_v48 = vpop.f32.mrf.mxu1  ;;  %7878 = vmatmul.mubr.msk.bf16.gmra.mxu1 %vm586_vm1, %v2529_v40  ;;  %7839 = vmatprep.mubr.msk.bf16.mxu0 %vm586_vm1, %v11637_v42  ;;  %v11642_v16 = vld [vmem:[#allocation14_spill] sm:$0xff] }
 0x10c   : > { %v775_v11 = vpop.f32.mrf.mxu0  ;;  %7881 = vmatprep.mubr.msk.bf16.mxu1 %vm586_vm1, %v2533_v22  ;;  %v2546_v39 = vrot.slane %v11642_v16, 2  ;;  %v11645_v40 = vld [vmem:[#allocation6_spill] sm:$0xff]  ;;  %v2544_v63 = vor.u32 %v2543_v19, %v2542_v45  ;;  %v2558_v22 = vshll.u32 %v9341_v2, 16  ;;  %v11647_v19 = vld [vmem:[#allocation8_spill] sm:$0xff] }
 0x10d   : > { %v9336_v29 = vadd.f32 %v991_v4, %v775_v11  ;;  %v1007_v34 = vpop.f32.mrf.mxu1  ;;  %v2547_v4 = vrot.slane %v11643_v46, 3  ;;  %v9373_v45 = vld [vmem:[%s8718_s21] sm:$0xff]  }
 0x10e   : > { %v7622_v41 = vpop.f32.mrf.mxu0  ;;  %v2545_v10 = vsel %vm2486_vm6, %v2540_v21, %v2544_v63  ;;  %v2560_v27 = vrot.slane %v2558_v22, 3  ;;  %11646 = vst [vmem:[#allocation18_spill] sm:$0xff] %v9373_v45  ;;  %v11648_v21 = vld [vmem:[#allocation7_spill] sm:$0xff] }
 0x10f   : > { %v9338_v26 = vadd.f32 %v7660_v50, %v7622_v41  ;;  %v7664_v54 = vpop.f32.mrf.mxu1  ;;  %v11644_v50 = vld [vmem:[#allocation23_spill] sm:$0xff]  ;;  %v2548_v47 = vor.u32 %v2547_v4, %v2546_v39 }
 0x110   : > { %v778_v35 = vpop.f32.mrf.mxu0  ;;  %v11649_v22 = vld [vmem:[#allocation19_spill] sm:$0xff] }
 0x111   : > { %v9346_v38 = vadd.f32 %v994_v53, %v778_v35  ;;  %v1010_v36 = vpop.f32.mrf.mxu1  ;;  %v2555_v53 = vshrl.u32 %v9341_v2, 16  ;;  %v9367_v35 = vld [vmem:[%s8569_s14 + $0xa0] ss:$0 sps:$4 sm:$0x77]  }
 0x112   : > { %v7625_v1 = vpop.f32.mrf.mxu0  ;;  %7840 = vmatmul.mubr.msk.bf16.gmra.mxu0 %vm586_vm1, %v11644_v50  ;;  %v2564_v39 = vshrl.u32 %v9367_v35, 16  ;;  %v2567_v46 = vshll.u32 %v9367_v35, 16  ;;  %v9388_v50 = vld [vmem:[%s8718_s21 + $0x8] sm:$0xff]  }
 0x113   : > { %v9353_v23 = vadd.f32 %v7663_v48, %v7625_v1  ;;  %v7667_v62 = vpop.f32.mrf.mxu1  ;;  %7882 = vmatmul.mubr.msk.bf16.gmra.mxu1 %vm586_vm1, %v2537_v24  ;;  %7843 = vmatprep.mubr.msk.bf16.mxu0 %vm586_vm1, %v11645_v40  ;;  %v2557_v41 = vrot.slane %v2555_v53, 2 }
 0x114   : > { %v791_v18 = vpop.f32.mrf.mxu0  ;;  %7885 = vmatprep.mubr.msk.bf16.mxu1 %vm586_vm1, %v2541_v59 }
 0x115   : > { %v9361_v5 = vadd.f32 %v1007_v34, %v791_v18  ;;  %v1023_v43 = vpop.f32.mrf.mxu1  ;;  %v2549_v34 = vsel %vm2486_vm6, %v2544_v63, %v2548_v47  ;;  %v2561_v16 = vor.u32 %v2560_v27, %v2557_v41 }
 0x116   : > { %v7626_v48 = vpop.f32.mrf.mxu0 }
 0x117   : > { %v9363_v42 = vadd.f32 %v7664_v54, %v7626_v48  ;;  %v7668_v11 = vpop.f32.mrf.mxu1  ;;  %v2553_v48 = vsel %vm2486_vm6, %v2548_v47, %v11649_v22  ;;  %v11653_v47 = vld [vmem:[#allocation25_spill] sm:$0xff] }
 0x118   : > { %v794_v13 = vpop.f32.mrf.mxu0 }
 0x119   : > { %v9369_v24 = vadd.f32 %v1010_v36, %v794_v13  ;;  %v1026_v31 = vpop.f32.mrf.mxu1  ;;  %v2562_v13 = vsel %vm2486_vm6, %v11649_v22, %v2561_v16 }
 0x11a   : > { %v7629_v32 = vpop.f32.mrf.mxu0  ;;  %7844 = vmatmul.mubr.msk.bf16.gmra.mxu0 %vm586_vm1, %v11647_v19 }
 0x11b   : > { %v9377_v54 = vadd.f32 %v7667_v62, %v7629_v32  ;;  %v7711_v59 = vpop.f32.mrf.mxu1  ;;  %7886 = vmatmul.mubr.msk.bf16.gmra.mxu1 %vm586_vm1, %v2545_v10  ;;  %7847 = vmatprep.mubr.msk.bf16.mxu0 %vm586_vm1, %v11648_v21  ;;  %v3390_v62 = vshll.u32 %v9373_v45, 16  ;;  %v2566_v10 = vrot.slane %v2564_v39, 2  ;;  %v11651_v21 = vld [vmem:[#allocation11_spill] sm:$0xff] }
 0x11c   : > { %v807_v36 = vpop.f32.mrf.mxu0  ;;  %7889 = vmatprep.mubr.msk.bf16.mxu1 %vm586_vm1, %v2549_v34  ;;  %v3388_v34 = vshrl.u32 %v9373_v45, 16 }
 0x11d   : > { %v9385_v4 = vadd.f32 %v1023_v43, %v807_v36  ;;  %v1403_v1 = vpop.f32.mrf.mxu1  ;;  %v2569_v43 = vrot.slane %v2567_v46, 3  ;;  %v3392_v32 = vrot.slane %v3390_v62, 1  ;;  %v9404_v36 = vld [vmem:[%s8718_s21 + $0x10] sm:$0xff]   ;;  %v2258_v62 = vrot.slane %v9341_v2, 2 }
 0x11e   : > { %v7630_v40 = vpop.f32.mrf.mxu0  ;;  %11652 = vst [vmem:[#allocation10_spill] sm:$0xff] %v9404_v36 }
 0x11f   : > { %v9391_v18 = vadd.f32 %v7668_v11, %v7630_v40  ;;  %v7712_v63 = vpop.f32.mrf.mxu1  ;;  %v2570_v46 = vor.u32 %v2569_v43, %v2566_v10  ;;  %v3393_v37 = vor.u32 %v3392_v32, %v3388_v34  ;;  %v11492_v43 = vshrl.u32 %v9388_v50, 16 }
 0x120   : > { %v810_v53 = vpop.f32.mrf.mxu0  ;;  %v2259_v34 = vsel %vm1942_vm4, %v9168_v6, %v2258_v62 }
 0x121   : > { %v9397_v41 = vadd.f32 %v1026_v31, %v810_v53  ;;  %v1406_v27 = vpop.f32.mrf.mxu1  ;;  %v11654_v31 = vld [vmem:[#allocation9_spill] sm:$0xff] }
 0x122   : > { %v7673_v19 = vpop.f32.mrf.mxu0  ;;  %7848 = vmatmul.mubr.msk.bf16.gmra.mxu0 %vm586_vm1, %v11651_v21  ;;  %v9413_v53 = vld [vmem:[%s8718_s21 + $0x18] sm:$0xff]  }
 0x123   : > { %11650 = vst [vmem:[#allocation12_spill] sm:$0xff] %v9397_v41  ;;  %v1314_v40 = vadd.f32 %v7673_v19, %v11653_v47  ;;  %v7715_v22 = vpop.f32.mrf.mxu1  ;;  %7890 = vmatmul.mubr.msk.bf16.gmra.mxu1 %vm586_vm1, %v2553_v48  ;;  %7851 = vmatprep.mubr.msk.bf16.mxu0 %vm586_vm1, %v11654_v31  ;;  %v11655_v19 = vshll.u32 %v9388_v50, 16  ;;  %v9421_v31 = vshll.u32 %v9404_v36, 16  ;;  %v9434_v32 = vshll.u32 %v9413_v53, 16 }
 0x124   : > { %v1169_v39 = vpop.f32.mrf.mxu0  ;;  %7893 = vmatprep.mubr.msk.bf16.mxu1 %vm586_vm1, %v2562_v13 }
 0x125   : > { %v1312_v21 = vadd.f32 %v1169_v39, %v9200_v33  ;;  %v1419_v11 = vpop.f32.mrf.mxu1  ;;  %v3397_v47 = vrot.slane %v11655_v19, 1  ;;  %v9418_v45 = vadd.f32 %v7711_v59, %v1314_v40  ;;  %11656 = vst [vmem:[#allocation14_spill] sm:$0xff] %v9421_v31  ;;  %v2571_v33 = vsel %vm2486_vm6, %v2561_v16, %v2570_v46  ;;  %11658 = vst [vmem:[#allocation23_spill] sm:$0xff] %v9434_v32  ;;  %v11659_v46 = vld [vmem:[#allocation24_spill] sm:$0xff] }
 0x126   : > { %v7674_v48 = vpop.f32.mrf.mxu0  ;;  %v9431_v59 = vshrl.u32 %v9404_v36, 16  ;;  %v3405_v6 = vrot.slane %v9421_v31, 1 }
 0x127   : > { %v1315_v13 = vadd.f32 %v7674_v48, %v9202_v51  ;;  %v7716_v10 = vpop.f32.mrf.mxu1  ;;  %v9425_v2 = vadd.f32 %v1403_v1, %v1312_v21  ;;  %v3398_v1 = vsel %vm437_vm2, %v3393_v37, %v3397_v47  ;;  %v3401_v37 = vor.u32 %v11492_v43, %v3397_v47  ;;  %v9461_v47 = vld [vmem:[%s8718_s21 + $0x28] sm:$0xff]  }
 0x128   : > { %v1172_v41 = vpop.f32.mrf.mxu0  ;;  %11657 = vst [vmem:[#allocation13_spill] sm:$0xff] %v9431_v59  ;;  %11661 = vst [vmem:[#allocation8_spill] sm:$0xff] %v9461_v47 }
 0x129   : > { %v1313_v51 = vadd.f32 %v1172_v41, %v9210_v44  ;;  %v1422_v40 = vpop.f32.mrf.mxu1  ;;  %v9438_v39 = vadd.f32 %v7712_v63, %v1315_v13  ;;  %v2260_v44 = vrot.slane %v9367_v35, 2  ;;  %v9450_v63 = vld [vmem:[%s8718_s21 + $0x20] sm:$0xff]   ;;  %v8437_v13 = vld [vmem:[%s8569_s14 + $0x10] sm:$0xff]  }
 0x12a   : > { %v7677_v16 = vpop.f32.mrf.mxu0  ;;  %7852 = vmatmul.mubr.msk.bf16.gmra.mxu0 %vm586_vm1, %v11659_v46  ;;  %11660 = vst [vmem:[#allocation6_spill] sm:$0xff] %v9450_v63 }
 0x12b   : > { %v1318_v21 = vadd.f32 %v7677_v16, %v9216_v15  ;;  %v7719_v19 = vpop.f32.mrf.mxu1  ;;  %7894 = vmatmul.mubr.msk.bf16.gmra.mxu1 %vm586_vm1, %v2571_v33  ;;  %7855 = vmatprep.mubr.msk.bf16.mxu0 %vm586_vm1, %v2259_v34  ;;  %v9452_v41 = vadd.f32 %v1406_v27, %v1313_v51  ;;  %v2845_v15 = vrot.slane %v8437_v13, 3  ;;  %v8438_v16 = vld [vmem:[%s8569_s14 + $0x18] sm:$0xff]   ;;  %v3409_v33 = vor.u32 %v9431_v59, %v3405_v6 }
 0x12c   : > { %v1185_v48 = vpop.f32.mrf.mxu0  ;;  %7937 = vmatprep.mubr.msk.bf16.mxu1 %vm586_vm1, %v3398_v1  ;;  %v2846_v46 = vrot.slane %v8438_v16, 3  ;;  %v3413_v34 = vrot.slane %v9434_v32, 1  ;;  %v2261_v13 = vsel %vm1942_vm4, %v2258_v62, %v2260_v44  ;;  %v9468_v16 = vshll.u32 %v9450_v63, 16  ;;  %v9489_v44 = vld [vmem:[%s8718_s21 + $0x30] sm:$0xff]  }
 0x12d   : > { %v1316_v31 = vadd.f32 %v1185_v48, %v9221_v8  ;;  %v1435_v36 = vpop.f32.mrf.mxu1  ;;  %v9463_v43 = vadd.f32 %v7715_v22, %v1318_v21  ;;  %v3406_v8 = vsel %vm437_vm2, %v3401_v37, %v3405_v6  ;;  %v9476_v21 = vshrl.u32 %v9413_v53, 16  ;;  %11667 = vst [vmem:[#allocation24_spill] sm:$0xff] %v9489_v44 }
 0x12e   : > { %v7678_v27 = vpop.f32.mrf.mxu0  ;;  %11662 = vst [vmem:[#allocation7_spill] sm:$0xff] %v9468_v16  ;;  %v2847_v48 = vsel %vm2844_vm7, %v2845_v15, %v2846_v46  ;;  %v3414_v22 = vsel %vm437_vm2, %v3409_v33, %v3413_v34  ;;  %v9480_v62 = vshrl.u32 %v9450_v63, 16  ;;  %v3421_v33 = vrot.slane %v9468_v16, 1 }
 0x12f   : > { %v1319_v51 = vadd.f32 %v7678_v27, %v9223_v20  ;;  %v7720_v1 = vpop.f32.mrf.mxu1  ;;  %v9470_v59 = vadd.f32 %v1419_v11, %v1316_v31  ;;  %11663 = vst [vmem:[#allocation19_spill] sm:$0xff] %v9476_v21  ;;  %v9483_v11 = vshll.u32 %v9461_v47, 16  ;;  %v3417_v63 = vor.u32 %v9476_v21, %v3413_v34  ;;  %v8441_v34 = vld [vmem:[%s11440_s2 + $0x8] sm:$0x3] }
 0x130   : > { %v1188_v32 = vpop.f32.mrf.mxu0  ;;  %11664 = vst [vmem:[#allocation11_spill] sm:$0xff] %v9480_v62 }
 0x131   : > { %v1317_v20 = vadd.f32 %v1188_v32, %v9229_v7  ;;  %v1438_v27 = vpop.f32.mrf.mxu1  ;;  %11665 = vst [vmem:[#allocation25_spill] sm:$0xff] %v9483_v11  ;;  %v9485_v31 = vadd.f32 %v7716_v10, %v1319_v51  ;;  %v8439_v7 = vld [vmem:[%s8569_s14 + $0x20] sm:$0xff]   ;;  %v3429_v16 = vrot.slane %v9483_v11, 1  ;;  %v9523_v11 = vshrl.u32 %v9461_v47, 16 }
 0x132   : > { %v7681_v6 = vpop.f32.mrf.mxu0  ;;  %7856 = vmatmul.mubr.msk.bf16.gmra.mxu0 %vm586_vm1, %v2261_v13  ;;  %v2848_v32 = vrot.slane %v8439_v7, 3  ;;  %v11668_v13 = vld [vmem:[#allocation5_spill] sm:$0xff]  ;;  %v3425_v7 = vor.u32 %v9480_v62, %v3421_v33 }
 0x133   : > { %11666 = vst [vmem:[#allocation9_spill] sm:$0xff] %v9485_v31  ;;  %v1322_v37 = vadd.f32 %v7681_v6, %v9235_v28  ;;  %v7723_v15 = vpop.f32.mrf.mxu1  ;;  %7938 = vmatmul.mubr.msk.bf16.vlgmr.msra.gmra.mxu1 %vm586_vm1, %v3406_v8  ;;  %7899 = vmatprep.mubr.msk.bf16.mxu0 %vm586_vm1, %v2847_v48  ;;  %v9496_v10 = vadd.f32 %v1422_v40, %v1317_v20  ;;  %v8440_v31 = vld [vmem:[%s8569_s14 + $0x28] sm:$0xff]   ;;  %v9503_v6 = vld [vmem:[%s8718_s21 + $0x38] sm:$0xff]   ;;  %v9515_v20 = vshll.u32 %v9489_v44, 16  ;;  %11671 = vst [vmem:[#allocation27_spill] sm:$0xff] %v9523_v11 }
 0x134   : > { %v1201_v51 = vpop.f32.mrf.mxu0  ;;  %7941 = vmatprep.mubr.msk.bf16.mxu1 %vm586_vm1, %v3414_v22  ;;  %8012 = vmatpush3.bf16.msra.mxu1 %v11668_v13  ;;  %v2850_v28 = vrot.slane %v8440_v31, 3  ;;  %v9529_v62 = vshll.u32 %v9503_v6, 16 }
 0x135   : > { %v1320_v8 = vadd.f32 %v1201_v51, %v9242_v57  ;;  %v1451_v48 = vpop.f32.mrf.mxu1  ;;  %v9508_v40 = vadd.f32 %v7719_v19, %v1322_v37  ;;  %8370 = vmatprep.subr.msk.bf16.mxu1 %vm641_vm0, %v8441_v34  ;;  %11669 = vst [vmem:[#allocation5_spill] sm:$0xff] %v9515_v20  ;;  %v2849_v51 = vsel %vm2844_vm7, %v2846_v46, %v2848_v32  ;;  %v9526_v34 = vshrl.u32 %v9489_v44, 16 }
 0x136   : > { %v7682_v22 = vpop.f32.mrf.mxu0  ;;  %v3422_v37 = vsel %vm437_vm2, %v3417_v63, %v3421_v33  ;;  %11673 = vst [vmem:[#allocation29_spill] sm:$0xff] %v9529_v62  ;;  %v2851_v46 = vsel %vm2844_vm7, %v2848_v32, %v2850_v28  ;;  %v8442_v33 = vld [vmem:[%s8569_s14 + $0x30] sm:$0xff]   ;;  %v3437_v44 = vrot.slane %v9515_v20, 1  ;;  %v9543_v32 = vld [vmem:[%s8718_s21 + $0x40] sm:$0xff]  }
 0x137   : > { %v1323_v31 = vadd.f32 %v7682_v22, %v9248_v58  ;;  %v7724_v57 = vpop.f32.mrf.mxu1  ;;  %v9519_v13 = vadd.f32 %v1435_v36, %v1320_v8  ;;  %11672 = vst [vmem:[#allocation28_spill] sm:$0xff] %v9526_v34  ;;  %v3430_v36 = vsel %vm437_vm2, %v3425_v7, %v3429_v16  ;;  %v2852_v21 = vrot.slane %v8442_v33, 3  ;;  %v9555_v33 = vld [vmem:[%s8718_s21 + $0x48] sm:$0xff]  }
 0x138   : > { %v1204_v19 = vpop.f32.mrf.mxu0 }
 0x139   : > { %11670 = vst [vmem:[#allocation26_spill] sm:$0xff] %v9519_v13  ;;  %v1321_v58 = vadd.f32 %v1204_v19, %v9257_v0  ;;  %v1454_v22 = vpop.f32.mrf.mxu1  ;;  %v9534_v8 = vadd.f32 %v7720_v1, %v1323_v31  ;;  %v11674_v13 = vld [vmem:[#allocation2_spill] sm:$0xff]  ;;  %v3433_v31 = vor.u32 %v9523_v11, %v3429_v16 }
 0x13a   : > { %v7685_v63 = vpop.f32.mrf.mxu0  ;;  %7900 = vmatmul.mubr.msk.bf16.vlgmr.msra.gmra.mxu0 %vm586_vm1, %v2849_v51  ;;  %11675 = vst [vmem:[#allocation2_spill] sm:$0xff] %v9543_v32  ;;  %v8443_v51 = vld [vmem:[%s8569_s14 + $0x38] sm:$0xff]  }
 0x13b   : > { %v1326_v47 = vadd.f32 %v7685_v63, %v9264_v14  ;;  %7974 = vmatpush3.bf16.msra.mxu0 %v11674_v13  ;;  %v7727_v0 = vpop.f32.mrf.mxu1  ;;  %7942 = vmatmul.mubr.msk.bf16.gmra.mxu1 %vm586_vm1, %v3422_v37  ;;  %v9545_v1 = vadd.f32 %v1438_v27, %v1321_v58  ;;  %v2854_v19 = vrot.slane %v8443_v51, 3  ;;  %v3441_v14 = vor.u32 %v9526_v34, %v3437_v44  ;;  %v8444_v27 = vld [vmem:[%s11440_s2 + $0x6] sm:$0x3] }
 0x13c   : > { %v1217_v7 = vpop.f32.mrf.mxu0  ;;  %7903 = vmatprep.mubr.msk.bf16.mxu0 %vm586_vm1, %v2851_v46  ;;  %7945 = vmatprep.mubr.msk.bf16.mxu1 %vm586_vm1, %v3430_v36  ;;  %v3445_v13 = vrot.slane %v9529_v62, 1  ;;  %v2853_v46 = vsel %vm2844_vm7, %v2850_v28, %v2852_v21  ;;  %v9581_v34 = vshll.u32 %v9555_v33, 16 }
 0x13d   : > { %v1324_v63 = vadd.f32 %v1217_v7, %v9271_v61  ;;  %v1467_v37 = vpop.f32.mrf.mxu1  ;;  %8369 = vmatprep.subr.msk.bf16.mxu0 %vm641_vm0, %v8444_v27  ;;  %v9561_v16 = vadd.f32 %v7723_v15, %v1326_v47  ;;  %v9566_v61 = vshrl.u32 %v9503_v6, 16  ;;  %v9569_v7 = vshll.u32 %v9543_v32, 16 }
 0x13e   : > { %v7686_v58 = vpop.f32.mrf.mxu0  ;;  %v3438_v47 = vsel %vm437_vm2, %v3433_v31, %v3437_v44  ;;  %v2855_v15 = vsel %vm2844_vm7, %v2852_v21, %v2854_v19  ;;  %v3446_v28 = vsel %vm437_vm2, %v3441_v14, %v3445_v13  ;;  %11679 = vst [vmem:[#allocation33_spill] sm:$0xff] %v9581_v34  ;;  %v8445_v44 = vld [vmem:[%s8569_s14 + $0x40] sm:$0xff]   ;;  %v9588_v31 = vld [vmem:[%s8718_s21 + $0x50] sm:$0xff]  }
 0x13f   : > { %v1327_v36 = vadd.f32 %v7686_v58, %v9277_v3  ;;  %v7728_v51 = vpop.f32.mrf.mxu1  ;;  %11676 = vst [vmem:[#allocation30_spill] sm:$0xff] %v9566_v61  ;;  %11677 = vst [vmem:[#allocation31_spill] sm:$0xff] %v9569_v7  ;;  %v9571_v62 = vadd.f32 %v1451_v48, %v1324_v63  ;;  %v9578_v58 = vshrl.u32 %v9543_v32, 16  ;;  %v2856_v21 = vrot.slane %v8445_v44, 3  ;;  %v9600_v32 = vld [vmem:[%s8718_s21 + $0x58] sm:$0xff]  }
 0x140   : > { %v1220_v20 = vpop.f32.mrf.mxu0  ;;  %11681 = vst [vmem:[#allocation35_spill] sm:$0xff] %v9588_v31  ;;  %v3449_v14 = vor.u32 %v9566_v61, %v3445_v13  ;;  %11682 = vst [vmem:[#allocation36_spill] sm:$0xff] %v9600_v32 }
 0x141   : > { %v1325_v3 = vadd.f32 %v1220_v20, %v9282_v9  ;;  %v1470_v27 = vpop.f32.mrf.mxu1  ;;  %11678 = vst [vmem:[#allocation32_spill] sm:$0xff] %v9578_v58  ;;  %v9583_v11 = vadd.f32 %v7724_v57, %v1327_v36  ;;  %v3453_v57 = vrot.slane %v9569_v7, 1 }
 0x142   : > { %v7689_v48 = vpop.f32.mrf.mxu0  ;;  %7904 = vmatmul.mubr.msk.bf16.gmra.mxu0 %vm586_vm1, %v2853_v46  ;;  %v8446_v46 = vld [vmem:[%s8569_s14 + $0x48] sm:$0xff]  }
 0x143   : > { %11680 = vst [vmem:[#allocation34_spill] sm:$0xff] %v9583_v11  ;;  %v1330_v9 = vadd.f32 %v7689_v48, %v9289_v52  ;;  %v7731_v20 = vpop.f32.mrf.mxu1  ;;  %7946 = vmatmul.mubr.msk.bf16.gmra.mxu1 %vm586_vm1, %v3438_v47  ;;  %7907 = vmatprep.mubr.msk.bf16.mxu0 %vm586_vm1, %v2855_v15  ;;  %v9595_v63 = vadd.f32 %v1454_v22, %v1325_v3  ;;  %v2858_v44 = vrot.slane %v8446_v46, 3  ;;  %v3461_v15 = vrot.slane %v9581_v34, 1 }
 0x144   : > { %v1233_v36 = vpop.f32.mrf.mxu0  ;;  %7949 = vmatprep.mubr.msk.bf16.mxu1 %vm586_vm1, %v3446_v28  ;;  %v3457_v47 = vor.u32 %v9578_v58, %v3453_v57  ;;  %v9608_v22 = vshll.u32 %v9588_v31, 16  ;;  %v2857_v46 = vsel %vm2844_vm7, %v2854_v19, %v2856_v21  ;;  %v3454_v7 = vsel %vm437_vm2, %v3449_v14, %v3453_v57 }
 0x145   : > { %v1328_v52 = vadd.f32 %v1233_v36, %v9295_v49  ;;  %v1483_v48 = vpop.f32.mrf.mxu1  ;;  %v9605_v11 = vadd.f32 %v7727_v0, %v1330_v9  ;;  %v2859_v58 = vsel %vm2844_vm7, %v2856_v21, %v2858_v44  ;;  %v9617_v0 = vshrl.u32 %v9555_v33, 16  ;;  %v8447_v21 = vld [vmem:[%s8569_s14 + $0x50] sm:$0xff]  }
 0x146   : > { %v7690_v13 = vpop.f32.mrf.mxu0  ;;  %11683 = vst [vmem:[#allocation37_spill] sm:$0xff] %v9608_v22  ;;  %v9620_v9 = vshrl.u32 %v9588_v31, 16  ;;  %v3462_v14 = vsel %vm437_vm2, %v3457_v47, %v3461_v15  ;;  %v3469_v34 = vrot.slane %v9608_v22, 1  ;;  %v9647_v22 = vld [vmem:[%s8718_s21 + $0x68] sm:$0xff]  }
 0x147   : > { %v1331_v3 = vadd.f32 %v7690_v13, %v9297_v17  ;;  %v7732_v28 = vpop.f32.mrf.mxu1  ;;  %v9613_v49 = vadd.f32 %v1467_v37, %v1328_v52  ;;  %11684 = vst [vmem:[#allocation38_spill] sm:$0xff] %v9617_v0  ;;  %v9623_v17 = vshll.u32 %v9600_v32, 16  ;;  %v2860_v52 = vrot.slane %v8447_v21, 3 }
 0x148   : > { %v1236_v36 = vpop.f32.mrf.mxu0  ;;  %11685 = vst [vmem:[#allocation39_spill] sm:$0xff] %v9620_v9  ;;  %v3473_v21 = vor.u32 %v9620_v9, %v3469_v34 }
 0x149   : > { %11686 = vst [vmem:[#allocation40_spill] sm:$0xff] %v9623_v17  ;;  %v1329_v13 = vadd.f32 %v1236_v36, %v9302_v12  ;;  %v1486_v19 = vpop.f32.mrf.mxu1  ;;  %v9627_v37 = vadd.f32 %v7728_v51, %v1331_v3  ;;  %v9636_v12 = vld [vmem:[%s8718_s21 + $0x60] sm:$0xff]   ;;  %v3465_v3 = vor.u32 %v9617_v0, %v3461_v15  ;;  %v9669_v0 = vshll.u32 %v9647_v22, 16 }
 0x14a   : > { %v7693_v57 = vpop.f32.mrf.mxu0  ;;  %7908 = vmatmul.mubr.msk.bf16.gmra.mxu0 %vm586_vm1, %v2857_v46  ;;  %11687 = vst [vmem:[#allocation41_spill] sm:$0xff] %v9636_v12  ;;  %v8448_v46 = vld [vmem:[%s8569_s14 + $0x58] sm:$0xff]   ;;  %v9666_v9 = vshrl.u32 %v9636_v12, 16 }
 0x14b   : > { %v1334_v61 = vadd.f32 %v7693_v57, %v9309_v55  ;;  %v7735_v31 = vpop.f32.mrf.mxu1  ;;  %7950 = vmatmul.mubr.msk.bf16.gmra.mxu1 %vm586_vm1, %v3454_v7  ;;  %7911 = vmatprep.mubr.msk.bf16.mxu0 %vm586_vm1, %v2859_v58  ;;  %v9638_v47 = vadd.f32 %v1470_v27, %v1329_v13  ;;  %v2862_v36 = vrot.slane %v8448_v46, 3  ;;  %v3477_v55 = vrot.slane %v9623_v17, 1  ;;  %11691 = vst [vmem:[#allocation45_spill] sm:$0xff] %v9669_v0 }
 0x14c   : > { %v1249_v51 = vpop.f32.mrf.mxu0  ;;  %7953 = vmatprep.mubr.msk.bf16.mxu1 %vm586_vm1, %v3462_v14  ;;  %v2861_v13 = vsel %vm2844_vm7, %v2858_v44, %v2860_v52  ;;  %v9654_v46 = vshrl.u32 %v9600_v32, 16  ;;  %v9657_v17 = vshll.u32 %v9636_v12, 16  ;;  %11690 = vst [vmem:[#allocation44_spill] sm:$0xff] %v9666_v9  ;;  %v9688_v12 = vld [vmem:[%s8718_s21 + $0x78] sm:$0xff]  }
 0x14d   : > { %v1332_v57 = vadd.f32 %v1249_v51, %v9315_v60  ;;  %v1499_v7 = vpop.f32.mrf.mxu1  ;;  %v9649_v58 = vadd.f32 %v7731_v20, %v1334_v61  ;;  %v3470_v61 = vsel %vm437_vm2, %v3465_v3, %v3469_v34  ;;  %v2863_v20 = vsel %vm2844_vm7, %v2860_v52, %v2862_v36  ;;  %v8449_v34 = vld [vmem:[%s8569_s14 + $0x60] sm:$0xff]   ;;  %v9676_v3 = vld [vmem:[%s8718_s21 + $0x70] sm:$0xff]   ;;  %11694 = vst [vmem:[#allocation48_spill] sm:$0xff] %v9688_v12 }
 0x14e   : > { %v7694_v27 = vpop.f32.mrf.mxu0  ;;  %11688 = vst [vmem:[#allocation42_spill] sm:$0xff] %v9654_v46  ;;  %11689 = vst [vmem:[#allocation43_spill] sm:$0xff] %v9657_v17  ;;  %v3478_v44 = vsel %vm437_vm2, %v3473_v21, %v3477_v55  ;;  %v2864_v52 = vrot.slane %v8449_v34, 3 }
 0x14f   : > { %v1335_v15 = vadd.f32 %v7694_v27, %v9317_v56  ;;  %v7736_v14 = vpop.f32.mrf.mxu1  ;;  %v9659_v60 = vadd.f32 %v1483_v48, %v1332_v57  ;;  %11693 = vst [vmem:[#allocation47_spill] sm:$0xff] %v9676_v3  ;;  %v3481_v57 = vor.u32 %v9654_v46, %v3477_v55 }
 0x150   : > { %v1252_v51 = vpop.f32.mrf.mxu0 }
 0x151   : > { %v1333_v56 = vadd.f32 %v1252_v51, %v9322_v25  ;;  %v1502_v27 = vpop.f32.mrf.mxu1  ;;  %v9671_v32 = vadd.f32 %v7732_v28, %v1335_v15  ;;  %v3485_v28 = vrot.slane %v9657_v17, 1 }
 0x152   : > { %v7697_v48 = vpop.f32.mrf.mxu0  ;;  %7912 = vmatmul.mubr.msk.bf16.gmra.mxu0 %vm586_vm1, %v2861_v13  ;;  %v8450_v13 = vld [vmem:[%s8569_s14 + $0x68] sm:$0xff]  }
 0x153   : > { %11692 = vst [vmem:[#allocation46_spill] sm:$0xff] %v9671_v32  ;;  %v1338_v25 = vadd.f32 %v7697_v48, %v9329_v30  ;;  %v7739_v21 = vpop.f32.mrf.mxu1  ;;  %7954 = vmatmul.mubr.msk.bf16.gmra.mxu1 %vm586_vm1, %v3470_v61  ;;  %7915 = vmatprep.mubr.msk.bf16.mxu0 %vm586_vm1, %v2863_v20  ;;  %v9683_v15 = vadd.f32 %v1486_v19, %v1333_v56  ;;  %v2866_v34 = vrot.slane %v8450_v13, 3  ;;  %v3493_v20 = vrot.slane %v9669_v0, 1 }
 0x154   : > { %v1265_v51 = vpop.f32.mrf.mxu0  ;;  %7957 = vmatprep.mubr.msk.bf16.mxu1 %vm586_vm1, %v3478_v44  ;;  %v3489_v61 = vor.u32 %v9666_v9, %v3485_v28  ;;  %v9696_v19 = vshll.u32 %v9676_v3, 16  ;;  %v2865_v13 = vsel %vm2844_vm7, %v2862_v36, %v2864_v52  ;;  %v3486_v17 = vsel %vm437_vm2, %v3481_v57, %v3485_v28  ;;  %v9724_v9 = vld [vmem:[%s8718_s21 + $0x80] sm:$0xff]  }
 0x155   : > { %v1336_v30 = vadd.f32 %v1265_v51, %v9336_v29  ;;  %v1515_v48 = vpop.f32.mrf.mxu1  ;;  %v9693_v32 = vadd.f32 %v7735_v31, %v1338_v25  ;;  %v2867_v51 = vsel %vm2844_vm7, %v2864_v52, %v2866_v34  ;;  %v9705_v31 = vshrl.u32 %v9647_v22, 16  ;;  %11699 = vst [vmem:[#allocation53_spill] sm:$0xff] %v9724_v9 }
 0x156   : > { %v7698_v55 = vpop.f32.mrf.mxu0  ;;  %11695 = vst [vmem:[#allocation49_spill] sm:$0xff] %v9696_v19  ;;  %v9708_v25 = vshrl.u32 %v9676_v3, 16  ;;  %v3501_v52 = vrot.slane %v9696_v19, 1  ;;  %v9735_v3 = vld [vmem:[%s8718_s21 + $0x88] sm:$0xff]  }
 0x157   : > { %v1339_v56 = vadd.f32 %v7698_v55, %v9338_v26  ;;  %v7740_v44 = vpop.f32.mrf.mxu1  ;;  %v9701_v46 = vadd.f32 %v1499_v7, %v1336_v30  ;;  %11696 = vst [vmem:[#allocation50_spill] sm:$0xff] %v9705_v31  ;;  %v9711_v26 = vshll.u32 %v9688_v12, 16  ;;  %v3494_v7 = vsel %vm437_vm2, %v3489_v61, %v3493_v20 }
 0x158   : > { %v1268_v29 = vpop.f32.mrf.mxu0  ;;  %11697 = vst [vmem:[#allocation51_spill] sm:$0xff] %v9708_v25 }
 0x159   : > { %11698 = vst [vmem:[#allocation52_spill] sm:$0xff] %v9711_v26  ;;  %v1337_v36 = vadd.f32 %v1268_v29, %v9346_v38  ;;  %v1518_v55 = vpop.f32.mrf.mxu1  ;;  %v9715_v57 = vadd.f32 %v7736_v14, %v1339_v56  ;;  %v8451_v38 = vld [vmem:[%s8569_s14 + $0x70] sm:$0xff]   ;;  %v3497_v56 = vor.u32 %v9705_v31, %v3493_v20 }
 0x15a   : > { %v7701_v28 = vpop.f32.mrf.mxu0  ;;  %7916 = vmatmul.mubr.msk.bf16.gmra.mxu0 %vm586_vm1, %v2865_v13  ;;  %v2868_v29 = vrot.slane %v8451_v38, 3  ;;  %v8452_v13 = vld [vmem:[%s8569_s14 + $0x78] sm:$0xff]  }
 0x15b   : > { %v1342_v30 = vadd.f32 %v7701_v28, %v9353_v23  ;;  %v7743_v0 = vpop.f32.mrf.mxu1  ;;  %7958 = vmatmul.mubr.msk.bf16.gmra.mxu1 %vm586_vm1, %v3486_v17  ;;  %7919 = vmatprep.mubr.msk.bf16.mxu0 %vm586_vm1, %v2867_v51  ;;  %v9726_v61 = vadd.f32 %v1502_v27, %v1337_v36  ;;  %v2870_v19 = vrot.slane %v8452_v13, 3  ;;  %v3505_v23 = vor.u32 %v9708_v25, %v3501_v52 }
 0x15c   : > { %v1281_v14 = vpop.f32.mrf.mxu0  ;;  %7961 = vmatprep.mubr.msk.bf16.mxu1 %vm586_vm1, %v3494_v7  ;;  %v3509_v28 = vrot.slane %v9711_v26, 1  ;;  %v2869_v7 = vsel %vm2844_vm7, %v2866_v34, %v2868_v29  ;;  %v9742_v13 = vshll.u32 %v9724_v9, 16  ;;  %v9754_v34 = vshrl.u32 %v9724_v9, 16 }
 0x15d   : > { %v1340_v17 = vadd.f32 %v1281_v14, %v9361_v5  ;;  %v1531_v51 = vpop.f32.mrf.mxu1  ;;  %v9737_v38 = vadd.f32 %v7739_v21, %v1342_v30  ;;  %v3502_v5 = vsel %vm437_vm2, %v3497_v56, %v3501_v52  ;;  %v2871_v14 = vsel %vm2844_vm7, %v2868_v29, %v2870_v19 }
 0x15e   : > { %v7702_v27 = vpop.f32.mrf.mxu0  ;;  %11700 = vst [vmem:[#allocation54_spill] sm:$0xff] %v9742_v13  ;;  %v3510_v21 = vsel %vm437_vm2, %v3505_v23, %v3509_v28  ;;  %v9750_v30 = vshrl.u32 %v9688_v12, 16  ;;  %11702 = vst [vmem:[#allocation56_spill] sm:$0xff] %v9754_v34  ;;  %v3517_v31 = vrot.slane %v9742_v13, 1 }
 0x15f   : > { %v1343_v36 = vadd.f32 %v7702_v27, %v9363_v42  ;;  %v7744_v20 = vpop.f32.mrf.mxu1  ;;  %v9744_v25 = vadd.f32 %v1515_v48, %v1340_v17  ;;  %v9757_v48 = vshll.u32 %v9735_v3, 16  ;;  %v9760_v17 = vld [vmem:[%s8718_s21 + $0x90] sm:$0xf] }
 0x160   : > { %v1284_v26 = vpop.f32.mrf.mxu0  ;;  %11701 = vst [vmem:[#allocation55_spill] sm:$0xff] %v9750_v30  ;;  %11704 = vst [vmem:[#allocation58_spill] sm:$0xff] %v9760_v17 }
 0x161   : > { %v1341_v42 = vadd.f32 %v1284_v26, %v9369_v24  ;;  %v1534_v27 = vpop.f32.mrf.mxu1  ;;  %11703 = vst [vmem:[#allocation57_spill] sm:$0xff] %v9757_v48  ;;  %v9762_v52 = vadd.f32 %v7740_v44, %v1343_v36  ;;  %v8453_v24 = vld [vmem:[%s8569_s14 + $0x80] sm:$0xff]   ;;  %v3513_v44 = vor.u32 %v9750_v30, %v3509_v28  ;;  %v8454_v36 = vld [vmem:[%s8569_s14 + $0x88] sm:$0xff]  }
 0x162   : > { %v7705_v29 = vpop.f32.mrf.mxu0  ;;  %7920 = vmatmul.mubr.msk.bf16.gmra.mxu0 %vm586_vm1, %v2869_v7  ;;  %v2872_v26 = vrot.slane %v8453_v24, 3  ;;  %v2874_v7 = vrot.slane %v8454_v36, 3  ;;  %v3525_v24 = vrot.slane %v9757_v48, 1 }
 0x163   : > { %v1346_v56 = vadd.f32 %v7705_v29, %v9377_v54  ;;  %v7787_v23 = vpop.f32.mrf.mxu1  ;;  %7962 = vmatmul.mubr.msk.bf16.gmra.mxu1 %vm586_vm1, %v3502_v5  ;;  %7923 = vmatprep.mubr.msk.bf16.mxu0 %vm586_vm1, %v2871_v14  ;;  %v9770_v9 = vadd.f32 %v1518_v55, %v1341_v42  ;;  %v9777_v54 = vcombine.low %v9760_v17, %v9760_v17 }
 0x164   : > { %v1297_v12 = vpop.f32.mrf.mxu0  ;;  %7965 = vmatprep.mubr.msk.bf16.mxu1 %vm586_vm1, %v3510_v21  ;;  %v3521_v29 = vor.u32 %v9754_v34, %v3517_v31  ;;  %v2873_v21 = vsel %vm2844_vm7, %v2870_v19, %v2872_v26  ;;  %v3518_v17 = vsel %vm437_vm2, %v3513_v44, %v3517_v31 }
 0x165   : > { %11705 = vst [vmem:[#allocation59_spill] sm:$0xff] %v9777_v54  ;;  %v1344_v5 = vadd.f32 %v1297_v12, %v9385_v4  ;;  %v2071_v14 = vpop.f32.mrf.mxu1  ;;  %v9782_v55 = vadd.f32 %v7743_v0, %v1346_v56  ;;  %v2875_v4 = vsel %vm2844_vm7, %v2872_v26, %v2874_v7  ;;  %v9791_v12 = vshrl.u32 %v9735_v3, 16  ;;  %v11707_v0 = vld [vmem:[#allocation12_spill] sm:$0xff]  ;;  %v11708_v26 = vld [vmem:[#allocation17_spill] sm:$0xff] }
 0x166   : > { %v7706_v42 = vpop.f32.mrf.mxu0  ;;  %v3531_v48 = vshll.u32 %v9777_v54, 16  ;;  %v2876_v44 = vrot.slane %v11708_v26, 3 }
 0x167   : > { %v1347_v28 = vadd.f32 %v7706_v42, %v9391_v18  ;;  %v7788_v13 = vpop.f32.mrf.mxu1  ;;  %v9786_v36 = vadd.f32 %v1531_v51, %v1344_v5  ;;  %11706 = vst [vmem:[#allocation60_spill] sm:$0xff] %v9791_v12  ;;  %v3526_v18 = vsel %vm437_vm2, %v3521_v29, %v3525_v24  ;;  %v11710_v29 = vld [vmem:[#allocation22_spill] sm:$0xff] }
 0x168   : > { %v1300_v30 = vpop.f32.mrf.mxu0 }
 0x169   : > { %v1345_v56 = vadd.f32 %v1300_v30, %v11707_v0  ;;  %v2074_v34 = vpop.f32.mrf.mxu1  ;;  %v9796_v42 = vadd.f32 %v7744_v20, %v1347_v28  ;;  %v3529_v0 = vor.u32 %v9791_v12, %v3525_v24  ;;  %v3533_v20 = vrot.slane %v3531_v48, 1 }
 0x16a   : > { %v7749_v19 = vpop.f32.mrf.mxu0  ;;  %7924 = vmatmul.mubr.msk.bf16.gmra.mxu0 %vm586_vm1, %v2873_v21  ;;  %v2878_v28 = vrot.slane %v11710_v29, 3  ;;  %v2877_v24 = vsel %vm2844_vm7, %v2874_v7, %v2876_v44 }
 0x16b   : > { %v1906_v51 = vadd.f32 %v7749_v19, %v9418_v45  ;;  %v7791_v31 = vpop.f32.mrf.mxu1  ;;  %7966 = vmatmul.mubr.msk.bf16.gmra.mxu1 %vm586_vm1, %v3518_v17  ;;  %7927 = vmatprep.mubr.msk.bf16.mxu0 %vm586_vm1, %v2875_v4  ;;  %v9803_v5 = vadd.f32 %v1534_v27, %v1345_v56  ;;  %v11711_v19 = vld [vmem:[#allocation18_spill] sm:$0xff]  ;;  %v3980_v17 = vrot.slane %v9388_v50, 1 }
 0x16c   : > { %v1761_v30 = vpop.f32.mrf.mxu0  ;;  %7969 = vmatprep.mubr.msk.bf16.mxu1 %vm586_vm1, %v3526_v18  ;;  %v3979_v54 = vrot.slane %v11711_v19, 1  ;;  %v3534_v18 = vsel %vm437_vm2, %v3529_v0, %v3533_v20 }
 0x16d   : > { %11709 = vst [vmem:[#allocation12_spill] sm:$0xff] %v9803_v5  ;;  %v1904_v21 = vadd.f32 %v1761_v30, %v9425_v2  ;;  %v2087_v45 = vpop.f32.mrf.mxu1  ;;  %v9811_v4 = vadd.f32 %v7787_v23, %v1906_v51  ;;  %v2879_v2 = vsel %vm2844_vm7, %v2876_v44, %v2878_v28 }
 0x16e   : > { %v7750_v26 = vpop.f32.mrf.mxu0  ;;  %v3981_v5 = vsel %vm1040_vm3, %v3979_v54, %v3980_v17  ;;  %v11712_v54 = vld [vmem:[#allocation10_spill] sm:$0xff] }
 0x16f   : > { %v1907_v27 = vadd.f32 %v7750_v26, %v9438_v39  ;;  %v7792_v56 = vpop.f32.mrf.mxu1  ;;  %v9815_v12 = vadd.f32 %v2071_v14, %v1904_v21  ;;  %v2880_v14 = vrot.slane %v9367_v35, 3  ;;  %v3984_v21 = vrot.slane %v9413_v53, 1 }
 0x170   : > { %v1764_v48 = vpop.f32.mrf.mxu0 }
 0x171   : > { %v1905_v30 = vadd.f32 %v1764_v48, %v9452_v41  ;;  %v2090_v29 = vpop.f32.mrf.mxu1  ;;  %v9821_v23 = vadd.f32 %v7788_v13, %v1907_v27  ;;  %v3982_v13 = vrot.slane %v11712_v54, 1  ;;  %v11713_v27 = vld [vmem:[#allocation9_spill] sm:$0xff]  ;;  %v2881_v35 = vsel %vm2844_vm7, %v2878_v28, %v2880_v14  ;;  %v11716_v14 = vld [vmem:[#allocation16_spill] sm:$0xff] }
 0x172   : > { %v7753_v51 = vpop.f32.mrf.mxu0  ;;  %7928 = vmatmul.mubr.msk.bf16.gmra.mxu0 %vm586_vm1, %v2877_v24 }
 0x173   : > { %v1910_v39 = vadd.f32 %v7753_v51, %v9463_v43  ;;  %v7795_v7 = vpop.f32.mrf.mxu1  ;;  %7970 = vmatmul.mubr.msk.bf16.gmra.mxu1 %vm586_vm1, %v3534_v18  ;;  %7931 = vmatprep.mubr.msk.bf16.mxu0 %vm586_vm1, %v2879_v2  ;;  %v9828_v44 = vadd.f32 %v2074_v34, %v1905_v30  ;;  %v9845_v30 = vsel %vm1040_vm3, %v3982_v13, %v3984_v21 }
 0x174   : > { %v1777_v41 = vpop.f32.mrf.mxu0  ;;  %8013 = vmatprep.mubr.msk.bf16.mxu1 %vm586_vm1, %v3981_v5  ;;  %v9841_v5 = vsel %vm1040_vm3, %v3980_v17, %v3982_v13  ;;  %11714 = vst [vmem:[#allocation17_spill] sm:$0xff] %v9845_v30  ;;  %v11715_v17 = vld [vmem:[#allocation6_spill] sm:$0xff] }
 0x175   : > { %v1908_v0 = vadd.f32 %v1777_v41, %v9470_v59  ;;  %v2103_v20 = vpop.f32.mrf.mxu1  ;;  %v9834_v43 = vadd.f32 %v7791_v31, %v1910_v39  ;;  %v11717_v41 = vld [vmem:[#allocation26_spill] sm:$0xff] }
 0x176   : > { %v7754_v26 = vpop.f32.mrf.mxu0 }
 0x177   : > { %v1911_v24 = vadd.f32 %v7754_v26, %v11713_v27  ;;  %v7796_v48 = vpop.f32.mrf.mxu1  ;;  %v9838_v34 = vadd.f32 %v2087_v45, %v1908_v0  ;;  %v11718_v0 = vld [vmem:[#allocation8_spill] sm:$0xff] }
 0x178   : > { %v1780_v18 = vpop.f32.mrf.mxu0  ;;  %v3988_v26 = vrot.slane %v11718_v0, 1 }
 0x179   : > { %v1909_v2 = vadd.f32 %v1780_v18, %v9496_v10  ;;  %v2106_v59 = vpop.f32.mrf.mxu1  ;;  %v9847_v31 = vadd.f32 %v7792_v56, %v1911_v24  ;;  %v3986_v56 = vrot.slane %v11715_v17, 1 }
 0x17a   : > { %v7757_v51 = vpop.f32.mrf.mxu0  ;;  %7932 = vmatmul.mubr.msk.bf16.gmra.mxu0 %vm586_vm1, %v2881_v35 }
 0x17b   : > { %v1914_v39 = vadd.f32 %v7757_v51, %v9508_v40  ;;  %v7799_v28 = vpop.f32.mrf.mxu1  ;;  %8014 = vmatmul.mubr.msk.bf16.vlgmr.msra.gmra.mxu1 %vm586_vm1, %v9841_v5  ;;  %7975 = vmatprep.mubr.msk.bf16.mxu0 %vm586_vm1, %v11711_v19  ;;  %v9855_v45 = vadd.f32 %v2090_v29, %v1909_v2  ;;  %v8455_v19 = vld [vmem:[%s11440_s2 + $0xc] sm:$0x3]  ;;  %v9873_v51 = vsel %vm1040_vm3, %v3984_v21, %v3986_v56 }
 0x17c   : > { %v1793_v10 = vpop.f32.mrf.mxu0  ;;  %8017 = vmatprep.mubr.msk.bf16.mxu1 %vm586_vm1, %v9845_v30  ;;  %8088 = vmatpush3.bf16.msra.mxu1 %v11716_v14  ;;  %11719 = vst [vmem:[#allocation22_spill] sm:$0xff] %v9873_v51 }
 0x17d   : > { %v1912_v13 = vadd.f32 %v1793_v10, %v11717_v41  ;;  %v2119_v40 = vpop.f32.mrf.mxu1  ;;  %v9863_v27 = vadd.f32 %v7795_v7, %v1914_v39  ;;  %8372 = vmatprep.subr.msk.bf16.mxu1 %vm641_vm0, %v8455_v19  ;;  %v9877_v39 = vsel %vm1040_vm3, %v3986_v56, %v3988_v26 }
 0x17e   : > { %v7758_v29 = vpop.f32.mrf.mxu0  ;;  %11720 = vst [vmem:[#allocation18_spill] sm:$0xff] %v9877_v39 }
 0x17f   : > { %v1915_v24 = vadd.f32 %v7758_v29, %v9534_v8  ;;  %v7800_v35 = vpop.f32.mrf.mxu1  ;;  %v9870_v18 = vadd.f32 %v2103_v20, %v1912_v13  ;;  %v11721_v20 = vld [vmem:[#allocation4_spill] sm:$0xff]  ;;  %v3992_v29 = vrot.slane %v9503_v6, 1 }
 0x180   : > { %v1796_v2 = vpop.f32.mrf.mxu0 }
 0x181   : > { %v1913_v10 = vadd.f32 %v1796_v2, %v9545_v1  ;;  %v2122_v7 = vpop.f32.mrf.mxu1  ;;  %v9879_v14 = vadd.f32 %v7796_v48, %v1915_v24  ;;  %v11723_v48 = vld [vmem:[#allocation24_spill] sm:$0xff]  ;;  %v8456_v24 = vld [vmem:[%s11440_s2 + $0xa] sm:$0x3] }
 0x182   : > { %v7761_v41 = vpop.f32.mrf.mxu0  ;;  %7976 = vmatmul.mubr.msk.bf16.vlgmr.msra.gmra.mxu0 %vm586_vm1, %v9388_v50  ;;  %v3990_v56 = vrot.slane %v11723_v48, 1 }
 0x183   : > { %v1918_v8 = vadd.f32 %v7761_v41, %v9561_v16  ;;  %8050 = vmatpush3.bf16.msra.mxu0 %v11721_v20  ;;  %v7803_v13 = vpop.f32.mrf.mxu1  ;;  %8018 = vmatmul.mubr.msk.bf16.gmra.mxu1 %vm586_vm1, %v9873_v51  ;;  %v9887_v21 = vadd.f32 %v2106_v59, %v1913_v10 }
 0x184   : > { %v1809_v1 = vpop.f32.mrf.mxu0  ;;  %7979 = vmatprep.mubr.msk.bf16.mxu0 %vm586_vm1, %v11712_v54  ;;  %8021 = vmatprep.mubr.msk.bf16.mxu1 %vm586_vm1, %v9877_v39  ;;  %v11724_v54 = vld [vmem:[#allocation34_spill] sm:$0xff]  ;;  %v9910_v30 = vsel %vm1040_vm3, %v3990_v56, %v3992_v29 }
 0x185   : > { %11722 = vst [vmem:[#allocation10_spill] sm:$0xff] %v9887_v21  ;;  %v1916_v19 = vadd.f32 %v1809_v1, %v9571_v62  ;;  %v2135_v16 = vpop.f32.mrf.mxu1  ;;  %8371 = vmatprep.subr.msk.bf16.mxu0 %vm641_vm0, %v8456_v24  ;;  %v9900_v59 = vadd.f32 %v7799_v28, %v1918_v8  ;;  %v9906_v62 = vsel %vm1040_vm3, %v3988_v26, %v3990_v56  ;;  %11725 = vst [vmem:[#allocation9_spill] sm:$0xff] %v9910_v30 }
 0x186   : > { %v7762_v2 = vpop.f32.mrf.mxu0 }
 0x187   : > { %v1919_v10 = vadd.f32 %v7762_v2, %v11724_v54  ;;  %v7804_v41 = vpop.f32.mrf.mxu1  ;;  %v9903_v20 = vadd.f32 %v2119_v40, %v1916_v19 }
 0x188   : > { %v1812_v39 = vpop.f32.mrf.mxu0 }
 0x189   : > { %v1917_v1 = vadd.f32 %v1812_v39, %v9595_v63  ;;  %v2138_v51 = vpop.f32.mrf.mxu1  ;;  %v9912_v21 = vadd.f32 %v7800_v35, %v1919_v10  ;;  %v11726_v35 = vld [vmem:[#allocation2_spill] sm:$0xff] }
 0x18a   : > { %v7765_v28 = vpop.f32.mrf.mxu0  ;;  %7980 = vmatmul.mubr.msk.bf16.gmra.mxu0 %vm586_vm1, %v9413_v53  ;;  %v3994_v39 = vrot.slane %v11726_v35, 1 }
 0x18b   : > { %v1922_v8 = vadd.f32 %v7765_v28, %v9605_v11  ;;  %v7807_v40 = vpop.f32.mrf.mxu1  ;;  %8022 = vmatmul.mubr.msk.bf16.gmra.mxu1 %vm586_vm1, %v9906_v62  ;;  %7983 = vmatprep.mubr.msk.bf16.mxu0 %vm586_vm1, %v11715_v17  ;;  %v9921_v63 = vadd.f32 %v2122_v7, %v1917_v1  ;;  %v3996_v11 = vrot.slane %v9555_v33, 1 }
 0x18c   : > { %v1825_v26 = vpop.f32.mrf.mxu0  ;;  %8025 = vmatprep.mubr.msk.bf16.mxu1 %vm586_vm1, %v9910_v30  ;;  %v9934_v10 = vsel %vm1040_vm3, %v3992_v29, %v3994_v39 }
 0x18d   : > { %v1920_v56 = vadd.f32 %v1825_v26, %v9613_v49  ;;  %v2151_v53 = vpop.f32.mrf.mxu1  ;;  %v9928_v19 = vadd.f32 %v7803_v13, %v1922_v8  ;;  %11727 = vst [vmem:[#allocation6_spill] sm:$0xff] %v9934_v10  ;;  %v9938_v49 = vsel %vm1040_vm3, %v3994_v39, %v3996_v11 }
 0x18e   : > { %v7766_v24 = vpop.f32.mrf.mxu0  ;;  %11728 = vst [vmem:[#allocation16_spill] sm:$0xff] %v9938_v49 }
 0x18f   : > { %v1923_v2 = vadd.f32 %v7766_v24, %v9627_v37  ;;  %v7808_v54 = vpop.f32.mrf.mxu1  ;;  %v9931_v17 = vadd.f32 %v2135_v16, %v1920_v56  ;;  %v11730_v56 = vld [vmem:[#allocation36_spill] sm:$0xff] }
 0x190   : > { %v1828_v7 = vpop.f32.mrf.mxu0 }
 0x191   : > { %v1921_v1 = vadd.f32 %v1828_v7, %v9638_v47  ;;  %v2154_v28 = vpop.f32.mrf.mxu1  ;;  %v9940_v26 = vadd.f32 %v7804_v41, %v1923_v2  ;;  %v11729_v41 = vld [vmem:[#allocation35_spill] sm:$0xff]  ;;  %v11731_v7 = vld [vmem:[#allocation46_spill] sm:$0xff] }
 0x192   : > { %v7769_v13 = vpop.f32.mrf.mxu0  ;;  %7984 = vmatmul.mubr.msk.bf16.gmra.mxu0 %vm586_vm1, %v11718_v0  ;;  %v3998_v8 = vrot.slane %v11729_v41, 1 }
 0x193   : > { %v1926_v37 = vadd.f32 %v7769_v13, %v9649_v58  ;;  %v7811_v16 = vpop.f32.mrf.mxu1  ;;  %8026 = vmatmul.mubr.msk.bf16.gmra.mxu1 %vm586_vm1, %v9934_v10  ;;  %7987 = vmatprep.mubr.msk.bf16.mxu0 %vm586_vm1, %v11723_v48  ;;  %v9949_v47 = vadd.f32 %v2138_v51, %v1921_v1  ;;  %v4000_v58 = vrot.slane %v11730_v56, 1 }
 0x194   : > { %v1841_v29 = vpop.f32.mrf.mxu0  ;;  %8029 = vmatprep.mubr.msk.bf16.mxu1 %vm586_vm1, %v9938_v49  ;;  %v9962_v1 = vsel %vm1040_vm3, %v3996_v11, %v3998_v8 }
 0x195   : > { %v1924_v39 = vadd.f32 %v1841_v29, %v9659_v60  ;;  %v2167_v0 = vpop.f32.mrf.mxu1  ;;  %v9956_v24 = vadd.f32 %v7807_v40, %v1926_v37  ;;  %v9966_v60 = vsel %vm1040_vm3, %v3998_v8, %v4000_v58 }
 0x196   : > { %v7770_v2 = vpop.f32.mrf.mxu0  ;;  %11732 = vst [vmem:[#allocation26_spill] sm:$0xff] %v9966_v60 }
 0x197   : > { %v1927_v13 = vadd.f32 %v7770_v2, %v11731_v7  ;;  %v7812_v10 = vpop.f32.mrf.mxu1  ;;  %v9959_v48 = vadd.f32 %v2151_v53, %v1924_v39 }
 0x198   : > { %v1844_v51 = vpop.f32.mrf.mxu0 }
 0x199   : > { %v1925_v49 = vadd.f32 %v1844_v51, %v9683_v15  ;;  %v2170_v30 = vpop.f32.mrf.mxu1  ;;  %v9968_v29 = vadd.f32 %v7808_v54, %v1927_v13  ;;  %v11733_v54 = vld [vmem:[#allocation41_spill] sm:$0xff] }
 0x19a   : > { %v7773_v40 = vpop.f32.mrf.mxu0  ;;  %7988 = vmatmul.mubr.msk.bf16.gmra.mxu0 %vm586_vm1, %v9503_v6  ;;  %v4002_v8 = vrot.slane %v11733_v54, 1 }
 0x19b   : > { %v1930_v37 = vadd.f32 %v7773_v40, %v9693_v32  ;;  %v7815_v53 = vpop.f32.mrf.mxu1  ;;  %8030 = vmatmul.mubr.msk.bf16.gmra.mxu1 %vm586_vm1, %v9962_v1  ;;  %7991 = vmatprep.mubr.msk.bf16.mxu0 %vm586_vm1, %v11726_v35  ;;  %v9977_v15 = vadd.f32 %v2154_v28, %v1925_v49  ;;  %v4004_v32 = vrot.slane %v9647_v22, 1 }
 0x19c   : > { %v1857_v11 = vpop.f32.mrf.mxu0  ;;  %8033 = vmatprep.mubr.msk.bf16.mxu1 %vm586_vm1, %v9966_v60  ;;  %v9990_v49 = vsel %vm1040_vm3, %v4000_v58, %v4002_v8 }
 0x19d   : > { %v1928_v39 = vadd.f32 %v1857_v11, %v9701_v46  ;;  %v2183_v6 = vpop.f32.mrf.mxu1  ;;  %v9984_v2 = vadd.f32 %v7811_v16, %v1930_v37  ;;  %11734 = vst [vmem:[#allocation8_spill] sm:$0xff] %v9990_v49  ;;  %v9994_v46 = vsel %vm1040_vm3, %v4002_v8, %v4004_v32 }
 0x19e   : > { %v7774_v7 = vpop.f32.mrf.mxu0  ;;  %11735 = vst [vmem:[#allocation4_spill] sm:$0xff] %v9994_v46 }
 0x19f   : > { %v1931_v13 = vadd.f32 %v7774_v7, %v9715_v57  ;;  %v7816_v51 = vpop.f32.mrf.mxu1  ;;  %v9987_v35 = vadd.f32 %v2167_v0, %v1928_v39  ;;  %v11737_v39 = vld [vmem:[#allocation48_spill] sm:$0xff] }
 0x1a0   : > { %v1860_v28 = vpop.f32.mrf.mxu0 }
 0x1a1   : > { %v1929_v40 = vadd.f32 %v1860_v28, %v9726_v61  ;;  %v2186_v60 = vpop.f32.mrf.mxu1  ;;  %v9996_v11 = vadd.f32 %v7812_v10, %v1931_v13  ;;  %v11736_v10 = vld [vmem:[#allocation47_spill] sm:$0xff] }
 0x1a2   : > { %v7777_v16 = vpop.f32.mrf.mxu0  ;;  %7992 = vmatmul.mubr.msk.bf16.gmra.mxu0 %vm586_vm1, %v9555_v33  ;;  %v4006_v37 = vrot.slane %v11736_v10, 1 }
 0x1a3   : > { %v1934_v57 = vadd.f32 %v7777_v16, %v9737_v38  ;;  %v7819_v0 = vpop.f32.mrf.mxu1  ;;  %8034 = vmatmul.mubr.msk.bf16.gmra.mxu1 %vm586_vm1, %v9990_v49  ;;  %7995 = vmatprep.mubr.msk.bf16.mxu0 %vm586_vm1, %v11729_v41  ;;  %v10005_v61 = vadd.f32 %v2170_v30, %v1929_v40  ;;  %v4008_v38 = vrot.slane %v11737_v39, 1 }
 0x1a4   : > { %v1873_v58 = vpop.f32.mrf.mxu0  ;;  %8037 = vmatprep.mubr.msk.bf16.mxu1 %vm586_vm1, %v9994_v46  ;;  %v10018_v40 = vsel %vm1040_vm3, %v4004_v32, %v4006_v37 }
 0x1a5   : > { %v1932_v8 = vadd.f32 %v1873_v58, %v9744_v25  ;;  %v2199_v33 = vpop.f32.mrf.mxu1  ;;  %v10012_v7 = vadd.f32 %v7815_v53, %v1934_v57  ;;  %11738 = vst [vmem:[#allocation24_spill] sm:$0xff] %v10018_v40  ;;  %v10022_v25 = vsel %vm1040_vm3, %v4006_v37, %v4008_v38  ;;  %v10039_v37 = vrot.slane %v9735_v3, 1 }
 0x1a6   : > { %v7778_v13 = vpop.f32.mrf.mxu0  ;;  %11739 = vst [vmem:[#allocation34_spill] sm:$0xff] %v10022_v25 }
 0x1a7   : > { %v1935_v28 = vadd.f32 %v7778_v13, %v9762_v52  ;;  %v7820_v16 = vpop.f32.mrf.mxu1  ;;  %v10015_v41 = vadd.f32 %v2183_v6, %v1932_v8 }
 0x1a8   : > { %v1876_v30 = vpop.f32.mrf.mxu0 }
 0x1a9   : > { %v1933_v46 = vadd.f32 %v1876_v30, %v9770_v9  ;;  %v2202_v49 = vpop.f32.mrf.mxu1  ;;  %v10024_v58 = vadd.f32 %v7816_v51, %v1935_v28  ;;  %v11741_v51 = vld [vmem:[#allocation53_spill] sm:$0xff] }
 0x1aa   : > { %v7781_v53 = vpop.f32.mrf.mxu0  ;;  %7996 = vmatmul.mubr.msk.bf16.gmra.mxu0 %vm586_vm1, %v11730_v56  ;;  %v4010_v57 = vrot.slane %v11741_v51, 1 }
 0x1ab   : > { %v1938_v52 = vadd.f32 %v7781_v53, %v9782_v55  ;;  %v7863_v6 = vpop.f32.mrf.mxu1  ;;  %8038 = vmatmul.mubr.msk.bf16.gmra.mxu1 %vm586_vm1, %v10018_v40  ;;  %7999 = vmatprep.mubr.msk.bf16.mxu0 %vm586_vm1, %v11733_v54  ;;  %v10033_v9 = vadd.f32 %v2186_v60, %v1933_v46 }
 0x1ac   : > { %v1889_v32 = vpop.f32.mrf.mxu0  ;;  %8041 = vmatprep.mubr.msk.bf16.mxu1 %vm586_vm1, %v10022_v25  ;;  %v10048_v30 = vsel %vm1040_vm3, %v4008_v38, %v4010_v57  ;;  %v10052_v53 = vsel %vm1040_vm3, %v4010_v57, %v10039_v37  ;;  %v11746_v25 = vshrl.u32 %v9388_v50, 16 }
 0x1ad   : > { %11740 = vst [vmem:[#allocation2_spill] sm:$0xff] %v10033_v9  ;;  %v1936_v55 = vadd.f32 %v1889_v32, %v9786_v36  ;;  %v2663_v56 = vpop.f32.mrf.mxu1  ;;  %v10042_v8 = vadd.f32 %v7819_v0, %v1938_v52  ;;  %11744 = vst [vmem:[#allocation46_spill] sm:$0xff] %v10048_v30  ;;  %v11747_v0 = vshll.u32 %v9388_v50, 16  ;;  %v11748_v32 = vld [vmem:[#allocation12_spill] sm:$0xff] }
 0x1ae   : > { %v7782_v13 = vpop.f32.mrf.mxu0  ;;  %11745 = vst [vmem:[#allocation41_spill] sm:$0xff] %v10052_v53  ;;  %v4512_v36 = vrot.slane %v11746_v25, 1 }
 0x1af   : > { %11742 = vst [vmem:[#allocation35_spill] sm:$0xff] %v10042_v8  ;;  %v1939_v28 = vadd.f32 %v7782_v13, %v9796_v42  ;;  %v7864_v54 = vpop.f32.mrf.mxu1  ;;  %v10045_v60 = vadd.f32 %v2199_v33, %v1936_v55  ;;  %v4513_v52 = vrot.slane %v11747_v0, 2  ;;  %v11749_v13 = vld [vmem:[#allocation13_spill] sm:$0xff]  ;;  %v11750_v55 = vld [vmem:[#allocation14_spill] sm:$0xff] }
 0x1b0   : > { %v1892_v46 = vpop.f32.mrf.mxu0  ;;  %v4515_v33 = vrot.slane %v11749_v13, 1 }
 0x1b1   : > { %11743 = vst [vmem:[#allocation36_spill] sm:$0xff] %v10045_v60  ;;  %v1937_v40 = vadd.f32 %v1892_v46, %v11748_v32  ;;  %v2666_v42 = vpop.f32.mrf.mxu1  ;;  %v4516_v60 = vrot.slane %v11750_v55, 2  ;;  %v10061_v8 = vadd.f32 %v7820_v16, %v1939_v28  ;;  %v11752_v16 = vld [vmem:[#allocation59_spill] sm:$0xff]  ;;  %v4514_v0 = vor.u32 %v4513_v52, %v4512_v36 }
 0x1b2   : > { %v7825_v38 = vpop.f32.mrf.mxu0  ;;  %8000 = vmatmul.mubr.msk.bf16.gmra.mxu0 %vm586_vm1, %v9647_v22  ;;  %v4014_v28 = vrot.slane %v11752_v16, 1  ;;  %v11753_v55 = vld [vmem:[#allocation23_spill] sm:$0xff] }
 0x1b3   : > { %v2450_v57 = vadd.f32 %v7825_v38, %v9811_v4  ;;  %v7867_v9 = vpop.f32.mrf.mxu1  ;;  %8042 = vmatmul.mubr.msk.bf16.gmra.mxu1 %vm586_vm1, %v10048_v30  ;;  %8003 = vmatprep.mubr.msk.bf16.mxu0 %vm586_vm1, %v11736_v10  ;;  %v10070_v50 = vadd.f32 %v2202_v49, %v1937_v40  ;;  %v4517_v4 = vor.u32 %v4516_v60, %v4515_v33  ;;  %v4520_v13 = vrot.slane %v11753_v55, 2  ;;  %v11754_v16 = vld [vmem:[#allocation19_spill] sm:$0xff] }
 0x1b4   : > { %v2305_v25 = vpop.f32.mrf.mxu0  ;;  %8045 = vmatprep.mubr.msk.bf16.mxu1 %vm586_vm1, %v10052_v53  ;;  %v4015_v53 = vsel %vm1040_vm3, %v10039_v37, %v4014_v28  ;;  %v11756_v36 = vld [vmem:[#allocation7_spill] sm:$0xff] }
 0x1b5   : > { %11751 = vst [vmem:[#allocation47_spill] sm:$0xff] %v10070_v50  ;;  %v2448_v46 = vadd.f32 %v2305_v25, %v9815_v12  ;;  %v2679_v22 = vpop.f32.mrf.mxu1  ;;  %v10076_v32 = vadd.f32 %v7863_v6, %v2450_v57  ;;  %v4519_v50 = vrot.slane %v11754_v16, 1  ;;  %v11755_v12 = vld [vmem:[#allocation11_spill] sm:$0xff]  ;;  %v4524_v60 = vrot.slane %v11756_v36, 2 }
 0x1b6   : > { %v7826_v38 = vpop.f32.mrf.mxu0  ;;  %v4523_v25 = vrot.slane %v11755_v12, 1  ;;  %v4518_v33 = vsel %vm1584_vm5, %v4514_v0, %v4517_v4  ;;  %v11758_v12 = vld [vmem:[#allocation25_spill] sm:$0xff] }
 0x1b7   : > { %v2451_v10 = vadd.f32 %v7826_v38, %v9821_v23  ;;  %v7868_v49 = vpop.f32.mrf.mxu1  ;;  %v10080_v40 = vadd.f32 %v2663_v56, %v2448_v46 }
 0x1b8   : > { %v2308_v30 = vpop.f32.mrf.mxu0 }
 0x1b9   : > { %v2449_v6 = vadd.f32 %v2308_v30, %v9828_v44  ;;  %v2682_v52 = vpop.f32.mrf.mxu1  ;;  %v10089_v57 = vadd.f32 %v7864_v54, %v2451_v10  ;;  %v4521_v30 = vor.u32 %v4520_v13, %v4519_v50  ;;  %v4525_v54 = vor.u32 %v4524_v60, %v4523_v25  ;;  %v11760_v60 = vld [vmem:[#allocation5_spill] sm:$0xff] }
 0x1ba   : > { %v7829_v23 = vpop.f32.mrf.mxu0  ;;  %8004 = vmatmul.mubr.msk.bf16.gmra.mxu0 %vm586_vm1, %v11737_v39 }
 0x1bb   : > { %v2454_v56 = vadd.f32 %v7829_v23, %v9834_v43  ;;  %v7871_v28 = vpop.f32.mrf.mxu1  ;;  %8046 = vmatmul.mubr.msk.bf16.gmra.mxu1 %vm586_vm1, %v4015_v53  ;;  %8007 = vmatprep.mubr.msk.bf16.mxu0 %vm586_vm1, %v11741_v51  ;;  %v10097_v46 = vadd.f32 %v2666_v42, %v2449_v6  ;;  %v11757_v53 = vld [vmem:[#allocation27_spill] sm:$0xff]  ;;  %v4528_v51 = vrot.slane %v11758_v12, 2  ;;  %v4526_v13 = vsel %vm1584_vm5, %v4521_v30, %v4525_v54 }
 0x1bc   : > { %v2321_v44 = vpop.f32.mrf.mxu0  ;;  %8089 = vmatprep.mubr.msk.bf16.mxu1 %vm586_vm1, %v4518_v33  ;;  %v4527_v36 = vrot.slane %v11757_v53, 1  ;;  %v4522_v33 = vsel %vm1584_vm5, %v4517_v4, %v4521_v30  ;;  %v11804_v16 = vld [vmem:[#allocation47_spill] sm:$0xff] }
 0x1bd   : > { %v2452_v0 = vadd.f32 %v2321_v44, %v9838_v34  ;;  %v2695_v38 = vpop.f32.mrf.mxu1  ;;  %v10101_v10 = vadd.f32 %v7867_v9, %v2454_v56  ;;  %v11759_v9 = vld [vmem:[#allocation28_spill] sm:$0xff]  ;;  %v4532_v56 = vrot.slane %v11760_v60, 2 }
 0x1be   : > { %v7830_v39 = vpop.f32.mrf.mxu0  ;;  %v4531_v25 = vrot.slane %v11759_v9, 1 }
 0x1bf   : > { %v2455_v43 = vadd.f32 %v7830_v39, %v9847_v31  ;;  %v7872_v23 = vpop.f32.mrf.mxu1  ;;  %v10106_v42 = vadd.f32 %v2679_v22, %v2452_v0 }
 0x1c0   : > { %v2324_v6 = vpop.f32.mrf.mxu0 }
 0x1c1   : > { %v2453_v34 = vadd.f32 %v2324_v6, %v9855_v45  ;;  %v2698_v50 = vpop.f32.mrf.mxu1  ;;  %v10113_v31 = vadd.f32 %v7868_v49, %v2455_v43  ;;  %v4529_v45 = vor.u32 %v4528_v51, %v4527_v36  ;;  %v11761_v49 = vld [vmem:[#allocation21_spill] sm:$0xff] }
 0x1c2   : > { %v7833_v44 = vpop.f32.mrf.mxu0  ;;  %8008 = vmatmul.mubr.msk.bf16.gmra.mxu0 %vm586_vm1, %v9735_v3  ;;  %v4533_v3 = vor.u32 %v4532_v56, %v4531_v25  ;;  %v11763_v25 = vld [vmem:[#allocation29_spill] sm:$0xff]  ;;  %v11764_v56 = vld [vmem:[#allocation32_spill] sm:$0xff] }
 0x1c3   : > { %v2458_v22 = vadd.f32 %v7833_v44, %v9863_v27  ;;  %v7875_v0 = vpop.f32.mrf.mxu1  ;;  %8090 = vmatmul.mubr.msk.bf16.vlgmr.msra.gmra.mxu1 %vm586_vm1, %v4522_v33  ;;  %8051 = vmatprep.mubr.msk.bf16.mxu0 %vm586_vm1, %v9841_v5  ;;  %v10121_v4 = vadd.f32 %v2682_v52, %v2453_v34  ;;  %v8457_v27 = vld [vmem:[%s11440_s2 + $0x10] sm:$0x3]  ;;  %v4530_v51 = vsel %vm1584_vm5, %v4525_v54, %v4529_v45  ;;  %v4539_v44 = vrot.slane %v11764_v56, 1  ;;  %v11767_v54 = vld [vmem:[#allocation17_spill] sm:$0xff] }
 0x1c4   : > { %v2337_v30 = vpop.f32.mrf.mxu0  ;;  %8093 = vmatprep.mubr.msk.bf16.mxu1 %vm586_vm1, %v4526_v13  ;;  %8164 = vmatpush3.bf16.msra.mxu1 %v11761_v49  ;;  %v11766_v49 = vld [vmem:[#allocation10_spill] sm:$0xff]  ;;  %v4534_v9 = vsel %vm1584_vm5, %v4529_v45, %v4533_v3 }
 0x1c5   : > { %v2456_v39 = vadd.f32 %v2337_v30, %v9870_v18  ;;  %v2711_v43 = vpop.f32.mrf.mxu1  ;;  %v10126_v6 = vadd.f32 %v7871_v28, %v2458_v22  ;;  %8374 = vmatprep.subr.msk.bf16.mxu1 %vm641_vm0, %v8457_v27  ;;  %v11762_v18 = vld [vmem:[#allocation30_spill] sm:$0xff]  ;;  %v4536_v28 = vrot.slane %v11763_v25, 2  ;;  %v11765_v22 = vld [vmem:[#allocation31_spill] sm:$0xff] }
 0x1c6   : > { %v7834_v5 = vpop.f32.mrf.mxu0  ;;  %v4535_v34 = vrot.slane %v11762_v18, 1  ;;  %v4540_v30 = vrot.slane %v11765_v22, 2 }
 0x1c7   : > { %v2459_v36 = vadd.f32 %v7834_v5, %v9879_v14  ;;  %v7876_v52 = vpop.f32.mrf.mxu1  ;;  %v10134_v33 = vadd.f32 %v2695_v38, %v2456_v39  ;;  %v11768_v39 = vld [vmem:[#allocation15_spill] sm:$0xff] }
 0x1c8   : > { %v2340_v13 = vpop.f32.mrf.mxu0  ;;  %v4541_v45 = vor.u32 %v4540_v30, %v4539_v44 }
 0x1c9   : > { %v2457_v60 = vadd.f32 %v2340_v13, %v11766_v49  ;;  %v2714_v27 = vpop.f32.mrf.mxu1  ;;  %v10142_v14 = vadd.f32 %v7872_v23, %v2459_v36  ;;  %v11769_v13 = vld [vmem:[#allocation22_spill] sm:$0xff]  ;;  %v4537_v23 = vor.u32 %v4536_v28, %v4535_v34 }
 0x1ca   : > { %v7837_v5 = vpop.f32.mrf.mxu0  ;;  %8052 = vmatmul.mubr.msk.bf16.vlgmr.msra.gmra.mxu0 %vm586_vm1, %v11767_v54  ;;  %v11770_v54 = vld [vmem:[#allocation38_spill] sm:$0xff] }
 0x1cb   : > { %v2462_v38 = vadd.f32 %v7837_v5, %v9900_v59  ;;  %8126 = vmatpush3.bf16.msra.mxu0 %v11768_v39  ;;  %v7879_v25 = vpop.f32.mrf.mxu1  ;;  %8094 = vmatmul.mubr.msk.bf16.gmra.mxu1 %vm586_vm1, %v4530_v51  ;;  %v10149_v56 = vadd.f32 %v2698_v50, %v2457_v60  ;;  %v8458_v59 = vld [vmem:[%s11440_s2 + $0xe] sm:$0x3]  ;;  %v4543_v39 = vrot.slane %v11770_v54, 1  ;;  %v4538_v44 = vsel %vm1584_vm5, %v4533_v3, %v4537_v23  ;;  %v11774_v54 = vld [vmem:[#allocation18_spill] sm:$0xff] }
 0x1cc   : > { %v2353_v22 = vpop.f32.mrf.mxu0  ;;  %8055 = vmatprep.mubr.msk.bf16.mxu0 %vm586_vm1, %v11769_v13  ;;  %8097 = vmatprep.mubr.msk.bf16.mxu1 %vm586_vm1, %v4534_v9  ;;  %v11771_v9 = vld [vmem:[#allocation33_spill] sm:$0xff] }
 0x1cd   : > { %v2460_v36 = vadd.f32 %v2353_v22, %v9903_v20  ;;  %v2727_v49 = vpop.f32.mrf.mxu1  ;;  %8373 = vmatprep.subr.msk.bf16.mxu0 %vm641_vm0, %v8458_v59  ;;  %v10159_v51 = vadd.f32 %v7875_v0, %v2462_v38  ;;  %v4544_v34 = vrot.slane %v11771_v9, 2  ;;  %v4542_v22 = vsel %vm1584_vm5, %v4537_v23, %v4541_v45  ;;  %v11772_v0 = vld [vmem:[#allocation39_spill] sm:$0xff]  ;;  %v11773_v59 = vld [vmem:[#allocation37_spill] sm:$0xff] }
 0x1ce   : > { %v7838_v50 = vpop.f32.mrf.mxu0  ;;  %v4547_v38 = vrot.slane %v11772_v0, 1  ;;  %v4548_v18 = vrot.slane %v11773_v59, 2 }
 0x1cf   : > { %v2463_v60 = vadd.f32 %v7838_v50, %v9912_v21  ;;  %v7880_v5 = vpop.f32.mrf.mxu1  ;;  %v10164_v28 = vadd.f32 %v2711_v43, %v2460_v36 }
 0x1d0   : > { %v2356_v20 = vpop.f32.mrf.mxu0 }
 0x1d1   : > { %v2461_v30 = vadd.f32 %v2356_v20, %v9921_v63  ;;  %v2730_v13 = vpop.f32.mrf.mxu1  ;;  %v10171_v21 = vadd.f32 %v7876_v52, %v2463_v60  ;;  %v4545_v63 = vor.u32 %v4544_v34, %v4543_v39  ;;  %v4549_v20 = vor.u32 %v4548_v18, %v4547_v38  ;;  %v11776_v34 = vld [vmem:[#allocation40_spill] sm:$0xff] }
 0x1d2   : > { %v7841_v50 = vpop.f32.mrf.mxu0  ;;  %8056 = vmatmul.mubr.msk.bf16.gmra.mxu0 %vm586_vm1, %v11774_v54 }
 0x1d3   : > { %v2466_v43 = vadd.f32 %v7841_v50, %v9928_v19  ;;  %v7883_v36 = vpop.f32.mrf.mxu1  ;;  %8098 = vmatmul.mubr.msk.bf16.gmra.mxu1 %vm586_vm1, %v4538_v44  ;;  %8059 = vmatprep.mubr.msk.bf16.mxu0 %vm586_vm1, %v9906_v62  ;;  %v10179_v3 = vadd.f32 %v2714_v27, %v2461_v30  ;;  %v4546_v44 = vsel %vm1584_vm5, %v4541_v45, %v4545_v63  ;;  %v11775_v27 = vld [vmem:[#allocation42_spill] sm:$0xff]  ;;  %v4552_v30 = vrot.slane %v11776_v34, 2  ;;  %v11779_v45 = vld [vmem:[#allocation9_spill] sm:$0xff] }
 0x1d4   : > { %v2369_v23 = vpop.f32.mrf.mxu0  ;;  %8101 = vmatprep.mubr.msk.bf16.mxu1 %vm586_vm1, %v4542_v22  ;;  %v4551_v39 = vrot.slane %v11775_v27, 1  ;;  %v11777_v22 = vld [vmem:[#allocation44_spill] sm:$0xff]  ;;  %v4550_v38 = vsel %vm1584_vm5, %v4545_v63, %v4549_v20 }
 0x1d5   : > { %v2464_v52 = vadd.f32 %v2369_v23, %v9931_v17  ;;  %v2743_v60 = vpop.f32.mrf.mxu1  ;;  %v10183_v59 = vadd.f32 %v7879_v25, %v2466_v43  ;;  %v4555_v9 = vrot.slane %v11777_v22, 1  ;;  %v11778_v17 = vld [vmem:[#allocation43_spill] sm:$0xff] }
 0x1d6   : > { %v7842_v54 = vpop.f32.mrf.mxu0  ;;  %v4556_v23 = vrot.slane %v11778_v17, 2  ;;  %v4553_v63 = vor.u32 %v4552_v30, %v4551_v39  ;;  %v11782_v39 = vld [vmem:[#allocation45_spill] sm:$0xff] }
 0x1d7   : > { %v2467_v19 = vadd.f32 %v7842_v54, %v9940_v26  ;;  %v7884_v50 = vpop.f32.mrf.mxu1  ;;  %v10187_v0 = vadd.f32 %v2727_v49, %v2464_v52  ;;  %v11780_v54 = vld [vmem:[#allocation6_spill] sm:$0xff] }
 0x1d8   : > { %v2372_v62 = vpop.f32.mrf.mxu0 }
 0x1d9   : > { %v2465_v18 = vadd.f32 %v2372_v62, %v9949_v47  ;;  %v2746_v25 = vpop.f32.mrf.mxu1  ;;  %v10195_v26 = vadd.f32 %v7880_v5, %v2467_v19  ;;  %v4557_v5 = vor.u32 %v4556_v23, %v4555_v9  ;;  %v4560_v9 = vrot.slane %v11782_v39, 2  ;;  %v11786_v39 = vld [vmem:[#allocation55_spill] sm:$0xff] }
 0x1da   : > { %v7845_v43 = vpop.f32.mrf.mxu0  ;;  %8060 = vmatmul.mubr.msk.bf16.gmra.mxu0 %vm586_vm1, %v11779_v45 }
 0x1db   : > { %v2470_v49 = vadd.f32 %v7845_v43, %v9956_v24  ;;  %v7887_v52 = vpop.f32.mrf.mxu1  ;;  %8102 = vmatmul.mubr.msk.bf16.gmra.mxu1 %vm586_vm1, %v4546_v44  ;;  %8063 = vmatprep.mubr.msk.bf16.mxu0 %vm586_vm1, %v11780_v54  ;;  %v10203_v17 = vadd.f32 %v2730_v13, %v2465_v18  ;;  %v4554_v13 = vsel %vm1584_vm5, %v4549_v20, %v4553_v63  ;;  %v11781_v54 = vld [vmem:[#allocation50_spill] sm:$0xff] }
 0x1dc   : > { %v2385_v47 = vpop.f32.mrf.mxu0  ;;  %8105 = vmatprep.mubr.msk.bf16.mxu1 %vm586_vm1, %v4550_v38  ;;  %v4558_v18 = vsel %vm1584_vm5, %v4553_v63, %v4557_v5  ;;  %v4559_v38 = vrot.slane %v11781_v54, 1  ;;  %v4567_v54 = vrot.slane %v11786_v39, 1 }
 0x1dd   : > { %v2468_v19 = vadd.f32 %v2385_v47, %v9959_v48  ;;  %v2759_v62 = vpop.f32.mrf.mxu1  ;;  %v10207_v22 = vadd.f32 %v7883_v36, %v2470_v49  ;;  %v11783_v36 = vld [vmem:[#allocation51_spill] sm:$0xff]  ;;  %v11784_v49 = vld [vmem:[#allocation49_spill] sm:$0xff] }
 0x1de   : > { %v7846_v45 = vpop.f32.mrf.mxu0  ;;  %v4563_v23 = vrot.slane %v11783_v36, 1  ;;  %v4564_v47 = vrot.slane %v11784_v49, 2 }
 0x1df   : > { %v2471_v24 = vadd.f32 %v7846_v45, %v9968_v29  ;;  %v7888_v43 = vpop.f32.mrf.mxu1  ;;  %v10210_v44 = vadd.f32 %v2743_v60, %v2468_v19  ;;  %v11785_v19 = vld [vmem:[#allocation16_spill] sm:$0xff]  ;;  %v4561_v45 = vor.u32 %v4560_v9, %v4559_v38  ;;  %v11789_v9 = vld [vmem:[#allocation54_spill] sm:$0xff] }
 0x1e0   : > { %v2388_v34 = vpop.f32.mrf.mxu0  ;;  %v4565_v49 = vor.u32 %v4564_v47, %v4563_v23  ;;  %v11788_v38 = vld [vmem:[#allocation56_spill] sm:$0xff]  ;;  %v4572_v23 = vrot.slane %v11789_v9, 2 }
 0x1e1   : > { %v2469_v48 = vadd.f32 %v2388_v34, %v9977_v15  ;;  %v2762_v30 = vpop.f32.mrf.mxu1  ;;  %v10219_v29 = vadd.f32 %v7884_v50, %v2471_v24  ;;  %v11792_v9 = vld [vmem:[#allocation8_spill] sm:$0xff] }
 0x1e2   : > { %v7849_v60 = vpop.f32.mrf.mxu0  ;;  %8064 = vmatmul.mubr.msk.bf16.gmra.mxu0 %vm586_vm1, %v11785_v19  ;;  %v3290_v19 = vld [vmem:[%s8718_s21 + $0x94] sm:$0xf] }
 0x1e3   : > { %v2474_v20 = vadd.f32 %v7849_v60, %v9984_v2  ;;  %v7891_v63 = vpop.f32.mrf.mxu1  ;;  %8106 = vmatmul.mubr.msk.bf16.gmra.mxu1 %vm586_vm1, %v4554_v13  ;;  %8067 = vmatprep.mubr.msk.bf16.mxu0 %vm586_vm1, %v9962_v1  ;;  %v10227_v15 = vadd.f32 %v2746_v25, %v2469_v48  ;;  %v11787_v1 = vld [vmem:[#allocation52_spill] sm:$0xff] }
 0x1e4   : > { %v2401_v34 = vpop.f32.mrf.mxu0  ;;  %8109 = vmatprep.mubr.msk.bf16.mxu1 %vm586_vm1, %v4558_v18  ;;  %v4568_v25 = vrot.slane %v11787_v1, 2  ;;  %v4562_v18 = vsel %vm1584_vm5, %v4557_v5, %v4561_v45  ;;  %v11799_v1 = vld [vmem:[#allocation4_spill] sm:$0xff] }
 0x1e5   : > { %v2472_v50 = vadd.f32 %v2401_v34, %v9987_v35  ;;  %v2775_v24 = vpop.f32.mrf.mxu1  ;;  %v10231_v36 = vadd.f32 %v7887_v52, %v2474_v20  ;;  %v4571_v35 = vrot.slane %v11788_v38, 1  ;;  %v11790_v52 = vld [vmem:[#allocation58_spill] sm:$0xff]  ;;  %v4566_v34 = vsel %vm1584_vm5, %v4561_v45, %v4565_v49 }
 0x1e6   : > { %v7850_v2 = vpop.f32.mrf.mxu0  ;;  %v10243_v47 = vcombine.low %v11790_v52, %v3290_v19  ;;  %v4569_v19 = vor.u32 %v4568_v25, %v4567_v54 }
 0x1e7   : > { %v2475_v60 = vadd.f32 %v7850_v2, %v9996_v11  ;;  %v7892_v13 = vpop.f32.mrf.mxu1  ;;  %v10237_v48 = vadd.f32 %v2759_v62, %v2472_v50  ;;  %v11791_v50 = vld [vmem:[#allocation26_spill] sm:$0xff] }
 0x1e8   : > { %v2404_v27 = vpop.f32.mrf.mxu0  ;;  %v4570_v25 = vsel %vm1584_vm5, %v4565_v49, %v4569_v19  ;;  %v11798_v49 = vshll.u32 %v10243_v47, 16 }
 0x1e9   : > { %v2473_v20 = vadd.f32 %v2404_v27, %v10005_v61  ;;  %v2778_v11 = vpop.f32.mrf.mxu1  ;;  %v10247_v2 = vadd.f32 %v7888_v43, %v2475_v60  ;;  %v4573_v43 = vor.u32 %v4572_v23, %v4571_v35  ;;  %v11793_v23 = vld [vmem:[#allocation60_spill] sm:$0xff] }
 0x1ea   : > { %v7853_v62 = vpop.f32.mrf.mxu0  ;;  %8068 = vmatmul.mubr.msk.bf16.gmra.mxu0 %vm586_vm1, %v11791_v50 }
 0x1eb   : > { %v2478_v5 = vadd.f32 %v7853_v62, %v10012_v7  ;;  %v7895_v38 = vpop.f32.mrf.mxu1  ;;  %8110 = vmatmul.mubr.msk.bf16.gmra.mxu1 %vm586_vm1, %v4562_v18  ;;  %8071 = vmatprep.mubr.msk.bf16.mxu0 %vm586_vm1, %v11792_v9  ;;  %v10255_v61 = vadd.f32 %v2762_v30, %v2473_v20  ;;  %v10262_v62 = vld [vmem:[%s8718_s21 + $0x98] sm:$0xf]  ;;  %v4575_v20 = vrot.slane %v11793_v23, 1 }
 0x1ec   : > { %v2417_v27 = vpop.f32.mrf.mxu0  ;;  %8113 = vmatprep.mubr.msk.bf16.mxu1 %vm586_vm1, %v4566_v34  ;;  %v11794_v34 = vld [vmem:[#allocation57_spill] sm:$0xff]  ;;  %v10275_v7 = vcombine.low %v10262_v62, %v10262_v62 }
 0x1ed   : > { %v2476_v45 = vadd.f32 %v2417_v27, %v10015_v41  ;;  %v2791_v60 = vpop.f32.mrf.mxu1  ;;  %v10264_v18 = vadd.f32 %v7891_v63, %v2478_v5  ;;  %v4574_v41 = vsel %vm1584_vm5, %v4569_v19, %v4573_v43  ;;  %v4576_v27 = vrot.slane %v11794_v34, 2  ;;  %v11796_v63 = vld [vmem:[#allocation2_spill] sm:$0xff]  ;;  %v11800_v34 = vld [vmem:[#allocation35_spill] sm:$0xff] }
 0x1ee   : > { %v7854_v50 = vpop.f32.mrf.mxu0  ;;  %11795 = vst [vmem:[#allocation48_spill] sm:$0xff] %v10275_v7 }
 0x1ef   : > { %v2479_v54 = vadd.f32 %v7854_v50, %v10024_v58  ;;  %v7896_v30 = vpop.f32.mrf.mxu1  ;;  %v10268_v9 = vadd.f32 %v2775_v24, %v2476_v45  ;;  %v11797_v58 = vshrl.u32 %v10243_v47, 16  ;;  %v4585_v24 = vrot.slane %v11798_v49, 2 }
 0x1f0   : > { %v2420_v35 = vpop.f32.mrf.mxu0  ;;  %v4592_v49 = vshll.u32 %v10275_v7, 16 }
 0x1f1   : > { %v2477_v5 = vadd.f32 %v2420_v35, %v11796_v63  ;;  %v2794_v52 = vpop.f32.mrf.mxu1  ;;  %v4582_v50 = vrot.slane %v11797_v58, 1  ;;  %v10282_v45 = vadd.f32 %v7892_v13, %v2479_v54  ;;  %v11802_v35 = vld [vmem:[#allocation24_spill] sm:$0xff]  ;;  %v4577_v13 = vor.u32 %v4576_v27, %v4575_v20 }
 0x1f2   : > { %v7857_v19 = vpop.f32.mrf.mxu0  ;;  %8072 = vmatmul.mubr.msk.bf16.gmra.mxu0 %vm586_vm1, %v11799_v1  ;;  %v4589_v54 = vshrl.u32 %v10275_v7, 16  ;;  %v11803_v1 = vld [vmem:[#allocation36_spill] sm:$0xff]  ;;  %v4594_v55 = vrot.slane %v4592_v49, 2 }
 0x1f3   : > { %v2482_v23 = vadd.f32 %v7857_v19, %v11800_v34  ;;  %v10287_v39 = vpop.f32.mrf.mxu1  ;;  %8114 = vmatmul.mubr.msk.bf16.gmra.mxu1 %vm586_vm1, %v4570_v25  ;;  %8075 = vmatprep.mubr.msk.bf16.mxu0 %vm586_vm1, %v11802_v35  ;;  %v10292_v63 = vadd.f32 %v2778_v11, %v2477_v5  ;;  %v4586_v19 = vor.u32 %v4585_v24, %v4582_v50 }
 0x1f4   : > { %11801 = vst [vmem:[#allocation53_spill] sm:$0xff] %v10287_v39  ;;  %v2433_v58 = vpop.f32.mrf.mxu0  ;;  %8117 = vmatprep.mubr.msk.bf16.mxu1 %vm586_vm1, %v4574_v41  ;;  %v4578_v20 = vsel %vm1584_vm5, %v4573_v43, %v4577_v13  ;;  %v4591_v27 = vrot.slane %v4589_v54, 1  ;;  %v11808_v43 = vld [vmem:[#allocation46_spill] sm:$0xff] }
 0x1f5   : > { %v2480_v12 = vadd.f32 %v2433_v58, %v11803_v1  ;;  %v10298_v34 = vpop.f32.mrf.mxu1  ;;  %v10300_v53 = vadd.f32 %v7895_v38, %v2482_v23  ;;  %v4587_v50 = vsel %vm1584_vm5, %v4577_v13, %v4586_v19  ;;  %v10335_v1 = vld [vmem:[%s8718_s21 + $0x10] sm:$0xff]  }
 0x1f6   : > { %v7858_v25 = vpop.f32.mrf.mxu0  ;;  %v4595_v13 = vor.u32 %v4594_v55, %v4591_v27 }
 0x1f7   : > { %v2483_v35 = vadd.f32 %v7858_v25, %v10061_v8  ;;  %v10303_v11 = vpop.f32.mrf.mxu1  ;;  %v10305_v5 = vadd.f32 %v2791_v60, %v2480_v12  ;;  %v11806_v8 = vld [vmem:[#allocation34_spill] sm:$0xff] }
 0x1f8   : > { %v2436_v41 = vpop.f32.mrf.mxu0 }
 0x1f9   : > { %v2481_v39 = vadd.f32 %v2436_v41, %v11804_v16  ;;  %v10309_v58 = vpop.f32.mrf.mxu1  ;;  %v10312_v38 = vadd.f32 %v7896_v30, %v2483_v35  ;;  %v10327_v30 = vld [vmem:[%s11441_s3] ss:$0 sm:$0xff] }
 0x1fa   : > { %11805 = vst [vmem:[#allocation12_spill] sm:$0xff] %v10309_v58  ;;  %v7901_v23 = vpop.f32.mrf.mxu0  ;;  %8076 = vmatmul.mubr.msk.bf16.gmra.mxu0 %vm586_vm1, %v11806_v8 }
 0x1fb   : > { %v3118_v12 = vadd.f32 %v7901_v23, %v10076_v32  ;;  %v10317_v60 = vpop.f32.mrf.mxu1  ;;  %8118 = vmatmul.mubr.msk.bf16.gmra.mxu1 %vm586_vm1, %v4578_v20  ;;  %8079 = vmatprep.mubr.msk.bf16.mxu0 %vm586_vm1, %v11808_v43  ;;  %v10322_v16 = vadd.f32 %v2794_v52, %v2481_v39  ;;  %v4289_v32 = vrot.slane %v10243_v47, 1  ;;  %v4865_v39 = vrot.slane %v10335_v1, 2  ;;  %v10339_v52 = vld [vmem:[%s8718_s21 + $0x18] sm:$0xff]  }
 0x1fc   : > { %11807 = vst [vmem:[#allocation59_spill] sm:$0xff] %v10317_v60  ;;  %v2973_v24 = vpop.f32.mrf.mxu0  ;;  %8121 = vmatprep.mubr.msk.bf16.mxu1 %vm586_vm1, %v4587_v50  ;;  %v4867_v25 = vrot.slane %v10339_v52, 2 }
 0x1fd   : > { %v3116_v54 = vadd.f32 %v2973_v24, %v10080_v40  ;;  %v10332_v49 = vpop.f32.mrf.mxu1  ;;  %v3161_v41 = vadd.f32 %v10327_v30, %v3118_v12  ;;  %v4596_v40 = vsel %vm1584_vm5, %v4586_v19, %v4595_v13  ;;  %v4290_v50 = vsel %vm1040_vm3, %v10039_v37, %v4289_v32 }
 0x1fe   : > { %11809 = vst [vmem:[#allocation21_spill] sm:$0xff] %v10332_v49  ;;  %v7902_v35 = vpop.f32.mrf.mxu0  ;;  %v4291_v37 = vrot.slane %v10275_v7, 1 }
 0x1ff   : > { %v3119_v20 = vadd.f32 %v7902_v35, %v10089_v57  ;;  %v10344_v55 = vpop.f32.mrf.mxu1  ;;  %v3159_v23 = vadd.f32 %v10327_v30, %v3116_v54  ;;  %v10355_v57 = vsel %vm1942_vm4, %v4865_v39, %v4867_v25  ;;  %v11812_v35 = vld [vmem:[#allocation41_spill] sm:$0xff]  ;;  %v3197_v19 = vmax.f32 %v3161_v41, 0.0  ;;  %v8462_v41 = vld [vmem:[%s8718_s21 + $0x8] sm:$0xff]  }
 0x200   : > { %11810 = vst [vmem:[#allocation10_spill] sm:$0xff] %v10344_v55  ;;  %v2976_v27 = vpop.f32.mrf.mxu0  ;;  %v10374_v55 = vld [vmem:[%s8718_s21 + $0x28] sm:$0xff]   ;;  %v4292_v58 = vsel %vm1040_vm3, %v4289_v32, %v4291_v37 }
 0x201   : > { %v3162_v8 = vadd.f32 %v10327_v30, %v3119_v20  ;;  %v3117_v43 = vadd.f32 %v2976_v27, %v10097_v46  ;;  %v10352_v24 = vpop.f32.mrf.mxu1  ;;  %11815 = vst [vmem:[#allocation18_spill] sm:$0xff] %v10374_v55 }
 0x202   : > { %11811 = vst [vmem:[#allocation17_spill] sm:$0xff] %v10352_v24  ;;  %v7905_v12 = vpop.f32.mrf.mxu0  ;;  %8080 = vmatmul.mubr.msk.bf16.gmra.mxu0 %vm586_vm1, %v11812_v35  ;;  %v10369_v24 = vld [vmem:[%s8718_s21 + $0x20] sm:$0xff]  }
 0x203   : > { %v3198_v13 = vmax.f32 %v3162_v8, 0.0  ;;  %v3160_v54 = vadd.f32 %v10327_v30, %v3117_v43  ;;  %v3122_v20 = vadd.f32 %v7905_v12, %v10101_v10  ;;  %v10362_v46 = vpop.f32.mrf.mxu1  ;;  %8122 = vmatmul.mubr.msk.bf16.gmra.mxu1 %vm586_vm1, %v4596_v40  ;;  %8083 = vmatprep.mubr.msk.bf16.mxu0 %vm586_vm1, %v4290_v50  ;;  %11814 = vst [vmem:[#allocation22_spill] sm:$0xff] %v10369_v24  ;;  %v4869_v35 = vrot.slane %v10369_v24, 2 }
 0x204   : > { %11813 = vst [vmem:[#allocation15_spill] sm:$0xff] %v10362_v46  ;;  %v2989_v27 = vpop.f32.mrf.mxu0  ;;  %8165 = vmatprep.mubr.msk.bf16.mxu1 %vm586_vm1, %v10355_v57  ;;  %v4864_v8 = vrot.slane %v8462_v41, 2  ;;  %v4871_v10 = vrot.slane %v10374_v55, 2  ;;  %v3195_v43 = vmax.f32 %v3159_v23, 0.0 }
 0x205   : > { %v10377_v12 = vpack.c.bf16 %v3198_v13, %v3197_v19  ;;  %v3196_v40 = vmax.f32 %v3160_v54, 0.0  ;;  %v3120_v50 = vadd.f32 %v2989_v27, %v10106_v42  ;;  %v10380_v46 = vpop.f32.mrf.mxu1  ;;  %v3165_v60 = vadd.f32 %v10327_v30, %v3122_v20 }
 0x206   : > { %v7906_v49 = vpop.f32.mrf.mxu0  ;;  %v4870_v23 = vsel %vm1942_vm4, %v4867_v25, %v4869_v35  ;;  %v4866_v19 = vsel %vm1942_vm4, %v4864_v8, %v4865_v39 }
 0x207   : > { %11816 = vst [vmem:[#allocation9_spill] sm:$0xff] %v10377_v12  ;;  %v10382_v7 = vpack.c.bf16 %v3196_v40, %v3195_v43  ;;  %v3123_v24 = vadd.f32 %v7906_v49, %v10113_v31  ;;  %v10386_v41 = vpop.f32.mrf.mxu1  ;;  %v3163_v42 = vadd.f32 %v10327_v30, %v3120_v50  ;;  %v10397_v31 = vsel %vm1942_vm4, %v4869_v35, %v4871_v10 }
 0x208   : > { %v2992_v55 = vpop.f32.mrf.mxu0  ;;  %v3201_v32 = vmax.f32 %v3165_v60, 0.0  ;;  %v11818_v60 = vld [vmem:[#allocation3_spill] sm:$0xff] }
 0x209   : > { %11817 = vst [vmem:[#allocation6_spill] sm:$0xff] %v10382_v7  ;;  %v3166_v13 = vadd.f32 %v10327_v30, %v3123_v24  ;;  %v3121_v54 = vadd.f32 %v2992_v55, %v10121_v4  ;;  %v10394_v27 = vpop.f32.mrf.mxu1  ;;  %v10409_v55 = vld [vmem:[%s8718_s21 + $0x30] sm:$0xff]   ;;  %v10414_v24 = vld [vmem:[%s8718_s21 + $0x38] sm:$0xff]   ;;  %v3199_v35 = vmax.f32 %v3163_v42, 0.0 }
 0x20a   : > { %v7909_v49 = vpop.f32.mrf.mxu0  ;;  %8084 = vmatmul.mubr.msk.bf16.gmra.mxu0 %vm586_vm1, %v4292_v58  ;;  %v4873_v58 = vrot.slane %v10409_v55, 2 }
 0x20b   : > { %v3202_v25 = vmax.f32 %v3166_v13, 0.0  ;;  %v3164_v39 = vadd.f32 %v10327_v30, %v3121_v54  ;;  %v3126_v37 = vadd.f32 %v7909_v49, %v10126_v6  ;;  %v10402_v20 = vpop.f32.mrf.mxu1  ;;  %8166 = vmatmul.mubr.msk.bf16.vlgmr.msra.gmra.mxu1 %vm586_vm1, %v4870_v23  ;;  %8127 = vmatprep.mubr.msk.bf16.mxu0 %vm586_vm1, %v4866_v19  ;;  %v4875_v6 = vrot.slane %v10414_v24, 2 }
 0x20c   : > { %v3005_v4 = vpop.f32.mrf.mxu0  ;;  %8169 = vmatprep.mubr.msk.bf16.mxu1 %vm586_vm1, %v10397_v31  ;;  %8240 = vmatpush3.bf16.msra.mxu1 %v11818_v60  ;;  %v4874_v7 = vsel %vm1942_vm4, %v4871_v10, %v4873_v58 }
 0x20d   : > { %v10417_v8 = vpack.c.bf16 %v3202_v25, %v3201_v32  ;;  %v3200_v43 = vmax.f32 %v3164_v39, 0.0  ;;  %v3124_v40 = vadd.f32 %v3005_v4, %v10134_v33  ;;  %v10420_v50 = vpop.f32.mrf.mxu1  ;;  %v3169_v54 = vadd.f32 %v10327_v30, %v3126_v37 }
 0x20e   : > { %v7910_v19 = vpop.f32.mrf.mxu0  ;;  %v10435_v39 = vsel %vm1942_vm4, %v4873_v58, %v4875_v6 }
 0x20f   : > { %11819 = vst [vmem:[#allocation16_spill] sm:$0xff] %v10417_v8  ;;  %v10422_v13 = vpack.c.bf16 %v3200_v43, %v3199_v35  ;;  %v3127_v49 = vadd.f32 %v7910_v19, %v10142_v14  ;;  %v10426_v60 = vpop.f32.mrf.mxu1  ;;  %v3167_v42 = vadd.f32 %v10327_v30, %v3124_v40  ;;  %v10440_v14 = vld [vmem:[%s11442_s4 + $0x8] sm:$0xff]   ;;  %v3205_v10 = vmax.f32 %v3169_v54, 0.0  ;;  %v11822_v35 = vld [vmem:[#allocation20_spill] sm:$0xff]  ;;  %v10454_v40 = vld [vmem:[%s8718_s21 + $0x40] sm:$0xff]  }
 0x210   : > { %v3008_v12 = vpop.f32.mrf.mxu0  ;;  %v10458_v19 = vld [vmem:[%s8718_s21 + $0x48] sm:$0xff]   ;;  %8317 = vmatprep.subr.bf16.mxu1 %v10440_v14 }
 0x211   : > { %11820 = vst [vmem:[#allocation58_spill] sm:$0xff] %v10422_v13  ;;  %v3170_v32 = vadd.f32 %v10327_v30, %v3127_v49  ;;  %v3125_v33 = vadd.f32 %v3008_v12, %v10149_v56  ;;  %v10432_v25 = vpop.f32.mrf.mxu1  ;;  %v3203_v54 = vmax.f32 %v3167_v42, 0.0 }
 0x212   : > { %11821 = vst [vmem:[#allocation26_spill] sm:$0xff] %v10432_v25  ;;  %v7913_v37 = vpop.f32.mrf.mxu0  ;;  %8128 = vmatmul.mubr.msk.bf16.vlgmr.msra.gmra.mxu0 %vm586_vm1, %v10355_v57  ;;  %v4877_v57 = vrot.slane %v10454_v40, 2 }
 0x213   : > { %v3206_v4 = vmax.f32 %v3170_v32, 0.0  ;;  %v3168_v56 = vadd.f32 %v10327_v30, %v3125_v33  ;;  %v3130_v12 = vadd.f32 %v7913_v37, %v10159_v51  ;;  %8202 = vmatpush3.bf16.msra.mxu0 %v11822_v35  ;;  %v10447_v58 = vpop.f32.mrf.mxu1  ;;  %8170 = vmatmul.mubr.msk.bf16.gmra.mxu1 %vm586_vm1, %v4874_v7  ;;  %v4879_v51 = vrot.slane %v10458_v19, 2 }
 0x214   : > { %11823 = vst [vmem:[#allocation8_spill] sm:$0xff] %v10447_v58  ;;  %v3021_v43 = vpop.f32.mrf.mxu0  ;;  %8131 = vmatprep.mubr.msk.bf16.mxu0 %vm586_vm1, %v4870_v23  ;;  %8173 = vmatprep.mubr.msk.bf16.mxu1 %vm586_vm1, %v10435_v39  ;;  %v4878_v42 = vsel %vm1942_vm4, %v4875_v6, %v4877_v57 }
 0x215   : > { %v10461_v49 = vpack.c.bf16 %v3206_v4, %v3205_v10  ;;  %v3204_v32 = vmax.f32 %v3168_v56, 0.0  ;;  %v3128_v33 = vadd.f32 %v3021_v43, %v10164_v28  ;;  %v10464_v37 = vpop.f32.mrf.mxu1  ;;  %v3173_v8 = vadd.f32 %v10327_v30, %v3130_v12 }
 0x216   : > { %v7914_v23 = vpop.f32.mrf.mxu0  ;;  %v10480_v43 = vsel %vm1942_vm4, %v4877_v57, %v4879_v51 }
 0x217   : > { %11824 = vst [vmem:[#allocation2_spill] sm:$0xff] %v10461_v49  ;;  %v10467_v35 = vpack.c.bf16 %v3204_v32, %v3203_v54  ;;  %v3131_v13 = vadd.f32 %v7914_v23, %v10171_v21  ;;  %v10471_v58 = vpop.f32.mrf.mxu1  ;;  %v3171_v10 = vadd.f32 %v10327_v30, %v3128_v33  ;;  %v3209_v21 = vmax.f32 %v3173_v8, 0.0  ;;  %v10497_v8 = vld [vmem:[%s8718_s21 + $0x58] sm:$0xff]  }
 0x218   : > { %11826 = vst [vmem:[#allocation35_spill] sm:$0xff] %v10471_v58  ;;  %v3024_v25 = vpop.f32.mrf.mxu0 }
 0x219   : > { %11825 = vst [vmem:[#allocation4_spill] sm:$0xff] %v10467_v35  ;;  %v3174_v28 = vadd.f32 %v10327_v30, %v3131_v13  ;;  %v3129_v4 = vadd.f32 %v3024_v25, %v10179_v3  ;;  %v10477_v56 = vpop.f32.mrf.mxu1  ;;  %v10493_v13 = vld [vmem:[%s8718_s21 + $0x50] sm:$0xff]   ;;  %v4883_v25 = vrot.slane %v10497_v8, 2  ;;  %v3207_v57 = vmax.f32 %v3171_v10, 0.0 }
 0x21a   : > { %11827 = vst [vmem:[#allocation24_spill] sm:$0xff] %v10477_v56  ;;  %v7917_v12 = vpop.f32.mrf.mxu0  ;;  %8132 = vmatmul.mubr.msk.bf16.gmra.mxu0 %vm586_vm1, %v10397_v31  ;;  %v4881_v31 = vrot.slane %v10493_v13, 2 }
 0x21b   : > { %v3210_v54 = vmax.f32 %v3174_v28, 0.0  ;;  %v3172_v6 = vadd.f32 %v10327_v30, %v3129_v4  ;;  %v3134_v32 = vadd.f32 %v7917_v12, %v10183_v59  ;;  %v10486_v33 = vpop.f32.mrf.mxu1  ;;  %8174 = vmatmul.mubr.msk.bf16.gmra.mxu1 %vm586_vm1, %v4878_v42  ;;  %8135 = vmatprep.mubr.msk.bf16.mxu0 %vm586_vm1, %v4874_v7 }
 0x21c   : > { %11828 = vst [vmem:[#allocation36_spill] sm:$0xff] %v10486_v33  ;;  %v3037_v3 = vpop.f32.mrf.mxu0  ;;  %8177 = vmatprep.mubr.msk.bf16.mxu1 %vm586_vm1, %v10480_v43  ;;  %v4882_v58 = vsel %vm1942_vm4, %v4879_v51, %v4881_v31 }
 0x21d   : > { %v10500_v59 = vpack.c.bf16 %v3210_v54, %v3209_v21  ;;  %v3208_v23 = vmax.f32 %v3172_v6, 0.0  ;;  %v3132_v28 = vadd.f32 %v3037_v3, %v10187_v0  ;;  %v10503_v4 = vpop.f32.mrf.mxu1  ;;  %v3177_v49 = vadd.f32 %v10327_v30, %v3134_v32 }
 0x21e   : > { %v7918_v7 = vpop.f32.mrf.mxu0  ;;  %v10518_v6 = vsel %vm1942_vm4, %v4881_v31, %v4883_v25 }
 0x21f   : > { %11829 = vst [vmem:[#allocation47_spill] sm:$0xff] %v10500_v59  ;;  %v10505_v12 = vpack.c.bf16 %v3208_v23, %v3207_v57  ;;  %v3135_v35 = vadd.f32 %v7918_v7, %v10195_v26  ;;  %v10509_v33 = vpop.f32.mrf.mxu1  ;;  %v3175_v10 = vadd.f32 %v10327_v30, %v3132_v28  ;;  %v3213_v26 = vmax.f32 %v3177_v49, 0.0  ;;  %v10535_v49 = vld [vmem:[%s8718_s21 + $0x68] sm:$0xff]  }
 0x220   : > { %v3040_v56 = vpop.f32.mrf.mxu0 }
 0x221   : > { %11830 = vst [vmem:[#allocation34_spill] sm:$0xff] %v10505_v12  ;;  %v3178_v21 = vadd.f32 %v10327_v30, %v3135_v35  ;;  %v3133_v0 = vadd.f32 %v3040_v56, %v10203_v17  ;;  %v10515_v54 = vpop.f32.mrf.mxu1  ;;  %v10531_v35 = vld [vmem:[%s8718_s21 + $0x60] sm:$0xff]   ;;  %v4887_v56 = vrot.slane %v10535_v49, 2  ;;  %v3211_v31 = vmax.f32 %v3175_v10, 0.0 }
 0x222   : > { %11831 = vst [vmem:[#allocation46_spill] sm:$0xff] %v10515_v54  ;;  %v7921_v32 = vpop.f32.mrf.mxu0  ;;  %8136 = vmatmul.mubr.msk.bf16.gmra.mxu0 %vm586_vm1, %v10435_v39  ;;  %v4885_v39 = vrot.slane %v10531_v35, 2 }
 0x223   : > { %v3214_v3 = vmax.f32 %v3178_v21, 0.0  ;;  %v3176_v51 = vadd.f32 %v10327_v30, %v3133_v0  ;;  %v3138_v57 = vadd.f32 %v7921_v32, %v10207_v22  ;;  %v10524_v23 = vpop.f32.mrf.mxu1  ;;  %8178 = vmatmul.mubr.msk.bf16.gmra.mxu1 %vm586_vm1, %v4882_v58  ;;  %8139 = vmatprep.mubr.msk.bf16.mxu0 %vm586_vm1, %v4878_v42 }
 0x224   : > { %11832 = vst [vmem:[#allocation41_spill] sm:$0xff] %v10524_v23  ;;  %v3053_v17 = vpop.f32.mrf.mxu0  ;;  %8181 = vmatprep.mubr.msk.bf16.mxu1 %vm586_vm1, %v10518_v6  ;;  %v4886_v54 = vsel %vm1942_vm4, %v4883_v25, %v4885_v39 }
 0x225   : > { %v10538_v22 = vpack.c.bf16 %v3214_v3, %v3213_v26  ;;  %v3212_v28 = vmax.f32 %v3176_v51, 0.0  ;;  %v3136_v7 = vadd.f32 %v3053_v17, %v10210_v44  ;;  %v10541_v21 = vpop.f32.mrf.mxu1  ;;  %v3181_v32 = vadd.f32 %v10327_v30, %v3138_v57 }
 0x226   : > { %v7922_v42 = vpop.f32.mrf.mxu0  ;;  %v10556_v51 = vsel %vm1942_vm4, %v4885_v39, %v4887_v56 }
 0x227   : > { %11833 = vst [vmem:[#allocation3_spill] sm:$0xff] %v10538_v22  ;;  %v10543_v0 = vpack.c.bf16 %v3212_v28, %v3211_v31  ;;  %v3139_v59 = vadd.f32 %v7922_v42, %v10219_v29  ;;  %v10547_v12 = vpop.f32.mrf.mxu1  ;;  %v3179_v10 = vadd.f32 %v10327_v30, %v3136_v7  ;;  %v3217_v29 = vmax.f32 %v3181_v32, 0.0 }
 0x228   : > { %v3056_v23 = vpop.f32.mrf.mxu0 }
 0x229   : > { %11834 = vst [vmem:[#allocation20_spill] sm:$0xff] %v10543_v0  ;;  %v3182_v26 = vadd.f32 %v10327_v30, %v3139_v59  ;;  %v3137_v44 = vadd.f32 %v3056_v23, %v10227_v15  ;;  %v10553_v3 = vpop.f32.mrf.mxu1  ;;  %v10569_v59 = vld [vmem:[%s8718_s21 + $0x70] sm:$0xff]   ;;  %v10573_v23 = vld [vmem:[%s8718_s21 + $0x78] sm:$0xff]   ;;  %v3215_v7 = vmax.f32 %v3179_v10, 0.0 }
 0x22a   : > { %11835 = vst [vmem:[#allocation61_spill] sm:$0xff] %v10553_v3  ;;  %v7925_v57 = vpop.f32.mrf.mxu0  ;;  %8140 = vmatmul.mubr.msk.bf16.gmra.mxu0 %vm586_vm1, %v10480_v43  ;;  %v4889_v43 = vrot.slane %v10569_v59, 2  ;;  %v4891_v39 = vrot.slane %v10573_v23, 2 }
 0x22b   : > { %v3218_v17 = vmax.f32 %v3182_v26, 0.0  ;;  %v3180_v25 = vadd.f32 %v10327_v30, %v3137_v44  ;;  %v3142_v31 = vadd.f32 %v7925_v57, %v10231_v36  ;;  %v10562_v28 = vpop.f32.mrf.mxu1  ;;  %8182 = vmatmul.mubr.msk.bf16.gmra.mxu1 %vm586_vm1, %v4886_v54  ;;  %8143 = vmatprep.mubr.msk.bf16.mxu0 %vm586_vm1, %v4882_v58 }
 0x22c   : > { %11836 = vst [vmem:[#allocation62_spill] sm:$0xff] %v10562_v28  ;;  %v3069_v15 = vpop.f32.mrf.mxu0  ;;  %8185 = vmatprep.mubr.msk.bf16.mxu1 %vm586_vm1, %v10556_v51  ;;  %v4890_v3 = vsel %vm1942_vm4, %v4887_v56, %v4889_v43 }
 0x22d   : > { %v10576_v36 = vpack.c.bf16 %v3218_v17, %v3217_v29  ;;  %v3216_v42 = vmax.f32 %v3180_v25, 0.0  ;;  %v3140_v32 = vadd.f32 %v3069_v15, %v10237_v48  ;;  %v10579_v26 = vpop.f32.mrf.mxu1  ;;  %v3185_v57 = vadd.f32 %v10327_v30, %v3142_v31 }
 0x22e   : > { %v7926_v58 = vpop.f32.mrf.mxu0  ;;  %v10594_v25 = vsel %vm1942_vm4, %v4889_v43, %v4891_v39  ;;  %v10611_v43 = vld [vmem:[%s8718_s21 + $0x88] sm:$0xff]  }
 0x22f   : > { %11837 = vst [vmem:[#allocation63_spill] sm:$0xff] %v10576_v36  ;;  %v10581_v44 = vpack.c.bf16 %v3216_v42, %v3215_v7  ;;  %v3143_v22 = vadd.f32 %v7926_v58, %v10247_v2  ;;  %v10585_v0 = vpop.f32.mrf.mxu1  ;;  %v3183_v10 = vadd.f32 %v10327_v30, %v3140_v32  ;;  %v3221_v2 = vmax.f32 %v3185_v57, 0.0 }
 0x230   : > { %v3072_v28 = vpop.f32.mrf.mxu0  ;;  %v4895_v42 = vrot.slane %v10611_v43, 2 }
 0x231   : > { %11838 = vst [vmem:[#allocation64_spill] sm:$0xff] %v10581_v44  ;;  %v3186_v29 = vadd.f32 %v10327_v30, %v3143_v22  ;;  %v3141_v48 = vadd.f32 %v3072_v28, %v10255_v61  ;;  %v10591_v17 = vpop.f32.mrf.mxu1  ;;  %v10607_v28 = vld [vmem:[%s8718_s21 + $0x80] sm:$0xff]   ;;  %v3219_v32 = vmax.f32 %v3183_v10, 0.0 }
 0x232   : > { %11839 = vst [vmem:[#allocation65_spill] sm:$0xff] %v10591_v17  ;;  %v7929_v31 = vpop.f32.mrf.mxu0  ;;  %8144 = vmatmul.mubr.msk.bf16.gmra.mxu0 %vm586_vm1, %v10518_v6  ;;  %v4893_v6 = vrot.slane %v10607_v28, 2 }
 0x233   : > { %v3222_v15 = vmax.f32 %v3186_v29, 0.0  ;;  %v3184_v56 = vadd.f32 %v10327_v30, %v3141_v48  ;;  %v3146_v7 = vadd.f32 %v7929_v31, %v10264_v18  ;;  %v10600_v22 = vpop.f32.mrf.mxu1  ;;  %8186 = vmatmul.mubr.msk.bf16.gmra.mxu1 %vm586_vm1, %v4890_v3  ;;  %8147 = vmatprep.mubr.msk.bf16.mxu0 %vm586_vm1, %v4886_v54  ;;  %v3292_v54 = vld [vmem:[%s8718_s21 + $0x9c] sm:$0xf] }
 0x234   : > { %11840 = vst [vmem:[#allocation66_spill] sm:$0xff] %v10600_v22  ;;  %v3085_v61 = vpop.f32.mrf.mxu0  ;;  %8189 = vmatprep.mubr.msk.bf16.mxu1 %vm586_vm1, %v10594_v25  ;;  %v4894_v10 = vsel %vm1942_vm4, %v4891_v39, %v4893_v6 }
 0x235   : > { %v10614_v18 = vpack.c.bf16 %v3222_v15, %v3221_v2  ;;  %v3220_v58 = vmax.f32 %v3184_v56, 0.0  ;;  %v3144_v57 = vadd.f32 %v3085_v61, %v10268_v9  ;;  %v10617_v29 = vpop.f32.mrf.mxu1  ;;  %v3189_v36 = vadd.f32 %v10327_v30, %v3146_v7 }
 0x236   : > { %v7930_v48 = vpop.f32.mrf.mxu0  ;;  %v10628_v2 = vcombine.low %v10262_v62, %v3292_v54  ;;  %v10636_v7 = vsel %vm1942_vm4, %v4893_v6, %v4895_v42 }
 0x237   : > { %11841 = vst [vmem:[#allocation67_spill] sm:$0xff] %v10614_v18  ;;  %v10620_v31 = vpack.c.bf16 %v3220_v58, %v3219_v32  ;;  %v3147_v44 = vadd.f32 %v7930_v48, %v10282_v45  ;;  %v10624_v22 = vpop.f32.mrf.mxu1  ;;  %v3187_v9 = vadd.f32 %v10327_v30, %v3144_v57  ;;  %v3225_v32 = vmax.f32 %v3189_v36, 0.0 }
 0x238   : > { %v3088_v17 = vpop.f32.mrf.mxu0 }
 0x239   : > { %11842 = vst [vmem:[#allocation68_spill] sm:$0xff] %v10620_v31  ;;  %v3190_v15 = vadd.f32 %v10327_v30, %v3147_v44  ;;  %v3145_v56 = vadd.f32 %v3088_v17, %v10292_v63  ;;  %v10633_v61 = vpop.f32.mrf.mxu1  ;;  %v10647_v44 = vrot.slane %v10243_v47, 2  ;;  %v3223_v36 = vmax.f32 %v3187_v9, 0.0 }
 0x23a   : > { %11843 = vst [vmem:[#allocation69_spill] sm:$0xff] %v10633_v61  ;;  %v7933_v45 = vpop.f32.mrf.mxu0  ;;  %8148 = vmatmul.mubr.msk.bf16.gmra.mxu0 %vm586_vm1, %v10556_v51  ;;  %v5174_v51 = vrot.slane %v10628_v2, 2 }
 0x23b   : > { %v3226_v39 = vmax.f32 %v3190_v15, 0.0  ;;  %v3188_v62 = vadd.f32 %v10327_v30, %v3145_v56  ;;  %v3150_v58 = vadd.f32 %v7933_v45, %v10300_v53  ;;  %v8015_v57 = vpop.f32.mrf.mxu1  ;;  %8190 = vmatmul.mubr.msk.bf16.gmra.mxu1 %vm586_vm1, %v4894_v10  ;;  %8151 = vmatprep.mubr.msk.bf16.mxu0 %vm586_vm1, %v4890_v3  ;;  %v10654_v15 = vld [vmem:[%s8718_s21 + $0xa0] ss:$0 sps:$4 sm:$0x77]   ;;  %v4898_v9 = vsel %vm1942_vm4, %v4895_v42, %v10647_v44 }
 0x23c   : > { %v3101_v63 = vpop.f32.mrf.mxu0  ;;  %8193 = vmatprep.mubr.msk.bf16.mxu1 %vm586_vm1, %v10636_v7  ;;  %11845 = vst [vmem:[#allocation71_spill] sm:$0xff] %v10654_v15 }
 0x23d   : > { %v10650_v17 = vpack.c.bf16 %v3226_v39, %v3225_v32  ;;  %v3224_v6 = vmax.f32 %v3188_v62, 0.0  ;;  %v3148_v53 = vadd.f32 %v3101_v63, %v10305_v5  ;;  %v4104_v54 = vpop.f32.mrf.mxu1  ;;  %v3193_v56 = vadd.f32 %v10327_v30, %v3150_v58 }
 0x23e   : > { %v7934_v48 = vpop.f32.mrf.mxu0  ;;  %v5175_v62 = vsel %vm1942_vm4, %v10647_v44, %v5174_v51 }
 0x23f   : > { %11844 = vst [vmem:[#allocation70_spill] sm:$0xff] %v10650_v17  ;;  %v10656_v3 = vpack.c.bf16 %v3224_v6, %v3223_v36  ;;  %v3151_v45 = vadd.f32 %v7934_v48, %v10312_v38  ;;  %v8016_v18 = vpop.f32.mrf.mxu1  ;;  %v3191_v61 = vadd.f32 %v10327_v30, %v3148_v53  ;;  %v5176_v38 = vrot.slane %v10654_v15, 2  ;;  %v11847_v53 = vld [vmem:[#allocation53_spill] sm:$0xff] }
 0x240   : > { %v3104_v31 = vpop.f32.mrf.mxu0  ;;  %v3229_v58 = vmax.f32 %v3193_v56, 0.0 }
 0x241   : > { %11846 = vst [vmem:[#allocation72_spill] sm:$0xff] %v10656_v3  ;;  %v3194_v32 = vadd.f32 %v10327_v30, %v3151_v45  ;;  %v3149_v5 = vadd.f32 %v3104_v31, %v10322_v16  ;;  %v4107_v39 = vpop.f32.mrf.mxu1  ;;  %v3227_v16 = vmax.f32 %v3191_v61, 0.0  ;;  %v5749_v45 = vrot.slane %v10335_v1, 3 }
 0x242   : > { %v7977_v63 = vpop.f32.mrf.mxu0  ;;  %8152 = vmatmul.mubr.msk.bf16.gmra.mxu0 %vm586_vm1, %v10594_v25  ;;  %v5750_v25 = vrot.slane %v10339_v52, 3  ;;  %v11850_v52 = vld [vmem:[#allocation13_spill] sm:$0xff] }
 0x243   : > { %v3230_v36 = vmax.f32 %v3194_v32, 0.0  ;;  %v3192_v6 = vadd.f32 %v10327_v30, %v3149_v5  ;;  %v3845_v42 = vadd.f32 %v7977_v63, %v11847_v53  ;;  %v8019_v48 = vpop.f32.mrf.mxu1  ;;  %8194 = vmatmul.mubr.msk.bf16.gmra.mxu1 %vm586_vm1, %v4898_v9  ;;  %8155 = vmatprep.mubr.msk.bf16.mxu0 %vm586_vm1, %v4894_v10 }
 0x244   : > { %v3836_v31 = vpop.f32.mrf.mxu0  ;;  %8197 = vmatprep.mubr.msk.bf16.mxu1 %vm586_vm1, %v5175_v62  ;;  %v5177_v62 = vsel %vm1942_vm4, %v5174_v51, %v5176_v38  ;;  %v11856_v51 = vld [vmem:[#allocation59_spill] sm:$0xff] }
 0x245   : > { %v10677_v17 = vpack.c.bf16 %v3230_v36, %v3229_v58  ;;  %v3228_v56 = vmax.f32 %v3192_v6, 0.0  ;;  %v3837_v30 = vadd.f32 %v3836_v31, %v10298_v34  ;;  %v4120_v32 = vpop.f32.mrf.mxu1  ;;  %v10680_v5 = vadd.f32 %v8015_v57, %v3845_v42  ;;  %v11851_v36 = vld [vmem:[#allocation14_spill] sm:$0xff]  ;;  %v11853_v31 = vld [vmem:[#allocation23_spill] sm:$0xff]  ;;  %v11854_v42 = vld [vmem:[#allocation12_spill] sm:$0xff] }
 0x246   : > { %v7978_v63 = vpop.f32.mrf.mxu0  ;;  %v5397_v58 = vrot.slane %v11850_v52, 2  ;;  %v5398_v6 = vrot.slane %v11851_v36, 3  ;;  %v5401_v57 = vrot.slane %v11853_v31, 3  ;;  %v11860_v31 = vld [vmem:[#allocation21_spill] sm:$0xff] }
 0x247   : > { %11848 = vst [vmem:[#allocation53_spill] sm:$0xff] %v10677_v17  ;;  %v10682_v53 = vpack.c.bf16 %v3228_v56, %v3227_v16  ;;  %v3848_v10 = vadd.f32 %v7978_v63, %v10303_v11  ;;  %v8020_v61 = vpop.f32.mrf.mxu1  ;;  %v10686_v3 = vadd.f32 %v4104_v54, %v3837_v30  ;;  %v11852_v17 = vld [vmem:[#allocation19_spill] sm:$0xff]  ;;  %v5751_v56 = vsel %vm2844_vm7, %v5749_v45, %v5750_v25 }
 0x248   : > { %v3839_v1 = vpop.f32.mrf.mxu0  ;;  %v5400_v34 = vrot.slane %v11852_v17, 2  ;;  %v11857_v17 = vld [vmem:[#allocation48_spill] sm:$0xff] }
 0x249   : > { %11849 = vst [vmem:[#allocation73_spill] sm:$0xff] %v10682_v53  ;;  %v3840_v15 = vadd.f32 %v3839_v1, %v11854_v42  ;;  %v4123_v16 = vpop.f32.mrf.mxu1  ;;  %v10694_v11 = vadd.f32 %v8016_v18, %v3848_v10  ;;  %v4899_v30 = vrot.slane %v11857_v17, 2  ;;  %v11859_v18 = vld [vmem:[#allocation22_spill] sm:$0xff]  ;;  %v5399_v10 = vor.u32 %v5398_v6, %v5397_v58 }
 0x24a   : > { %v7981_v63 = vpop.f32.mrf.mxu0  ;;  %8156 = vmatmul.mubr.msk.bf16.gmra.mxu0 %vm586_vm1, %v10636_v7  ;;  %v5752_v45 = vrot.slane %v11859_v18, 3  ;;  %v5402_v36 = vor.u32 %v5401_v57, %v5400_v34  ;;  %v11864_v17 = vld [vmem:[#allocation10_spill] sm:$0xff] }
 0x24b   : > { %11855 = vst [vmem:[#allocation13_spill] sm:$0xff] %v10694_v11  ;;  %v3861_v54 = vadd.f32 %v7981_v63, %v11856_v51  ;;  %v8023_v38 = vpop.f32.mrf.mxu1  ;;  %8198 = vmatmul.mubr.msk.bf16.gmra.mxu1 %vm586_vm1, %v5177_v62  ;;  %8159 = vmatprep.mubr.msk.bf16.mxu0 %vm586_vm1, %v4898_v9  ;;  %v10702_v52 = vadd.f32 %v4107_v39, %v3840_v15  ;;  %v11861_v63 = vld [vmem:[#allocation18_spill] sm:$0xff]  ;;  %v11863_v62 = vld [vmem:[#allocation11_spill] sm:$0xff] }
 0x24c   : > { %v3852_v1 = vpop.f32.mrf.mxu0  ;;  %8241 = vmatprep.mubr.msk.bf16.mxu1 %vm586_vm1, %v5751_v56  ;;  %v5754_v51 = vrot.slane %v11861_v63, 3  ;;  %v5404_v9 = vrot.slane %v11863_v62, 2  ;;  %v4900_v56 = vsel %vm1942_vm4, %v10647_v44, %v4899_v30  ;;  %v5753_v34 = vsel %vm2844_vm7, %v5750_v25, %v5752_v45  ;;  %v11868_v63 = vld [vmem:[#allocation17_spill] sm:$0xff]  ;;  %v8432_v44 = vld [vmem:[%s11442_s4] sm:$0xff]   ;;  %v11869_v25 = vld [vmem:[#allocation15_spill] sm:$0xff] }
 0x24d   : > { %11858 = vst [vmem:[#allocation14_spill] sm:$0xff] %v10702_v52  ;;  %v3853_v7 = vadd.f32 %v3852_v1, %v11860_v31  ;;  %v4136_v42 = vpop.f32.mrf.mxu1  ;;  %v10708_v53 = vadd.f32 %v8019_v48, %v3861_v54  ;;  %v11865_v52 = vld [vmem:[#allocation7_spill] sm:$0xff]  ;;  %v5403_v57 = vsel %vm2486_vm6, %v5399_v10, %v5402_v36  ;;  %v11867_v1 = vld [vmem:[#allocation25_spill] sm:$0xff] }
 0x24e   : > { %v7982_v11 = vpop.f32.mrf.mxu0  ;;  %v5405_v18 = vrot.slane %v11865_v52, 3  ;;  %v11866_v48 = vld [vmem:[#allocation27_spill] sm:$0xff]  ;;  %v5409_v31 = vrot.slane %v11867_v1, 3 }
 0x24f   : > { %11862 = vst [vmem:[#allocation19_spill] sm:$0xff] %v10708_v53  ;;  %v3864_v15 = vadd.f32 %v7982_v11, %v11864_v17  ;;  %v8024_v39 = vpop.f32.mrf.mxu1  ;;  %v10715_v58 = vadd.f32 %v4120_v32, %v3853_v7  ;;  %v5408_v54 = vrot.slane %v11866_v48, 2  ;;  %v5755_v17 = vsel %vm2844_vm7, %v5752_v45, %v5754_v51 }
 0x250   : > { %v3855_v6 = vpop.f32.mrf.mxu0  ;;  %v5406_v10 = vor.u32 %v5405_v18, %v5404_v9  ;;  %v5758_v48 = vrot.slane %v10414_v24, 3  ;;  %v11870_v9 = vld [vmem:[#allocation28_spill] sm:$0xff]  ;;  %v11871_v18 = vld [vmem:[#allocation5_spill] sm:$0xff] }
 0x251   : > { %v3856_v62 = vadd.f32 %v3855_v6, %v11868_v63  ;;  %v4139_v11 = vpop.f32.mrf.mxu1  ;;  %v10723_v53 = vadd.f32 %v8020_v61, %v3864_v15  ;;  %v5756_v61 = vrot.slane %v10409_v55, 3  ;;  %v5410_v15 = vor.u32 %v5409_v31, %v5408_v54  ;;  %v11872_v31 = vld [vmem:[#allocation30_spill] sm:$0xff] }
 0x252   : > { %v7985_v32 = vpop.f32.mrf.mxu0  ;;  %8160 = vmatmul.mubr.msk.bf16.gmra.mxu0 %vm586_vm1, %v4900_v56  ;;  %v5413_v1 = vrot.slane %v11871_v18, 3  ;;  %v5407_v55 = vsel %vm2486_vm6, %v5402_v36, %v5406_v10 }
 0x253   : > { %v3877_v30 = vadd.f32 %v7985_v32, %v11869_v25  ;;  %v8027_v52 = vpop.f32.mrf.mxu1  ;;  %8242 = vmatmul.mubr.msk.bf16.vlgmr.msra.gmra.mxu1 %vm586_vm1, %v5753_v34  ;;  %8203 = vmatprep.mubr.msk.bf16.mxu0 %vm586_vm1, %v5403_v57  ;;  %v10732_v7 = vadd.f32 %v4123_v16, %v3856_v62  ;;  %v5412_v16 = vrot.slane %v11870_v9, 2  ;;  %v5411_v24 = vsel %vm2486_vm6, %v5406_v10, %v5410_v15 }
 0x254   : > { %v3868_v45 = vpop.f32.mrf.mxu0  ;;  %8245 = vmatprep.mubr.msk.bf16.mxu1 %vm586_vm1, %v5755_v17  ;;  %8318 = vmatpush3.bf16.msra.mxu1 %v10440_v14  ;;  %v11873_v17 = vld [vmem:[#allocation29_spill] sm:$0xff]  ;;  %v5762_v9 = vrot.slane %v10458_v19, 3  ;;  %v11876_v19 = vld [vmem:[#allocation38_spill] sm:$0xff] }
 0x255   : > { %v3869_v56 = vadd.f32 %v3868_v45, %v10380_v46  ;;  %v4152_v6 = vpop.f32.mrf.mxu1  ;;  %8319 = vmatprep.subr.bf16.mxu1 %v8432_v44  ;;  %v10739_v34 = vadd.f32 %v8023_v38, %v3877_v30  ;;  %v5757_v46 = vsel %vm2844_vm7, %v5754_v51, %v5756_v61  ;;  %v5416_v38 = vrot.slane %v11872_v31, 2 }
 0x256   : > { %v7986_v57 = vpop.f32.mrf.mxu0  ;;  %v5417_v32 = vrot.slane %v11873_v17, 3 }
 0x257   : > { %v3880_v63 = vadd.f32 %v7986_v57, %v10386_v41  ;;  %v8028_v62 = vpop.f32.mrf.mxu1  ;;  %v10745_v54 = vadd.f32 %v4136_v42, %v3869_v56  ;;  %v5759_v41 = vsel %vm2844_vm7, %v5756_v61, %v5758_v48  ;;  %v5414_v42 = vor.u32 %v5413_v1, %v5412_v16 }
 0x258   : > { %v3871_v14 = vpop.f32.mrf.mxu0  ;;  %8320 = vmatpush3.bf16.msra.mxu1 %v8432_v44 }
 0x259   : > { %v3872_v25 = vadd.f32 %v3871_v14, %v10394_v27  ;;  %v4155_v30 = vpop.f32.mrf.mxu1  ;;  %v10753_v45 = vadd.f32 %v8024_v39, %v3880_v63  ;;  %v5760_v27 = vrot.slane %v10454_v40, 3  ;;  %v5418_v39 = vor.u32 %v5417_v32, %v5416_v38  ;;  %v11874_v63 = vld [vmem:[#allocation32_spill] sm:$0xff]  ;;  %v11875_v14 = vld [vmem:[#allocation31_spill] sm:$0xff]  ;;  %v11877_v38 = vld [vmem:[#allocation33_spill] sm:$0xff] }
 0x25a   : > { %v7989_v36 = vpop.f32.mrf.mxu0  ;;  %8204 = vmatmul.mubr.msk.bf16.vlgmr.msra.gmra.mxu0 %vm586_vm1, %v5407_v55  ;;  %v5415_v18 = vsel %vm2486_vm6, %v5410_v15, %v5414_v42  ;;  %v5420_v55 = vrot.slane %v11874_v63, 2  ;;  %v5425_v17 = vrot.slane %v11877_v38, 3  ;;  %v11878_v32 = vld [vmem:[#allocation26_spill] sm:$0xff]  ;;  %v5766_v63 = vrot.slane %v10497_v8, 3 }
 0x25b   : > { %v3893_v51 = vadd.f32 %v7989_v36, %v10402_v20  ;;  %v8031_v56 = vpop.f32.mrf.mxu1  ;;  %8246 = vmatmul.mubr.msk.bf16.gmra.mxu1 %vm586_vm1, %v5757_v46  ;;  %8207 = vmatprep.mubr.msk.bf16.mxu0 %vm586_vm1, %v5411_v24  ;;  %v10759_v10 = vadd.f32 %v4139_v11, %v3872_v25  ;;  %v5421_v46 = vrot.slane %v11875_v14, 3  ;;  %v5419_v31 = vsel %vm2486_vm6, %v5414_v42, %v5418_v39 }
 0x25c   : > { %v3884_v44 = vpop.f32.mrf.mxu0  ;;  %8249 = vmatprep.mubr.msk.bf16.mxu1 %vm586_vm1, %v5759_v41 }
 0x25d   : > { %v3885_v61 = vadd.f32 %v3884_v44, %v10420_v50  ;;  %v4168_v57 = vpop.f32.mrf.mxu1  ;;  %v10765_v16 = vadd.f32 %v8027_v52, %v3893_v51  ;;  %v5761_v50 = vsel %vm2844_vm7, %v5758_v48, %v5760_v27  ;;  %v5424_v52 = vrot.slane %v11876_v19, 2 }
 0x25e   : > { %v7990_v20 = vpop.f32.mrf.mxu0  ;;  %v5422_v48 = vor.u32 %v5421_v46, %v5420_v55  ;;  %v11880_v55 = vld [vmem:[#allocation39_spill] sm:$0xff] }
 0x25f   : > { %v3896_v1 = vadd.f32 %v7990_v20, %v10426_v60  ;;  %v8032_v11 = vpop.f32.mrf.mxu1  ;;  %v10771_v24 = vadd.f32 %v4152_v6, %v3885_v61  ;;  %v5763_v60 = vsel %vm2844_vm7, %v5760_v27, %v5762_v9  ;;  %v11879_v6 = vld [vmem:[#allocation8_spill] sm:$0xff]  ;;  %v8433_v61 = vld [vmem:[%s11443_s5 + $0x8] sm:$0xff]   ;;  %v5426_v20 = vor.u32 %v5425_v17, %v5424_v52 }
 0x260   : > { %v3887_v40 = vpop.f32.mrf.mxu0  ;;  %8277 = vmatprep.subr.bf16.mxu0 %v8433_v61  ;;  %v5428_v46 = vrot.slane %v11880_v55, 2 }
 0x261   : > { %v3888_v15 = vadd.f32 %v3887_v40, %v11878_v32  ;;  %v4171_v25 = vpop.f32.mrf.mxu1  ;;  %v10779_v41 = vadd.f32 %v8028_v62, %v3896_v1  ;;  %v5764_v62 = vrot.slane %v10493_v13, 3  ;;  %v11881_v40 = vld [vmem:[#allocation37_spill] sm:$0xff]  ;;  %8278 = vmatpush3.bf16.msra.mxu0 %v8433_v61  ;;  %v5423_v13 = vsel %vm2486_vm6, %v5418_v39, %v5422_v48 }
 0x262   : > { %v7993_v36 = vpop.f32.mrf.mxu0  ;;  %8208 = vmatmul.mubr.msk.bf16.gmra.mxu0 %vm586_vm1, %v5415_v18  ;;  %v5427_v8 = vsel %vm2486_vm6, %v5422_v48, %v5426_v20 }
 0x263   : > { %v3909_v51 = vadd.f32 %v7993_v36, %v11879_v6  ;;  %v8035_v44 = vpop.f32.mrf.mxu1  ;;  %8250 = vmatmul.mubr.msk.bf16.gmra.mxu1 %vm586_vm1, %v5761_v50  ;;  %8211 = vmatprep.mubr.msk.bf16.mxu0 %vm586_vm1, %v5419_v31  ;;  %v10785_v42 = vadd.f32 %v4155_v30, %v3888_v15  ;;  %v5429_v50 = vrot.slane %v11881_v40, 3  ;;  %v11882_v31 = vld [vmem:[#allocation35_spill] sm:$0xff]  ;;  %v5765_v17 = vsel %vm2844_vm7, %v5762_v9, %v5764_v62  ;;  %v11884_v15 = vld [vmem:[#allocation40_spill] sm:$0xff] }
 0x264   : > { %v3900_v27 = vpop.f32.mrf.mxu0  ;;  %8253 = vmatprep.mubr.msk.bf16.mxu1 %vm586_vm1, %v5763_v60  ;;  %v5433_v60 = vrot.slane %v11884_v15, 3  ;;  %v11885_v36 = vld [vmem:[#allocation24_spill] sm:$0xff]  ;;  %v5767_v61 = vsel %vm2844_vm7, %v5764_v62, %v5766_v63  ;;  %v5768_v62 = vrot.slane %v10531_v35, 3 }
 0x265   : > { %v3901_v18 = vadd.f32 %v3900_v27, %v10464_v37  ;;  %v4184_v1 = vpop.f32.mrf.mxu1  ;;  %v10794_v14 = vadd.f32 %v8031_v56, %v3909_v51  ;;  %v11883_v56 = vld [vmem:[#allocation42_spill] sm:$0xff]  ;;  %v5430_v39 = vor.u32 %v5429_v50, %v5428_v46  ;;  %v5770_v46 = vrot.slane %v10535_v49, 3 }
 0x266   : > { %v7994_v30 = vpop.f32.mrf.mxu0  ;;  %v5432_v32 = vrot.slane %v11883_v56, 2  ;;  %v11888_v56 = vld [vmem:[#allocation43_spill] sm:$0xff]  ;;  %v11889_v49 = vld [vmem:[#allocation50_spill] sm:$0xff] }
 0x267   : > { %v3912_v19 = vadd.f32 %v7994_v30, %v11882_v31  ;;  %v8036_v38 = vpop.f32.mrf.mxu1  ;;  %v10800_v52 = vadd.f32 %v4168_v57, %v3901_v18  ;;  %v11886_v57 = vld [vmem:[#allocation36_spill] sm:$0xff]  ;;  %v5437_v15 = vrot.slane %v11888_v56, 3 }
 0x268   : > { %v3903_v37 = vpop.f32.mrf.mxu0 }
 0x269   : > { %v3904_v6 = vadd.f32 %v3903_v37, %v11885_v36  ;;  %v4187_v51 = vpop.f32.mrf.mxu1  ;;  %v10808_v27 = vadd.f32 %v8032_v11, %v3912_v19  ;;  %v5434_v11 = vor.u32 %v5433_v60, %v5432_v32  ;;  %v11890_v60 = vld [vmem:[#allocation45_spill] sm:$0xff] }
 0x26a   : > { %v7997_v30 = vpop.f32.mrf.mxu0  ;;  %8212 = vmatmul.mubr.msk.bf16.gmra.mxu0 %vm586_vm1, %v5423_v13  ;;  %v5431_v13 = vsel %vm2486_vm6, %v5426_v20, %v5430_v39 }
 0x26b   : > { %v3925_v18 = vadd.f32 %v7997_v30, %v11886_v57  ;;  %v8039_v9 = vpop.f32.mrf.mxu1  ;;  %8254 = vmatmul.mubr.msk.bf16.gmra.mxu1 %vm586_vm1, %v5765_v17  ;;  %8215 = vmatprep.mubr.msk.bf16.mxu0 %vm586_vm1, %v5427_v8  ;;  %v10814_v48 = vadd.f32 %v4171_v25, %v3904_v6  ;;  %v11887_v17 = vld [vmem:[#allocation44_spill] sm:$0xff]  ;;  %v5435_v32 = vsel %vm2486_vm6, %v5430_v39, %v5434_v11  ;;  %v5441_v6 = vrot.slane %v11890_v60, 3 }
 0x26c   : > { %v3916_v55 = vpop.f32.mrf.mxu0  ;;  %8257 = vmatprep.mubr.msk.bf16.mxu1 %vm586_vm1, %v5767_v61  ;;  %v5436_v8 = vrot.slane %v11887_v17, 2  ;;  %v11891_v61 = vld [vmem:[#allocation46_spill] sm:$0xff] }
 0x26d   : > { %v3917_v40 = vadd.f32 %v3916_v55, %v10503_v4  ;;  %v4200_v31 = vpop.f32.mrf.mxu1  ;;  %v10820_v50 = vadd.f32 %v8035_v44, %v3925_v18  ;;  %v5769_v4 = vsel %vm2844_vm7, %v5766_v63, %v5768_v62  ;;  %v5440_v44 = vrot.slane %v11889_v49, 2 }
 0x26e   : > { %v7998_v19 = vpop.f32.mrf.mxu0  ;;  %v5438_v63 = vor.u32 %v5437_v15, %v5436_v8 }
 0x26f   : > { %v3928_v37 = vadd.f32 %v7998_v19, %v10509_v33  ;;  %v8040_v25 = vpop.f32.mrf.mxu1  ;;  %v10826_v36 = vadd.f32 %v4184_v1, %v3917_v40  ;;  %v5771_v33 = vsel %vm2844_vm7, %v5768_v62, %v5770_v46  ;;  %v11892_v1 = vld [vmem:[#allocation41_spill] sm:$0xff]  ;;  %v5772_v62 = vrot.slane %v10569_v59, 3 }
 0x270   : > { %v3919_v35 = vpop.f32.mrf.mxu0  ;;  %v5439_v60 = vsel %vm2486_vm6, %v5434_v11, %v5438_v63 }
 0x271   : > { %v3920_v20 = vadd.f32 %v3919_v35, %v11891_v61  ;;  %v4203_v30 = vpop.f32.mrf.mxu1  ;;  %v10834_v57 = vadd.f32 %v8036_v38, %v3928_v37  ;;  %v5442_v38 = vor.u32 %v5441_v6, %v5440_v44  ;;  %v11896_v6 = vld [vmem:[#allocation52_spill] sm:$0xff] }
 0x272   : > { %v8001_v18 = vpop.f32.mrf.mxu0  ;;  %8216 = vmatmul.mubr.msk.bf16.gmra.mxu0 %vm586_vm1, %v5431_v13  ;;  %v5774_v13 = vrot.slane %v10573_v23, 3  ;;  %v11895_v23 = vld [vmem:[#allocation55_spill] sm:$0xff] }
 0x273   : > { %v3941_v55 = vadd.f32 %v8001_v18, %v11892_v1  ;;  %v8043_v40 = vpop.f32.mrf.mxu1  ;;  %8258 = vmatmul.mubr.msk.bf16.gmra.mxu1 %vm586_vm1, %v5769_v4  ;;  %8219 = vmatprep.mubr.msk.bf16.mxu0 %vm586_vm1, %v5435_v32  ;;  %v10840_v39 = vadd.f32 %v4187_v51, %v3920_v20  ;;  %v11893_v4 = vld [vmem:[#allocation51_spill] sm:$0xff]  ;;  %v11894_v32 = vld [vmem:[#allocation49_spill] sm:$0xff]  ;;  %v5443_v44 = vsel %vm2486_vm6, %v5438_v63, %v5442_v38  ;;  %v5449_v20 = vrot.slane %v11896_v6, 3 }
 0x274   : > { %v3932_v19 = vpop.f32.mrf.mxu0  ;;  %8261 = vmatprep.mubr.msk.bf16.mxu1 %vm586_vm1, %v5771_v33  ;;  %v5444_v49 = vrot.slane %v11893_v4, 2  ;;  %v5445_v8 = vrot.slane %v11894_v32, 3  ;;  %v11897_v33 = vld [vmem:[#allocation61_spill] sm:$0xff] }
 0x275   : > { %v3933_v37 = vadd.f32 %v3932_v19, %v10541_v21  ;;  %v4216_v17 = vpop.f32.mrf.mxu1  ;;  %v10846_v56 = vadd.f32 %v8039_v9, %v3941_v55  ;;  %v5773_v21 = vsel %vm2844_vm7, %v5770_v46, %v5772_v62  ;;  %v5448_v9 = vrot.slane %v11895_v23, 2  ;;  %v11900_v23 = vld [vmem:[#allocation54_spill] sm:$0xff] }
 0x276   : > { %v8002_v35 = vpop.f32.mrf.mxu0  ;;  %v5775_v55 = vsel %vm2844_vm7, %v5772_v62, %v5774_v13  ;;  %v5446_v11 = vor.u32 %v5445_v8, %v5444_v49  ;;  %v5776_v62 = vrot.slane %v10607_v28, 3  ;;  %v5778_v49 = vrot.slane %v10611_v43, 3  ;;  %v11901_v43 = vld [vmem:[#allocation60_spill] sm:$0xff] }
 0x277   : > { %v3944_v51 = vadd.f32 %v8002_v35, %v10547_v12  ;;  %v8044_v15 = vpop.f32.mrf.mxu1  ;;  %v10852_v61 = vadd.f32 %v4200_v31, %v3933_v37  ;;  %v11898_v31 = vld [vmem:[#allocation62_spill] sm:$0xff]  ;;  %v5453_v6 = vrot.slane %v11900_v23, 3 }
 0x278   : > { %v3935_v59 = vpop.f32.mrf.mxu0 }
 0x279   : > { %v3936_v18 = vadd.f32 %v3935_v59, %v11897_v33  ;;  %v4219_v1 = vpop.f32.mrf.mxu1  ;;  %v10860_v12 = vadd.f32 %v8040_v25, %v3944_v51  ;;  %v5450_v25 = vor.u32 %v5449_v20, %v5448_v9  ;;  %v11902_v20 = vld [vmem:[#allocation57_spill] sm:$0xff] }
 0x27a   : > { %v8005_v19 = vpop.f32.mrf.mxu0  ;;  %8220 = vmatmul.mubr.msk.bf16.gmra.mxu0 %vm586_vm1, %v5439_v60  ;;  %v5447_v60 = vsel %vm2486_vm6, %v5442_v38, %v5446_v11 }
 0x27b   : > { %v3957_v37 = vadd.f32 %v8005_v19, %v11898_v31  ;;  %v8047_v46 = vpop.f32.mrf.mxu1  ;;  %8262 = vmatmul.mubr.msk.bf16.gmra.mxu1 %vm586_vm1, %v5773_v21  ;;  %8223 = vmatprep.mubr.msk.bf16.mxu0 %vm586_vm1, %v5443_v44  ;;  %v10866_v63 = vadd.f32 %v4203_v30, %v3936_v18  ;;  %v11899_v21 = vld [vmem:[#allocation56_spill] sm:$0xff]  ;;  %v5451_v9 = vsel %vm2486_vm6, %v5446_v11, %v5450_v25  ;;  %v5457_v18 = vrot.slane %v11902_v20, 3 }
 0x27c   : > { %v3948_v35 = vpop.f32.mrf.mxu0  ;;  %8265 = vmatprep.mubr.msk.bf16.mxu1 %vm586_vm1, %v5775_v55  ;;  %v5452_v44 = vrot.slane %v11899_v21, 2  ;;  %v11903_v55 = vld [vmem:[#allocation65_spill] sm:$0xff] }
 0x27d   : > { %v3949_v4 = vadd.f32 %v3948_v35, %v10579_v26  ;;  %v4232_v32 = vpop.f32.mrf.mxu1  ;;  %v10872_v8 = vadd.f32 %v8043_v40, %v3957_v37  ;;  %v5777_v26 = vsel %vm2844_vm7, %v5774_v13, %v5776_v62  ;;  %v5456_v40 = vrot.slane %v11901_v43, 2 }
 0x27e   : > { %v8006_v51 = vpop.f32.mrf.mxu0  ;;  %v5454_v11 = vor.u32 %v5453_v6, %v5452_v44 }
 0x27f   : > { %v3960_v59 = vadd.f32 %v8006_v51, %v10585_v0  ;;  %v8048_v30 = vpop.f32.mrf.mxu1  ;;  %v10878_v33 = vadd.f32 %v4216_v17, %v3949_v4  ;;  %v5779_v0 = vsel %vm2844_vm7, %v5776_v62, %v5778_v49  ;;  %v11904_v17 = vld [vmem:[#allocation66_spill] sm:$0xff]  ;;  %v5780_v62 = vrot.slane %v10243_v47, 3 }
 0x280   : > { %v3951_v28 = vpop.f32.mrf.mxu0 }
 0x281   : > { %v3952_v38 = vadd.f32 %v3951_v28, %v11903_v55  ;;  %v10885_v19 = vpop.f32.mrf.mxu1  ;;  %v10888_v31 = vadd.f32 %v8044_v15, %v3960_v59  ;;  %v5458_v15 = vor.u32 %v5457_v18, %v5456_v40  ;;  %v5465_v59 = vshrl.u32 %v10628_v2, 16 }
 0x282   : > { %v8009_v37 = vpop.f32.mrf.mxu0  ;;  %8224 = vmatmul.mubr.msk.bf16.gmra.mxu0 %vm586_vm1, %v5447_v60  ;;  %v5468_v60 = vshll.u32 %v10628_v2, 16  ;;  %v5782_v28 = vrot.slane %v10628_v2, 3  ;;  %v5455_v18 = vsel %vm2486_vm6, %v5450_v25, %v5454_v11 }
 0x283   : > { %v3973_v35 = vadd.f32 %v8009_v37, %v11904_v17  ;;  %v8091_v13 = vpop.f32.mrf.mxu1  ;;  %8266 = vmatmul.mubr.msk.bf16.gmra.mxu1 %vm586_vm1, %v5777_v26  ;;  %8227 = vmatprep.mubr.msk.bf16.mxu0 %vm586_vm1, %v5451_v9  ;;  %v10894_v4 = vadd.f32 %v4219_v1, %v3952_v38  ;;  %v11905_v1 = vshrl.u32 %v10243_v47, 16  ;;  %v11906_v9 = vshll.u32 %v10243_v47, 16 }
 0x284   : > { %v3964_v51 = vpop.f32.mrf.mxu0  ;;  %8269 = vmatprep.mubr.msk.bf16.mxu1 %vm586_vm1, %v5779_v0  ;;  %v5459_v38 = vsel %vm2486_vm6, %v5454_v11, %v5458_v15  ;;  %v5467_v0 = vrot.slane %v5465_v59, 2  ;;  %v5470_v47 = vrot.slane %v5468_v60, 3 }
 0x285   : > { %v3965_v21 = vadd.f32 %v3964_v51, %v10617_v29  ;;  %v4685_v23 = vpop.f32.mrf.mxu1  ;;  %v10902_v26 = vadd.f32 %v8047_v46, %v3973_v35  ;;  %v5460_v6 = vrot.slane %v11905_v1, 2  ;;  %v5461_v43 = vrot.slane %v11906_v9, 3  ;;  %v8434_v29 = vld [vmem:[%s11443_s5] sm:$0xff]   ;;  %v11908_v9 = vld [vmem:[#allocation13_spill] sm:$0xff] }
 0x286   : > { %v8010_v44 = vpop.f32.mrf.mxu0  ;;  %v5781_v46 = vsel %vm2844_vm7, %v5778_v49, %v5780_v62  ;;  %8279 = vmatprep.subr.bf16.mxu0 %v8434_v29  ;;  %v11907_v49 = vld [vmem:[#allocation71_spill] sm:$0xff] }
 0x287   : > { %v3976_v40 = vadd.f32 %v8010_v44, %v10624_v22  ;;  %v8092_v20 = vpop.f32.mrf.mxu1  ;;  %v10910_v55 = vadd.f32 %v4232_v32, %v3965_v21  ;;  %v5783_v22 = vsel %vm2844_vm7, %v5780_v62, %v5782_v28  ;;  %v5462_v32 = vor.u32 %v5461_v43, %v5460_v6  ;;  %8280 = vmatpush3.bf16.msra.mxu0 %v8434_v29 }
 0x288   : > { %v10915_v2 = vpop.f32.mrf.mxu0  ;;  %v5474_v11 = vshrl.u32 %v11907_v49, 16  ;;  %v5477_v59 = vshll.u32 %v11907_v49, 16  ;;  %v5471_v62 = vor.u32 %v5470_v47, %v5467_v0  ;;  %v11909_v0 = vld [vmem:[#allocation14_spill] sm:$0xff] }
 0x289   : > { %v4688_v37 = vpop.f32.mrf.mxu1  ;;  %v10920_v17 = vadd.f32 %v8048_v30, %v3976_v40  ;;  %v5784_v30 = vrot.slane %v11907_v49, 3  ;;  %v5463_v6 = vsel %vm2486_vm6, %v5458_v15, %v5462_v32  ;;  %v11910_v15 = vld [vmem:[#allocation19_spill] sm:$0xff] }
 0x28a   : > { %v8053_v25 = vpop.f32.mrf.mxu0  ;;  %8228 = vmatmul.mubr.msk.bf16.gmra.mxu0 %vm586_vm1, %v5455_v18  ;;  %v5476_v18 = vrot.slane %v5474_v11, 2  ;;  %v5472_v29 = vsel %vm2486_vm6, %v5462_v32, %v5471_v62 }
 0x28b   : > { %v4478_v35 = vadd.f32 %v8053_v25, %v10680_v5  ;;  %v8095_v51 = vpop.f32.mrf.mxu1  ;;  %8270 = vmatmul.mubr.msk.bf16.gmra.mxu1 %vm586_vm1, %v5781_v46  ;;  %8231 = vmatprep.mubr.msk.bf16.mxu0 %vm586_vm1, %v5459_v38  ;;  %v5479_v46 = vrot.slane %v5477_v59, 3  ;;  %v5785_v25 = vsel %vm2844_vm7, %v5782_v28, %v5784_v30  ;;  %v11911_v59 = vld [vmem:[#allocation6_spill] sm:$0xff] }
 0x28c   : > { %v4333_v60 = vpop.f32.mrf.mxu0  ;;  %8273 = vmatprep.mubr.msk.bf16.mxu1 %vm586_vm1, %v5783_v22 }
 0x28d   : > { %v4476_v21 = vadd.f32 %v4333_v60, %v10686_v3  ;;  %v4701_v44 = vpop.f32.mrf.mxu1  ;;  %v10931_v5 = vadd.f32 %v8091_v13, %v4478_v35 }
 0x28e   : > { %v8054_v1 = vpop.f32.mrf.mxu0 }
 0x28f   : > { %v4479_v43 = vadd.f32 %v8054_v1, %v11908_v9  ;;  %v8096_v40 = vpop.f32.mrf.mxu1  ;;  %v10935_v38 = vadd.f32 %v4685_v23, %v4476_v21  ;;  %v5480_v23 = vor.u32 %v5479_v46, %v5476_v18 }
 0x290   : > { %v4336_v22 = vpop.f32.mrf.mxu0 }
 0x291   : > { %v4477_v3 = vadd.f32 %v4336_v22, %v11909_v0  ;;  %v4704_v47 = vpop.f32.mrf.mxu1  ;;  %v10940_v13 = vadd.f32 %v8092_v20, %v4479_v43  ;;  %v5481_v9 = vsel %vm2486_vm6, %v5471_v62, %v5480_v23 }
 0x292   : > { %v8057_v35 = vpop.f32.mrf.mxu0  ;;  %8232 = vmatmul.mubr.msk.bf16.gmra.mxu0 %vm586_vm1, %v5463_v6 }
 0x293   : > { %v4482_v49 = vadd.f32 %v8057_v35, %v11910_v15  ;;  %v8099_v11 = vpop.f32.mrf.mxu1  ;;  %8274 = vmatmul.mubr.msk.bf16.gmra.mxu1 %vm586_vm1, %v5785_v25  ;;  %8235 = vmatprep.mubr.msk.bf16.mxu0 %vm586_vm1, %v5472_v29  ;;  %v10946_v28 = vadd.f32 %v4688_v37, %v4477_v3  ;;  %v11912_v29 = vld [vmem:[#allocation9_spill] sm:$0xff] }
 0x294   : > { %v4349_v32 = vpop.f32.mrf.mxu0  ;;  %8321 = vmatprep.mubr.msk.bf16.mxu1 %vm6159_vm8, %v11911_v59 }
 0x295   : > { %v4480_v20 = vadd.f32 %v4349_v32, %v10715_v58  ;;  %v4717_v60 = vpop.f32.mrf.mxu1  ;;  %v10951_v30 = vadd.f32 %v8095_v51, %v4482_v49 }
 0x296   : > { %v8058_v21 = vpop.f32.mrf.mxu0 }
 0x297   : > { %v4483_v1 = vadd.f32 %v8058_v21, %v10723_v53  ;;  %v8100_v6 = vpop.f32.mrf.mxu1  ;;  %v10955_v43 = vadd.f32 %v4701_v44, %v4480_v20  ;;  %v11913_v44 = vld [vmem:[#allocation58_spill] sm:$0xff] }
 0x298   : > { %v4352_v18 = vpop.f32.mrf.mxu0 }
 0x299   : > { %v4481_v37 = vadd.f32 %v4352_v18, %v10732_v7  ;;  %v4720_v46 = vpop.f32.mrf.mxu1  ;;  %v10958_v22 = vadd.f32 %v8096_v40, %v4483_v1 }
 0x29a   : > { %v8061_v25 = vpop.f32.mrf.mxu0  ;;  %8236 = vmatmul.mubr.msk.bf16.gmra.mxu0 %vm586_vm1, %v5481_v9 }
 0x29b   : > { %v4486_v58 = vadd.f32 %v8061_v25, %v10739_v34  ;;  %v8103_v51 = vpop.f32.mrf.mxu1  ;;  %8322 = vmatmul.mubr.msk.bf16.vlgmr.msra.gmra.mxu1 %vm6159_vm8, %v11912_v29  ;;  %v10964_v53 = vadd.f32 %v4704_v47, %v4481_v37 }
 0x29c   : > { %v4365_v62 = vpop.f32.mrf.mxu0  ;;  %8325 = vmatprep.mubr.msk.bf16.mxu1 %vm6159_vm8, %v11913_v44 }
 0x29d   : > { %v4484_v7 = vadd.f32 %v4365_v62, %v10745_v54  ;;  %v4733_v0 = vpop.f32.mrf.mxu1  ;;  %v10969_v40 = vadd.f32 %v8099_v11, %v4486_v58  ;;  %v11914_v54 = vld [vmem:[#allocation16_spill] sm:$0xff] }
 0x29e   : > { %v8062_v3 = vpop.f32.mrf.mxu0 }
 0x29f   : > { %v4487_v35 = vadd.f32 %v8062_v3, %v10753_v45  ;;  %v8104_v15 = vpop.f32.mrf.mxu1  ;;  %v10972_v34 = vadd.f32 %v4717_v60, %v4484_v7  ;;  %v11915_v45 = vld [vmem:[#allocation4_spill] sm:$0xff] }
 0x2a0   : > { %v4368_v49 = vpop.f32.mrf.mxu0 }
 0x2a1   : > { %v4485_v23 = vadd.f32 %v4368_v49, %v10759_v10  ;;  %v4736_v47 = vpop.f32.mrf.mxu1  ;;  %v10975_v32 = vadd.f32 %v8100_v6, %v4487_v35 }
 0x2a2   : > { %v8065_v59 = vpop.f32.mrf.mxu0 }
 0x2a3   : > { %v4490_v20 = vadd.f32 %v8065_v59, %v10765_v16  ;;  %v8107_v21 = vpop.f32.mrf.mxu1  ;;  %8326 = vmatmul.mubr.msk.bf16.gmra.mxu1 %vm6159_vm8, %v11914_v54  ;;  %v10980_v11 = vadd.f32 %v4720_v46, %v4485_v23 }
 0x2a4   : > { %v4381_v1 = vpop.f32.mrf.mxu0  ;;  %8329 = vmatprep.mubr.msk.bf16.mxu1 %vm6159_vm8, %v11915_v45 }
 0x2a5   : > { %v4488_v60 = vadd.f32 %v4381_v1, %v10771_v24  ;;  %v4749_v9 = vpop.f32.mrf.mxu1  ;;  %v10985_v10 = vadd.f32 %v8103_v51, %v4490_v20  ;;  %v11916_v24 = vld [vmem:[#allocation2_spill] sm:$0xff] }
 0x2a6   : > { %v8066_v6 = vpop.f32.mrf.mxu0 }
 0x2a7   : > { %v4491_v18 = vadd.f32 %v8066_v6, %v10779_v41  ;;  %v8108_v37 = vpop.f32.mrf.mxu1  ;;  %v10988_v16 = vadd.f32 %v4733_v0, %v4488_v60  ;;  %v11917_v41 = vld [vmem:[#allocation34_spill] sm:$0xff] }
 0x2a8   : > { %v4384_v25 = vpop.f32.mrf.mxu0 }
 0x2a9   : > { %v4489_v58 = vadd.f32 %v4384_v25, %v10785_v42  ;;  %v4752_v46 = vpop.f32.mrf.mxu1  ;;  %v10991_v29 = vadd.f32 %v8104_v15, %v4491_v18 }
 0x2aa   : > { %v8069_v62 = vpop.f32.mrf.mxu0 }
 0x2ab   : > { %v4494_v44 = vadd.f32 %v8069_v62, %v10794_v14  ;;  %v8111_v7 = vpop.f32.mrf.mxu1  ;;  %8330 = vmatmul.mubr.msk.bf16.gmra.mxu1 %vm6159_vm8, %v11916_v24  ;;  %v10996_v51 = vadd.f32 %v4736_v47, %v4489_v58 }
 0x2ac   : > { %v4397_v3 = vpop.f32.mrf.mxu0  ;;  %8333 = vmatprep.mubr.msk.bf16.mxu1 %vm6159_vm8, %v11917_v41 }
 0x2ad   : > { %v4492_v0 = vadd.f32 %v4397_v3, %v10800_v52  ;;  %v4765_v35 = vpop.f32.mrf.mxu1  ;;  %v11001_v42 = vadd.f32 %v8107_v21, %v4494_v44  ;;  %v11918_v52 = vld [vmem:[#allocation47_spill] sm:$0xff] }
 0x2ae   : > { %v8070_v15 = vpop.f32.mrf.mxu0 }
 0x2af   : > { %v4495_v49 = vadd.f32 %v8070_v15, %v10808_v27  ;;  %v8112_v23 = vpop.f32.mrf.mxu1  ;;  %v11004_v14 = vadd.f32 %v4749_v9, %v4492_v0  ;;  %v11919_v27 = vld [vmem:[#allocation20_spill] sm:$0xff] }
 0x2b0   : > { %v4400_v59 = vpop.f32.mrf.mxu0 }
 0x2b1   : > { %v4493_v20 = vadd.f32 %v4400_v59, %v10814_v48  ;;  %v4768_v47 = vpop.f32.mrf.mxu1  ;;  %v11007_v54 = vadd.f32 %v8108_v37, %v4495_v49 }
 0x2b2   : > { %v8073_v1 = vpop.f32.mrf.mxu0 }
 0x2b3   : > { %v4498_v45 = vadd.f32 %v8073_v1, %v10820_v50  ;;  %v8115_v60 = vpop.f32.mrf.mxu1  ;;  %8334 = vmatmul.mubr.msk.bf16.gmra.mxu1 %vm6159_vm8, %v11918_v52  ;;  %v11012_v21 = vadd.f32 %v4752_v46, %v4493_v20 }
 0x2b4   : > { %v4413_v6 = vpop.f32.mrf.mxu0  ;;  %8337 = vmatprep.mubr.msk.bf16.mxu1 %vm6159_vm8, %v11919_v27 }
 0x2b5   : > { %v4496_v9 = vadd.f32 %v4413_v6, %v10826_v36  ;;  %v4781_v18 = vpop.f32.mrf.mxu1  ;;  %v11017_v48 = vadd.f32 %v8111_v7, %v4498_v45  ;;  %v11920_v36 = vld [vmem:[#allocation3_spill] sm:$0xff] }
 0x2b6   : > { %v8074_v37 = vpop.f32.mrf.mxu0 }
 0x2b7   : > { %v4499_v25 = vadd.f32 %v8074_v37, %v10834_v57  ;;  %v8116_v58 = vpop.f32.mrf.mxu1  ;;  %v11020_v50 = vadd.f32 %v4765_v35, %v4496_v9  ;;  %v11921_v57 = vld [vmem:[#allocation64_spill] sm:$0xff] }
 0x2b8   : > { %v4416_v62 = vpop.f32.mrf.mxu0 }
 0x2b9   : > { %v4497_v44 = vadd.f32 %v4416_v62, %v10840_v39  ;;  %v4784_v46 = vpop.f32.mrf.mxu1  ;;  %v11023_v24 = vadd.f32 %v8112_v23, %v4499_v25 }
 0x2ba   : > { %v8077_v3 = vpop.f32.mrf.mxu0 }
 0x2bb   : > { %v4502_v41 = vadd.f32 %v8077_v3, %v10846_v56  ;;  %v8119_v0 = vpop.f32.mrf.mxu1  ;;  %8338 = vmatmul.mubr.msk.bf16.gmra.mxu1 %vm6159_vm8, %v11920_v36  ;;  %v11028_v7 = vadd.f32 %v4768_v47, %v4497_v44 }
 0x2bc   : > { %v4429_v15 = vpop.f32.mrf.mxu0  ;;  %8341 = vmatprep.mubr.msk.bf16.mxu1 %vm6159_vm8, %v11921_v57  ;;  %v11924_v57 = vld [vmem:[#allocation69_spill] sm:$0xff] }
 0x2bd   : > { %v4500_v35 = vadd.f32 %v4429_v15, %v10852_v61  ;;  %v4797_v49 = vpop.f32.mrf.mxu1  ;;  %v11033_v39 = vadd.f32 %v8115_v60, %v4502_v41  ;;  %v11922_v61 = vld [vmem:[#allocation63_spill] sm:$0xff] }
 0x2be   : > { %v8078_v23 = vpop.f32.mrf.mxu0 }
 0x2bf   : > { %v4503_v59 = vadd.f32 %v8078_v23, %v10860_v12  ;;  %v8120_v20 = vpop.f32.mrf.mxu1  ;;  %v11036_v56 = vadd.f32 %v4781_v18, %v4500_v35  ;;  %v11923_v12 = vld [vmem:[#allocation68_spill] sm:$0xff]  ;;  %v3968_v35 = vadd.f32 %v10915_v2, %v11924_v57  ;;  %v11925_v23 = vld [vmem:[#allocation67_spill] sm:$0xff] }
 0x2c0   : > { %v4432_v1 = vpop.f32.mrf.mxu0 }
 0x2c1   : > { %v4501_v45 = vadd.f32 %v4432_v1, %v10866_v63  ;;  %v4800_v47 = vpop.f32.mrf.mxu1  ;;  %v11039_v52 = vadd.f32 %v8116_v58, %v4503_v59  ;;  %v11926_v59 = vld [vmem:[#allocation72_spill] sm:$0xff] }
 0x2c2   : > { %v8081_v6 = vpop.f32.mrf.mxu0 }
 0x2c3   : > { %v4506_v27 = vadd.f32 %v8081_v6, %v10872_v8  ;;  %v8123_v9 = vpop.f32.mrf.mxu1  ;;  %8342 = vmatmul.mubr.msk.bf16.gmra.mxu1 %vm6159_vm8, %v11922_v61  ;;  %v11044_v60 = vadd.f32 %v4784_v46, %v4501_v45 }
 0x2c4   : > { %v4445_v37 = vpop.f32.mrf.mxu0  ;;  %8345 = vmatprep.mubr.msk.bf16.mxu1 %vm6159_vm8, %v11923_v12 }
 0x2c5   : > { %v4504_v18 = vadd.f32 %v4445_v37, %v10878_v33  ;;  %v4813_v25 = vpop.f32.mrf.mxu1  ;;  %v11049_v63 = vadd.f32 %v8119_v0, %v4506_v27 }
 0x2c6   : > { %v8082_v58 = vpop.f32.mrf.mxu0 }
 0x2c7   : > { %v4507_v62 = vadd.f32 %v8082_v58, %v10888_v31  ;;  %v8124_v44 = vpop.f32.mrf.mxu1  ;;  %v11052_v8 = vadd.f32 %v4797_v49, %v4504_v18 }
 0x2c8   : > { %v4448_v3 = vpop.f32.mrf.mxu0 }
 0x2c9   : > { %v4505_v41 = vadd.f32 %v4448_v3, %v10894_v4  ;;  %v4816_v46 = vpop.f32.mrf.mxu1  ;;  %v11055_v36 = vadd.f32 %v8120_v20, %v4507_v62  ;;  %v11927_v62 = vld [vmem:[#allocation70_spill] sm:$0xff]  ;;  %v11928_v3 = vld [vmem:[#allocation73_spill] sm:$0xff] }
 0x2ca   : > { %v8085_v15 = vpop.f32.mrf.mxu0 }
 0x2cb   : > { %v4510_v33 = vadd.f32 %v8085_v15, %v10902_v26  ;;  %v8167_v0 = vpop.f32.mrf.mxu1  ;;  %8346 = vmatmul.mubr.msk.bf16.gmra.mxu1 %vm6159_vm8, %v11925_v23  ;;  %v11062_v31 = vadd.f32 %v4800_v47, %v4505_v41  ;;  %v4280_v26 = vadd.f32 %v10885_v19, %v3968_v35 }
 0x2cc   : > { %v4461_v49 = vpop.f32.mrf.mxu0  ;;  %8349 = vmatprep.mubr.msk.bf16.mxu1 %vm6159_vm8, %v11926_v59 }
 0x2cd   : > { %v4508_v4 = vadd.f32 %v4461_v49, %v10910_v55  ;;  %v5218_v20 = vpop.f32.mrf.mxu1  ;;  %v11067_v1 = vadd.f32 %v8123_v9, %v4510_v33 }
 0x2ce   : > { %v8086_v45 = vpop.f32.mrf.mxu0 }
 0x2cf   : > { %v4511_v2 = vadd.f32 %v8086_v45, %v10920_v17  ;;  %v8168_v6 = vpop.f32.mrf.mxu1  ;;  %v11071_v27 = vadd.f32 %v4813_v25, %v4508_v4 }
 0x2d0   : > { %v4464_v61 = vpop.f32.mrf.mxu0 }
 0x2d1   : > { %v4509_v47 = vadd.f32 %v4464_v61, %v4280_v26  ;;  %v5221_v37 = vpop.f32.mrf.mxu1  ;;  %v11073_v12 = vadd.f32 %v8124_v44, %v4511_v2 }
 0x2d2   : > { %v8129_v18 = vpop.f32.mrf.mxu0 }
 0x2d3   : > { %v5134_v58 = vadd.f32 %v8129_v18, %v10931_v5  ;;  %v8171_v55 = vpop.f32.mrf.mxu1  ;;  %8350 = vmatmul.mubr.msk.bf16.gmra.mxu1 %vm6159_vm8, %v11927_v62  ;;  %v11078_v9 = vadd.f32 %v4816_v46, %v4509_v47 }
 0x2d4   : > { %v4989_v17 = vpop.f32.mrf.mxu0  ;;  %8353 = vmatprep.mubr.msk.bf16.mxu1 %vm6159_vm8, %v11928_v3 }
 0x2d5   : > { %v5132_v19 = vadd.f32 %v4989_v17, %v10935_v38  ;;  %v5234_v25 = vpop.f32.mrf.mxu1  ;;  %v11083_v41 = vadd.f32 %v8167_v0, %v5134_v58  ;;  %v11929_v38 = vld [vmem:[#allocation53_spill] sm:$0xff] }
 0x2d6   : > { %v8130_v44 = vpop.f32.mrf.mxu0 }
 0x2d7   : > { %v5135_v15 = vadd.f32 %v8130_v44, %v10940_v13  ;;  %v8172_v57 = vpop.f32.mrf.mxu1  ;;  %v11086_v5 = vadd.f32 %v5218_v20, %v5132_v19 }
 0x2d8   : > { %v4992_v35 = vpop.f32.mrf.mxu0 }
 0x2d9   : > { %v5133_v33 = vadd.f32 %v4992_v35, %v10946_v28  ;;  %v5237_v46 = vpop.f32.mrf.mxu1  ;;  %v11089_v23 = vadd.f32 %v8168_v6, %v5135_v15 }
 0x2da   : > { %v8133_v49 = vpop.f32.mrf.mxu0 }
 0x2db   : > { %v5138_v59 = vadd.f32 %v8133_v49, %v10951_v30  ;;  %v8175_v4 = vpop.f32.mrf.mxu1  ;;  %8354 = vmatmul.mubr.msk.bf16.gmra.mxu1 %vm6159_vm8, %v11929_v38  ;;  %v11094_v0 = vadd.f32 %v5221_v37, %v5133_v33 }
 0x2dc   : > { %v5005_v45 = vpop.f32.mrf.mxu0 }
 0x2dd   : > { %v5136_v13 = vadd.f32 %v5005_v45, %v10955_v43  ;;  %v5250_v20 = vpop.f32.mrf.mxu1  ;;  %v11097_v2 = vadd.f32 %v8171_v55, %v5138_v59 }
 0x2de   : > { %v8134_v26 = vpop.f32.mrf.mxu0 }
 0x2df   : > { %v5139_v28 = vadd.f32 %v8134_v26, %v10958_v22  ;;  %v8176_v6 = vpop.f32.mrf.mxu1  ;;  %v11100_v61 = vadd.f32 %v5234_v25, %v5136_v13 }
 0x2e0   : > { %v5008_v47 = vpop.f32.mrf.mxu0 }
 0x2e1   : > { %v5137_v30 = vadd.f32 %v5008_v47, %v10964_v53  ;;  %v5253_v18 = vpop.f32.mrf.mxu1  ;;  %v11103_v58 = vadd.f32 %v8172_v57, %v5139_v28 }
 0x2e2   : > { %v8137_v37 = vpop.f32.mrf.mxu0 }
 0x2e3   : > { %v5142_v62 = vadd.f32 %v8137_v37, %v10969_v40  ;;  %v8179_v17 = vpop.f32.mrf.mxu1  ;;  %v11106_v43 = vadd.f32 %v5237_v46, %v5137_v30 }
 0x2e4   : > { %v5021_v55 = vpop.f32.mrf.mxu0 }
 0x2e5   : > { %v5140_v3 = vadd.f32 %v5021_v55, %v10972_v34  ;;  %v5266_v19 = vpop.f32.mrf.mxu1  ;;  %v11109_v22 = vadd.f32 %v8175_v4, %v5142_v62 }
 0x2e6   : > { %v8138_v25 = vpop.f32.mrf.mxu0 }
 0x2e7   : > { %v5143_v44 = vadd.f32 %v8138_v25, %v10975_v32  ;;  %v8180_v15 = vpop.f32.mrf.mxu1  ;;  %v11112_v53 = vadd.f32 %v5250_v20, %v5140_v3 }
 0x2e8   : > { %v5024_v57 = vpop.f32.mrf.mxu0 }
 0x2e9   : > { %v5141_v35 = vadd.f32 %v5024_v57, %v10980_v11  ;;  %v5269_v33 = vpop.f32.mrf.mxu1  ;;  %v11115_v40 = vadd.f32 %v8176_v6, %v5143_v44 }
 0x2ea   : > { %v8141_v46 = vpop.f32.mrf.mxu0 }
 0x2eb   : > { %v5146_v49 = vadd.f32 %v8141_v46, %v10985_v10  ;;  %v8183_v59 = vpop.f32.mrf.mxu1  ;;  %v11118_v34 = vadd.f32 %v5253_v18, %v5141_v35 }
 0x2ec   : > { %v5037_v4 = vpop.f32.mrf.mxu0 }
 0x2ed   : > { %v5144_v38 = vadd.f32 %v5037_v4, %v10988_v16  ;;  %v5282_v45 = vpop.f32.mrf.mxu1  ;;  %v11121_v32 = vadd.f32 %v8179_v17, %v5146_v49 }
 0x2ee   : > { %v8142_v13 = vpop.f32.mrf.mxu0 }
 0x2ef   : > { %v5147_v20 = vadd.f32 %v8142_v13, %v10991_v29  ;;  %v8184_v26 = vpop.f32.mrf.mxu1  ;;  %v11124_v11 = vadd.f32 %v5266_v19, %v5144_v38 }
 0x2f0   : > { %v5040_v28 = vpop.f32.mrf.mxu0 }
 0x2f1   : > { %v5145_v6 = vadd.f32 %v5040_v28, %v10996_v51  ;;  %v5285_v47 = vpop.f32.mrf.mxu1  ;;  %v11127_v10 = vadd.f32 %v8180_v15, %v5147_v20 }
 0x2f2   : > { %v8145_v30 = vpop.f32.mrf.mxu0 }
 0x2f3   : > { %v5150_v18 = vadd.f32 %v8145_v30, %v11001_v42  ;;  %v8187_v37 = vpop.f32.mrf.mxu1  ;;  %v11130_v16 = vadd.f32 %v5269_v33, %v5145_v6 }
 0x2f4   : > { %v5053_v62 = vpop.f32.mrf.mxu0 }
 0x2f5   : > { %v5148_v17 = vadd.f32 %v5053_v62, %v11004_v14  ;;  %v5298_v55 = vpop.f32.mrf.mxu1  ;;  %v11133_v29 = vadd.f32 %v8183_v59, %v5150_v18 }
 0x2f6   : > { %v8146_v3 = vpop.f32.mrf.mxu0 }
 0x2f7   : > { %v5151_v19 = vadd.f32 %v8146_v3, %v11007_v54  ;;  %v8188_v25 = vpop.f32.mrf.mxu1  ;;  %v11136_v51 = vadd.f32 %v5282_v45, %v5148_v17 }
 0x2f8   : > { %v5056_v44 = vpop.f32.mrf.mxu0 }
 0x2f9   : > { %v5149_v15 = vadd.f32 %v5056_v44, %v11012_v21  ;;  %v5301_v57 = vpop.f32.mrf.mxu1  ;;  %v11139_v42 = vadd.f32 %v8184_v26, %v5151_v19 }
 0x2fa   : > { %v8149_v35 = vpop.f32.mrf.mxu0 }
 0x2fb   : > { %v5154_v33 = vadd.f32 %v8149_v35, %v11017_v48  ;;  %v8191_v46 = vpop.f32.mrf.mxu1  ;;  %v11142_v14 = vadd.f32 %v5285_v47, %v5149_v15 }
 0x2fc   : > { %v5069_v49 = vpop.f32.mrf.mxu0 }
 0x2fd   : > { %v5152_v59 = vadd.f32 %v5069_v49, %v11020_v50  ;;  %v5314_v4 = vpop.f32.mrf.mxu1  ;;  %v11145_v54 = vadd.f32 %v8187_v37, %v5154_v33 }
 0x2fe   : > { %v8150_v38 = vpop.f32.mrf.mxu0 }
 0x2ff   : > { %v5155_v45 = vadd.f32 %v8150_v38, %v11023_v24  ;;  %v8192_v13 = vpop.f32.mrf.mxu1  ;;  %v11148_v21 = vadd.f32 %v5298_v55, %v5152_v59 }
 0x300   : > { %v5072_v20 = vpop.f32.mrf.mxu0 }
 0x301   : > { %v5153_v26 = vadd.f32 %v5072_v20, %v11028_v7  ;;  %v5317_v28 = vpop.f32.mrf.mxu1  ;;  %v11151_v48 = vadd.f32 %v8188_v25, %v5155_v45 }
 0x302   : > { %v8153_v6 = vpop.f32.mrf.mxu0 }
 0x303   : > { %v5158_v47 = vadd.f32 %v8153_v6, %v11033_v39  ;;  %v8195_v30 = vpop.f32.mrf.mxu1  ;;  %v11154_v50 = vadd.f32 %v5301_v57, %v5153_v26 }
 0x304   : > { %v5085_v18 = vpop.f32.mrf.mxu0 }
 0x305   : > { %v5156_v37 = vadd.f32 %v5085_v18, %v11036_v56  ;;  %v5330_v62 = vpop.f32.mrf.mxu1  ;;  %v11157_v24 = vadd.f32 %v8191_v46, %v5158_v47 }
 0x306   : > { %v8154_v17 = vpop.f32.mrf.mxu0 }
 0x307   : > { %v5159_v55 = vadd.f32 %v8154_v17, %v11039_v52  ;;  %v8196_v3 = vpop.f32.mrf.mxu1  ;;  %v11160_v7 = vadd.f32 %v5314_v4, %v5156_v37 }
 0x308   : > { %v5088_v19 = vpop.f32.mrf.mxu0 }
 0x309   : > { %v5157_v25 = vadd.f32 %v5088_v19, %v11044_v60  ;;  %v5333_v44 = vpop.f32.mrf.mxu1  ;;  %v11163_v39 = vadd.f32 %v8192_v13, %v5159_v55 }
 0x30a   : > { %v8157_v15 = vpop.f32.mrf.mxu0 }
 0x30b   : > { %v5162_v57 = vadd.f32 %v8157_v15, %v11049_v63  ;;  %v8199_v35 = vpop.f32.mrf.mxu1  ;;  %v11166_v56 = vadd.f32 %v5317_v28, %v5157_v25 }
 0x30c   : > { %v5101_v33 = vpop.f32.mrf.mxu0 }
 0x30d   : > { %v5160_v46 = vadd.f32 %v5101_v33, %v11052_v8  ;;  %v5346_v49 = vpop.f32.mrf.mxu1  ;;  %v11169_v52 = vadd.f32 %v8195_v30, %v5162_v57 }
 0x30e   : > { %v8158_v59 = vpop.f32.mrf.mxu0 }
 0x30f   : > { %v5163_v4 = vadd.f32 %v8158_v59, %v11055_v36  ;;  %v8200_v38 = vpop.f32.mrf.mxu1  ;;  %v11172_v60 = vadd.f32 %v5330_v62, %v5160_v46 }
 0x310   : > { %v5104_v45 = vpop.f32.mrf.mxu0 }
 0x311   : > { %v5161_v13 = vadd.f32 %v5104_v45, %v11062_v31  ;;  %v5349_v20 = vpop.f32.mrf.mxu1  ;;  %v11175_v63 = vadd.f32 %v8196_v3, %v5163_v4 }
 0x312   : > { %v8161_v26 = vpop.f32.mrf.mxu0 }
 0x313   : > { %v5166_v28 = vadd.f32 %v8161_v26, %v11067_v1  ;;  %v8243_v6 = vpop.f32.mrf.mxu1  ;;  %v11178_v8 = vadd.f32 %v5333_v44, %v5161_v13 }
 0x314   : > { %v5117_v47 = vpop.f32.mrf.mxu0 }
 0x315   : > { %v5164_v30 = vadd.f32 %v5117_v47, %v11071_v27  ;;  %v5874_v18 = vpop.f32.mrf.mxu1  ;;  %v11181_v36 = vadd.f32 %v8199_v35, %v5166_v28 }
 0x316   : > { %v8162_v37 = vpop.f32.mrf.mxu0 }
 0x317   : > { %v5167_v62 = vadd.f32 %v8162_v37, %v11073_v12  ;;  %v8244_v17 = vpop.f32.mrf.mxu1  ;;  %v11184_v31 = vadd.f32 %v5346_v49, %v5164_v30 }
 0x318   : > { %v5120_v55 = vpop.f32.mrf.mxu0 }
 0x319   : > { %v5165_v3 = vadd.f32 %v5120_v55, %v11078_v9  ;;  %v5877_v19 = vpop.f32.mrf.mxu1  ;;  %v11187_v1 = vadd.f32 %v8200_v38, %v5167_v62  ;;  %v11197_v38 = vld [vmem:[%s11441_s3] ss:$0 sm:$0xff] }
 0x31a   : > { %v8205_v25 = vpop.f32.mrf.mxu0 }
 0x31b   : > { %v5715_v44 = vadd.f32 %v8205_v25, %v11083_v41  ;;  %v8247_v15 = vpop.f32.mrf.mxu1  ;;  %v11190_v27 = vadd.f32 %v5349_v20, %v5165_v3 }
 0x31c   : > { %v5570_v57 = vpop.f32.mrf.mxu0 }
 0x31d   : > { %v6019_v35 = vadd.f32 %v8243_v6, %v5715_v44  ;;  %v5713_v33 = vadd.f32 %v5570_v57, %v11086_v5  ;;  %v5890_v12 = vpop.f32.mrf.mxu1 }
 0x31e   : > { %v8206_v46 = vpop.f32.mrf.mxu0 }
 0x31f   : > { %v6017_v49 = vadd.f32 %v5874_v18, %v5713_v33  ;;  %v5716_v59 = vadd.f32 %v8206_v46, %v11089_v23  ;;  %v8248_v4 = vpop.f32.mrf.mxu1  ;;  %v6055_v41 = vadd.f32 %v11197_v38, %v6019_v35 }
 0x320   : > { %v5573_v9 = vpop.f32.mrf.mxu0 }
 0x321   : > { %v6020_v45 = vadd.f32 %v8244_v17, %v5716_v59  ;;  %v5714_v13 = vadd.f32 %v5573_v9, %v11094_v0  ;;  %v5893_v20 = vpop.f32.mrf.mxu1  ;;  %v6053_v5 = vadd.f32 %v11197_v38, %v6017_v49  ;;  %v6091_v18 = vmax.f32 %v6055_v41, 0.0 }
 0x322   : > { %v8209_v26 = vpop.f32.mrf.mxu0 }
 0x323   : > { %v6056_v28 = vadd.f32 %v11197_v38, %v6020_v45  ;;  %v6018_v6 = vadd.f32 %v5877_v19, %v5714_v13  ;;  %v5719_v23 = vadd.f32 %v8209_v26, %v11097_v2  ;;  %v8251_v47 = vpop.f32.mrf.mxu1  ;;  %v6089_v25 = vmax.f32 %v6053_v5, 0.0 }
 0x324   : > { %v5586_v30 = vpop.f32.mrf.mxu0 }
 0x325   : > { %v6092_v37 = vmax.f32 %v6056_v28, 0.0  ;;  %v6054_v62 = vadd.f32 %v11197_v38, %v6018_v6  ;;  %v5717_v55 = vadd.f32 %v5586_v30, %v11100_v61  ;;  %v5906_v17 = vpop.f32.mrf.mxu1  ;;  %v6023_v3 = vadd.f32 %v8247_v15, %v5719_v23 }
 0x326   : > { %v8210_v0 = vpop.f32.mrf.mxu0 }
 0x327   : > { %v6126_v44 = vpack.c.bf16 %v6092_v37, %v6091_v18  ;;  %v6090_v57 = vmax.f32 %v6054_v62, 0.0  ;;  %v6021_v35 = vadd.f32 %v5890_v12, %v5717_v55  ;;  %v8252_v33 = vpop.f32.mrf.mxu1  ;;  %v5720_v19 = vadd.f32 %v8210_v0, %v11103_v58 }
 0x328   : > { %v5589_v46 = vpop.f32.mrf.mxu0  ;;  %v6059_v9 = vadd.f32 %v11197_v38, %v6023_v3 }
 0x329   : > { %v6125_v2 = vpack.c.bf16 %v6090_v57, %v6089_v25  ;;  %v5718_v49 = vadd.f32 %v5589_v46, %v11106_v43  ;;  %v5909_v59 = vpop.f32.mrf.mxu1  ;;  %v6024_v41 = vadd.f32 %v8248_v4, %v5720_v19  ;;  %v6057_v61 = vadd.f32 %v11197_v38, %v6021_v35 }
 0x32a   : > { %v8213_v45 = vpop.f32.mrf.mxu0  ;;  %v6095_v6 = vmax.f32 %v6059_v9, 0.0 }
 0x32b   : > { %v6022_v15 = vadd.f32 %v5893_v20, %v5718_v49  ;;  %v5723_v13 = vadd.f32 %v8213_v45, %v11109_v22  ;;  %v8255_v26 = vpop.f32.mrf.mxu1  ;;  %8281 = vmatprep.mubr.msk.bf16.mxu0 %vm6159_vm8, %v6125_v2  ;;  %v6060_v12 = vadd.f32 %v11197_v38, %v6024_v41  ;;  %v6093_v20 = vmax.f32 %v6057_v61, 0.0 }
 0x32c   : > { %v5602_v58 = vpop.f32.mrf.mxu0  ;;  %8282 = vmatmul.mubr.msk.bf16.vlgmr.msra.gmra.mxu0 %vm6159_vm8, %v6126_v44 }
 0x32d   : > { %v6058_v43 = vadd.f32 %v11197_v38, %v6022_v15  ;;  %v6027_v5 = vadd.f32 %v8251_v47, %v5723_v13  ;;  %v5721_v28 = vadd.f32 %v5602_v58, %v11112_v53  ;;  %v5922_v4 = vpop.f32.mrf.mxu1  ;;  %v6096_v23 = vmax.f32 %v6060_v12, 0.0 }
 0x32e   : > { %v8214_v30 = vpop.f32.mrf.mxu0 }
 0x32f   : > { %v6094_v18 = vmax.f32 %v6058_v43, 0.0  ;;  %v5724_v22 = vadd.f32 %v8214_v30, %v11115_v40  ;;  %v8256_v37 = vpop.f32.mrf.mxu1  ;;  %v6128_v62 = vpack.c.bf16 %v6096_v23, %v6095_v6  ;;  %v6025_v55 = vadd.f32 %v5906_v17, %v5721_v28 }
 0x330   : > { %v5605_v3 = vpop.f32.mrf.mxu0  ;;  %v6063_v25 = vadd.f32 %v11197_v38, %v6027_v5 }
 0x331   : > { %v6127_v0 = vpack.c.bf16 %v6094_v18, %v6093_v20  ;;  %v6028_v44 = vadd.f32 %v8252_v33, %v5724_v22  ;;  %v5925_v57 = vpop.f32.mrf.mxu1  ;;  %v5722_v47 = vadd.f32 %v5605_v3, %v11118_v34  ;;  %v6061_v40 = vadd.f32 %v11197_v38, %v6025_v55 }
 0x332   : > { %v8217_v53 = vpop.f32.mrf.mxu0  ;;  %v6099_v49 = vmax.f32 %v6063_v25, 0.0 }
 0x333   : > { %v6064_v35 = vadd.f32 %v11197_v38, %v6028_v44  ;;  %v5727_v19 = vadd.f32 %v8217_v53, %v11121_v32  ;;  %v8259_v46 = vpop.f32.mrf.mxu1  ;;  %8285 = vmatprep.mubr.msk.bf16.mxu0 %vm6159_vm8, %v6127_v0  ;;  %v6026_v2 = vadd.f32 %v5909_v59, %v5722_v47  ;;  %v6097_v58 = vmax.f32 %v6061_v40, 0.0 }
 0x334   : > { %v5618_v17 = vpop.f32.mrf.mxu0  ;;  %8286 = vmatmul.mubr.msk.bf16.gmra.mxu0 %vm6159_vm8, %v6128_v62 }
 0x335   : > { %v6100_v9 = vmax.f32 %v6064_v35, 0.0  ;;  %v6031_v33 = vadd.f32 %v8255_v26, %v5727_v19  ;;  %v5725_v41 = vadd.f32 %v5618_v17, %v11124_v11  ;;  %v5938_v34 = vpop.f32.mrf.mxu1  ;;  %v6062_v45 = vadd.f32 %v11197_v38, %v6026_v2 }
 0x336   : > { %v8218_v61 = vpop.f32.mrf.mxu0 }
 0x337   : > { %v6130_v15 = vpack.c.bf16 %v6100_v9, %v6099_v49  ;;  %v6029_v32 = vadd.f32 %v5922_v4, %v5725_v41  ;;  %v5728_v13 = vadd.f32 %v8218_v61, %v11127_v10  ;;  %v8260_v12 = vpop.f32.mrf.mxu1  ;;  %v6098_v43 = vmax.f32 %v6062_v45, 0.0 }
 0x338   : > { %v5621_v59 = vpop.f32.mrf.mxu0  ;;  %v6067_v5 = vadd.f32 %v11197_v38, %v6031_v33 }
 0x339   : > { %v6032_v28 = vadd.f32 %v8256_v37, %v5728_v13  ;;  %v5726_v6 = vadd.f32 %v5621_v59, %v11130_v16  ;;  %v5941_v26 = vpop.f32.mrf.mxu1  ;;  %v6129_v23 = vpack.c.bf16 %v6098_v43, %v6097_v58  ;;  %v6065_v30 = vadd.f32 %v11197_v38, %v6029_v32 }
 0x33a   : > { %v8221_v11 = vpop.f32.mrf.mxu0  ;;  %v6103_v62 = vmax.f32 %v6067_v5, 0.0 }
 0x33b   : > { %v6068_v20 = vadd.f32 %v11197_v38, %v6032_v28  ;;  %v6030_v18 = vadd.f32 %v5925_v57, %v5726_v6  ;;  %v5731_v4 = vadd.f32 %v8221_v11, %v11133_v29  ;;  %v8263_v10 = vpop.f32.mrf.mxu1  ;;  %8289 = vmatprep.mubr.msk.bf16.mxu0 %vm6159_vm8, %v6129_v23  ;;  %v6101_v44 = vmax.f32 %v6065_v30, 0.0 }
 0x33c   : > { %v5634_v22 = vpop.f32.mrf.mxu0  ;;  %8290 = vmatmul.mubr.msk.bf16.gmra.mxu0 %vm6159_vm8, %v6130_v15 }
 0x33d   : > { %v6104_v55 = vmax.f32 %v6068_v20, 0.0  ;;  %v6066_v37 = vadd.f32 %v11197_v38, %v6030_v18  ;;  %v5729_v16 = vadd.f32 %v5634_v22, %v11136_v51  ;;  %v5954_v3 = vpop.f32.mrf.mxu1  ;;  %v6035_v0 = vadd.f32 %v8259_v46, %v5731_v4 }
 0x33e   : > { %v8222_v25 = vpop.f32.mrf.mxu0 }
 0x33f   : > { %v6132_v47 = vpack.c.bf16 %v6104_v55, %v6103_v62  ;;  %v6102_v57 = vmax.f32 %v6066_v37, 0.0  ;;  %v6033_v53 = vadd.f32 %v5938_v34, %v5729_v16  ;;  %v8264_v29 = vpop.f32.mrf.mxu1  ;;  %v5732_v35 = vadd.f32 %v8222_v25, %v11139_v42 }
 0x340   : > { %v5637_v19 = vpop.f32.mrf.mxu0  ;;  %v6071_v49 = vadd.f32 %v11197_v38, %v6035_v0 }
 0x341   : > { %v6131_v40 = vpack.c.bf16 %v6102_v57, %v6101_v44  ;;  %v5730_v2 = vadd.f32 %v5637_v19, %v11142_v14  ;;  %v5957_v17 = vpop.f32.mrf.mxu1  ;;  %v6036_v51 = vadd.f32 %v8260_v12, %v5732_v35  ;;  %v6069_v33 = vadd.f32 %v11197_v38, %v6033_v53 }
 0x342   : > { %v8225_v9 = vpop.f32.mrf.mxu0  ;;  %v6107_v13 = vmax.f32 %v6071_v49, 0.0 }
 0x343   : > { %v6034_v46 = vadd.f32 %v5941_v26, %v5730_v2  ;;  %v5735_v41 = vadd.f32 %v8225_v9, %v11145_v54  ;;  %v8267_v45 = vpop.f32.mrf.mxu1  ;;  %8293 = vmatprep.mubr.msk.bf16.mxu0 %vm6159_vm8, %v6131_v40  ;;  %v6072_v34 = vadd.f32 %v11197_v38, %v6036_v51  ;;  %v6105_v43 = vmax.f32 %v6069_v33, 0.0 }
 0x344   : > { %v5650_v42 = vpop.f32.mrf.mxu0  ;;  %8294 = vmatmul.mubr.msk.bf16.gmra.mxu0 %vm6159_vm8, %v6132_v47 }
 0x345   : > { %v6070_v61 = vadd.f32 %v11197_v38, %v6034_v46  ;;  %v6039_v15 = vadd.f32 %v8263_v10, %v5735_v41  ;;  %v5733_v14 = vadd.f32 %v5650_v42, %v11148_v21  ;;  %v5970_v32 = vpop.f32.mrf.mxu1  ;;  %v6108_v12 = vmax.f32 %v6072_v34, 0.0 }
 0x346   : > { %v8226_v58 = vpop.f32.mrf.mxu0 }
 0x347   : > { %v6106_v59 = vmax.f32 %v6070_v61, 0.0  ;;  %v5736_v54 = vadd.f32 %v8226_v58, %v11151_v48  ;;  %v8268_v5 = vpop.f32.mrf.mxu1  ;;  %v6134_v28 = vpack.c.bf16 %v6108_v12, %v6107_v13  ;;  %v6037_v6 = vadd.f32 %v5954_v3, %v5733_v14 }
 0x348   : > { %v5653_v26 = vpop.f32.mrf.mxu0  ;;  %v6075_v11 = vadd.f32 %v11197_v38, %v6039_v15 }
 0x349   : > { %v6133_v23 = vpack.c.bf16 %v6106_v59, %v6105_v43  ;;  %v6040_v30 = vadd.f32 %v8264_v29, %v5736_v54  ;;  %v5973_v20 = vpop.f32.mrf.mxu1  ;;  %v5734_v21 = vadd.f32 %v5653_v26, %v11154_v50  ;;  %v6073_v48 = vadd.f32 %v11197_v38, %v6037_v6 }
 0x34a   : > { %v8229_v18 = vpop.f32.mrf.mxu0  ;;  %v6111_v37 = vmax.f32 %v6075_v11, 0.0 }
 0x34b   : > { %v6076_v4 = vadd.f32 %v11197_v38, %v6040_v30  ;;  %v5739_v10 = vadd.f32 %v8229_v18, %v11157_v24  ;;  %v8271_v22 = vpop.f32.mrf.mxu1  ;;  %8297 = vmatprep.mubr.msk.bf16.mxu0 %vm6159_vm8, %v6133_v23  ;;  %v6038_v62 = vadd.f32 %v5957_v17, %v5734_v21  ;;  %v6109_v29 = vmax.f32 %v6073_v48, 0.0 }
 0x34c   : > { %v5666_v55 = vpop.f32.mrf.mxu0  ;;  %8298 = vmatmul.mubr.msk.bf16.gmra.mxu0 %vm6159_vm8, %v6134_v28 }
 0x34d   : > { %v6112_v16 = vmax.f32 %v6076_v4, 0.0  ;;  %v6043_v3 = vadd.f32 %v8267_v45, %v5739_v10  ;;  %v5737_v0 = vadd.f32 %v5666_v55, %v11160_v7  ;;  %v5986_v50 = vpop.f32.mrf.mxu1  ;;  %v6074_v25 = vadd.f32 %v11197_v38, %v6038_v62 }
 0x34e   : > { %v8230_v44 = vpop.f32.mrf.mxu0 }
 0x34f   : > { %v6136_v47 = vpack.c.bf16 %v6112_v16, %v6111_v37  ;;  %v6041_v24 = vadd.f32 %v5970_v32, %v5737_v0  ;;  %v5740_v57 = vadd.f32 %v8230_v44, %v11163_v39  ;;  %v8272_v53 = vpop.f32.mrf.mxu1  ;;  %v6110_v35 = vmax.f32 %v6074_v25, 0.0 }
 0x350   : > { %v5669_v19 = vpop.f32.mrf.mxu0  ;;  %v6079_v40 = vadd.f32 %v11197_v38, %v6043_v3 }
 0x351   : > { %v6044_v2 = vadd.f32 %v8268_v5, %v5740_v57  ;;  %v5738_v17 = vadd.f32 %v5669_v19, %v11166_v56  ;;  %v6135_v7 = vpack.c.bf16 %v6110_v35, %v6109_v29  ;;  %v6077_v51 = vadd.f32 %v11197_v38, %v6041_v24  ;;  %v5989_v46 = vpop.f32.mrf.mxu1 }
 0x352   : > { %v8233_v49 = vpop.f32.mrf.mxu0  ;;  %v6115_v45 = vmax.f32 %v6079_v40, 0.0 }
 0x353   : > { %v6080_v9 = vadd.f32 %v11197_v38, %v6044_v2  ;;  %v6042_v33 = vadd.f32 %v5973_v20, %v5738_v17  ;;  %v5743_v41 = vadd.f32 %v8233_v49, %v11169_v52  ;;  %8301 = vmatprep.mubr.msk.bf16.mxu0 %vm6159_vm8, %v6135_v7  ;;  %v6113_v14 = vmax.f32 %v6077_v51, 0.0  ;;  %v8275_v12 = vpop.f32.mrf.mxu1 }
 0x354   : > { %v5682_v39 = vpop.f32.mrf.mxu0  ;;  %8302 = vmatmul.mubr.msk.bf16.gmra.mxu0 %vm6159_vm8, %v6136_v47 }
 0x355   : > { %v6116_v34 = vmax.f32 %v6080_v9, 0.0  ;;  %v6078_v42 = vadd.f32 %v11197_v38, %v6042_v33  ;;  %v5741_v61 = vadd.f32 %v5682_v39, %v11172_v60  ;;  %v6047_v56 = vadd.f32 %v8271_v22, %v5743_v41  ;;  %v6002_v26 = vpop.f32.mrf.mxu1 }
 0x356   : > { %v8234_v15 = vpop.f32.mrf.mxu0 }
 0x357   : > { %v6138_v32 = vpack.c.bf16 %v6116_v34, %v6115_v45  ;;  %v6114_v13 = vmax.f32 %v6078_v42, 0.0  ;;  %v6045_v58 = vadd.f32 %v5986_v50, %v5741_v61  ;;  %v5744_v52 = vadd.f32 %v8234_v15, %v11175_v63  ;;  %v8276_v48 = vpop.f32.mrf.mxu1 }
 0x358   : > { %v5685_v43 = vpop.f32.mrf.mxu0  ;;  %v6083_v5 = vadd.f32 %v11197_v38, %v6047_v56 }
 0x359   : > { %v6137_v59 = vpack.c.bf16 %v6114_v13, %v6113_v14  ;;  %v5742_v54 = vadd.f32 %v5685_v43, %v11178_v8  ;;  %v6048_v28 = vadd.f32 %v8272_v53, %v5744_v52  ;;  %v6081_v60 = vadd.f32 %v11197_v38, %v6045_v58 }
 0x35a   : > { %v8237_v6 = vpop.f32.mrf.mxu0  ;;  %v6119_v18 = vmax.f32 %v6083_v5, 0.0 }
 0x35b   : > { %v6046_v23 = vadd.f32 %v5989_v46, %v5742_v54  ;;  %v5747_v11 = vadd.f32 %v8237_v6, %v11181_v36  ;;  %8305 = vmatprep.mubr.msk.bf16.mxu0 %vm6159_vm8, %v6137_v59  ;;  %v6084_v30 = vadd.f32 %v11197_v38, %v6048_v28  ;;  %v6117_v22 = vmax.f32 %v6081_v60, 0.0 }
 0x35c   : > { %v5698_v20 = vpop.f32.mrf.mxu0  ;;  %8306 = vmatmul.mubr.msk.bf16.gmra.mxu0 %vm6159_vm8, %v6138_v32  ;;  %v11302_v32 = vld [vmem:[%s11444_s6] ss:$0 sm:$0xff] }
 0x35d   : > { %v6082_v63 = vadd.f32 %v11197_v38, %v6046_v23  ;;  %v6051_v21 = vadd.f32 %v8275_v12, %v5747_v11  ;;  %v5745_v8 = vadd.f32 %v5698_v20, %v11184_v31  ;;  %v6120_v4 = vmax.f32 %v6084_v30, 0.0  ;;  %v6005_v31 = vpop.f32.mrf.mxu1 }
 0x35e   : > { %v8238_v10 = vpop.f32.mrf.mxu0 }
 0x35f   : > { %v6118_v62 = vmax.f32 %v6082_v63, 0.0  ;;  %v5748_v36 = vadd.f32 %v8238_v10, %v11187_v1  ;;  %v6140_v55 = vpack.c.bf16 %v6120_v4, %v6119_v18  ;;  %v6049_v37 = vadd.f32 %v6002_v26, %v5745_v8 }
 0x360   : > { %v5701_v16 = vpop.f32.mrf.mxu0  ;;  %v6087_v0 = vadd.f32 %v11197_v38, %v6051_v21 }
 0x361   : > { %v6139_v3 = vpack.c.bf16 %v6118_v62, %v6117_v22  ;;  %v6052_v50 = vadd.f32 %v8276_v48, %v5748_v36  ;;  %v5746_v25 = vadd.f32 %v5701_v16, %v11190_v27  ;;  %v6085_v47 = vadd.f32 %v11197_v38, %v6049_v37  ;;  %v8323_v27 = vpop.f32.mrf.mxu1 }
 0x362   : > { %v6123_v57 = vmax.f32 %v6087_v0, 0.0 }
 0x363   : > { %v6088_v44 = vadd.f32 %v11197_v38, %v6052_v50  ;;  %8309 = vmatprep.mubr.msk.bf16.mxu0 %vm6159_vm8, %v6139_v3  ;;  %v6050_v24 = vadd.f32 %v6005_v31, %v5746_v25  ;;  %v6121_v35 = vmax.f32 %v6085_v47, 0.0  ;;  %v6491_v2 = vpop.f32.mrf.mxu1 }
 0x364   : > { %8310 = vmatmul.mubr.msk.bf16.gmra.mxu0 %vm6159_vm8, %v6140_v55 }
 0x365   : > { %v6124_v53 = vmax.f32 %v6088_v44, 0.0  ;;  %v6086_v1 = vadd.f32 %v11197_v38, %v6050_v24  ;;  %v8324_v17 = vpop.f32.mrf.mxu1 }
 0x367   : > { %v6142_v29 = vpack.c.bf16 %v6124_v53, %v6123_v57  ;;  %v6122_v19 = vmax.f32 %v6086_v1, 0.0  ;;  %v6494_v7 = vpop.f32.mrf.mxu1 }
 0x369   : > { %v6141_v40 = vpack.c.bf16 %v6122_v19, %v6121_v35  ;;  %v8327_v49 = vpop.f32.mrf.mxu1 }
 0x36b   : > { %8313 = vmatprep.mubr.msk.bf16.mxu0 %vm6159_vm8, %v6141_v40  ;;  %v6507_v51 = vpop.f32.mrf.mxu1 }
 0x36c   : > { %8314 = vmatmul.mubr.msk.bf16.gmra.mxu0 %vm6159_vm8, %v6142_v29 }
 0x36d   : > { %v8328_v9 = vpop.f32.mrf.mxu1 }
 0x36f   : > { %v6510_v33 = vpop.f32.mrf.mxu1 }
 0x371   : > { %v8331_v46 = vpop.f32.mrf.mxu1 }
 0x373   : > { %v6523_v41 = vpop.f32.mrf.mxu1 }
 0x375   : > { %v8332_v38 = vpop.f32.mrf.mxu1 }
 0x377   : > { %v6526_v39 = vpop.f32.mrf.mxu1 }
 0x379   : > { %v11286_v45 = vpop.f32.mrf.mxu1 }
 0x37b   : > { %v11288_v34 = vpop.f32.mrf.mxu1 }
 0x37d   : > { %v11290_v42 = vpop.f32.mrf.mxu1 }
 0x37f   : > { %v11292_v61 = vpop.f32.mrf.mxu1 }
 0x381   : > { %v11294_v56 = vpop.f32.mrf.mxu1 }
 0x383   : > { %v11297_v15 = vpop.f32.mrf.mxu1 }
 0x385   : > { %v11309_v58 = vpop.f32.mrf.mxu1 }
 0x387   : > { %v11315_v6 = vpop.f32.mrf.mxu1 }
 0x389   : > { %v11323_v63 = vpop.f32.mrf.mxu1 }
 0x38b   : > { %v11331_v48 = vpop.f32.mrf.mxu1 }
 0x38d   : > { %v8344_v3 = vpop.f32.mrf.mxu1 }
 0x38f   : > { %v6574_v24 = vpop.f32.mrf.mxu1 }
 0x391   : > { %v8347_v40 = vpop.f32.mrf.mxu1 }
 0x3ec   : > { %v8283_v14 = vpop.f32.mrf.mxu0 }
 0x3ed   : > { %v6500_v13 = vadd.f32 %v8323_v27, %v8283_v14 }
 0x3ee   : > { %v6248_v12 = vpop.f32.mrf.mxu0 }
 0x3ef   : > { %v6643_v52 = vadd.f32 %v11302_v32, %v6500_v13  ;;  %v6492_v43 = vadd.f32 %v6491_v2, %v6248_v12 }
 0x3f0   : > { %v8284_v59 = vpop.f32.mrf.mxu0 }
 0x3f1   : > { %6680 = vst.msk [vmem:[%s11307_s19 + $0x10] sm:$0xff] %vm6677_vm9, %v6643_v52  ;;  %v6641_v54 = vadd.f32 %v11302_v32, %v6492_v43  ;;  %v6503_v5 = vadd.f32 %v8324_v17, %v8284_v59 }
 0x3f2   : > { %v6251_v28 = vpop.f32.mrf.mxu0 }
 0x3f3   : > { %6678 = vst.msk [vmem:[%s11307_s19] sm:$0xff] %vm6677_vm9, %v6641_v54  ;;  %v6644_v60 = vadd.f32 %v11302_v32, %v6503_v5  ;;  %v6495_v26 = vadd.f32 %v6494_v7, %v6251_v28 }
 0x3f4   : > { %v8287_v23 = vpop.f32.mrf.mxu0 }
 0x3f5   : > { %6681 = vst.msk [vmem:[%s11307_s19 + $0x18] sm:$0xff] %vm6677_vm9, %v6644_v60  ;;  %v6642_v11 = vadd.f32 %v11302_v32, %v6495_v26  ;;  %v6516_v30 = vadd.f32 %v8327_v49, %v8287_v23 }
 0x3f6   : > { %v6264_v20 = vpop.f32.mrf.mxu0 }
 0x3f7   : > { %6679 = vst.msk [vmem:[%s11307_s19 + $0x8] sm:$0xff] %vm6677_vm9, %v6642_v11  ;;  %v6647_v21 = vadd.f32 %v11302_v32, %v6516_v30  ;;  %v6508_v8 = vadd.f32 %v6507_v51, %v6264_v20 }
 0x3f8   : > { %v8288_v18 = vpop.f32.mrf.mxu0 }
 0x3f9   : > { %6684 = vst.msk [vmem:[%s11307_s19 + $0x30] sm:$0xff] %vm6677_vm9, %v6647_v21  ;;  %v6645_v4 = vadd.f32 %v11302_v32, %v6508_v8  ;;  %v6519_v10 = vadd.f32 %v8328_v9, %v8288_v18  ;;  %v6587_v9 = vpop.f32.mrf.mxu1 }
 0x3fa   : > { %v6267_v22 = vpop.f32.mrf.mxu0 }
 0x3fb   : > { %6682 = vst.msk [vmem:[%s11307_s19 + $0x20] sm:$0xff] %vm6677_vm9, %v6645_v4  ;;  %v6648_v62 = vadd.f32 %v11302_v32, %v6519_v10  ;;  %v6511_v36 = vadd.f32 %v6510_v33, %v6267_v22 }
 0x3fc   : > { %v8291_v37 = vpop.f32.mrf.mxu0 }
 0x3fd   : > { %6685 = vst.msk [vmem:[%s11307_s19 + $0x38] sm:$0xff] %vm6677_vm9, %v6648_v62  ;;  %v6646_v55 = vadd.f32 %v11302_v32, %v6511_v36  ;;  %v6532_v16 = vadd.f32 %v8331_v46, %v8291_v37 }
 0x3fe   : > { %v6280_v0 = vpop.f32.mrf.mxu0 }
 0x3ff   : > { %6683 = vst.msk [vmem:[%s11307_s19 + $0x28] sm:$0xff] %vm6677_vm9, %v6646_v55  ;;  %v6651_v50 = vadd.f32 %v11302_v32, %v6532_v16  ;;  %v6524_v25 = vadd.f32 %v6523_v41, %v6280_v0 }
 0x400   : > { %v8292_v31 = vpop.f32.mrf.mxu0 }
 0x401   : > { %6688 = vst.msk [vmem:[%s11307_s19 + $0x50] sm:$0xff] %vm6677_vm9, %v6651_v50  ;;  %v6649_v44 = vadd.f32 %v11302_v32, %v6524_v25  ;;  %v6535_v47 = vadd.f32 %v8332_v38, %v8292_v31 }
 0x402   : > { %v6283_v57 = vpop.f32.mrf.mxu0 }
 0x403   : > { %6686 = vst.msk [vmem:[%s11307_s19 + $0x40] sm:$0xff] %vm6677_vm9, %v6649_v44  ;;  %v6652_v53 = vadd.f32 %v11302_v32, %v6535_v47  ;;  %v6527_v1 = vadd.f32 %v6526_v39, %v6283_v57 }
 0x404   : > { %v8295_v29 = vpop.f32.mrf.mxu0 }
 0x405   : > { %6689 = vst.msk [vmem:[%s11307_s19 + $0x58] sm:$0xff] %vm6677_vm9, %v6652_v53  ;;  %v6650_v35 = vadd.f32 %v11302_v32, %v6527_v1  ;;  %v6548_v19 = vadd.f32 %v11286_v45, %v8295_v29 }
 0x406   : > { %v6296_v27 = vpop.f32.mrf.mxu0 }
 0x407   : > { %6687 = vst.msk [vmem:[%s11307_s19 + $0x48] sm:$0xff] %vm6677_vm9, %v6650_v35  ;;  %v6655_v2 = vadd.f32 %v11302_v32, %v6548_v19  ;;  %v6540_v17 = vadd.f32 %v11288_v34, %v6296_v27  ;;  %v8348_v34 = vpop.f32.mrf.mxu1 }
 0x408   : > { %v8296_v7 = vpop.f32.mrf.mxu0 }
 0x409   : > { %6692 = vst.msk [vmem:[%s11307_s19 + $0x70] sm:$0xff] %vm6677_vm9, %v6655_v2  ;;  %v6653_v49 = vadd.f32 %v11302_v32, %v6540_v17  ;;  %v6551_v51 = vadd.f32 %v11290_v42, %v8296_v7  ;;  %v6590_v43 = vpop.f32.mrf.mxu1 }
 0x40a   : > { %v6299_v33 = vpop.f32.mrf.mxu0 }
 0x40b   : > { %6690 = vst.msk [vmem:[%s11307_s19 + $0x60] sm:$0xff] %vm6677_vm9, %v6653_v49  ;;  %v6656_v46 = vadd.f32 %v11302_v32, %v6551_v51  ;;  %v6543_v41 = vadd.f32 %v11292_v61, %v6299_v33  ;;  %v8351_v60 = vpop.f32.mrf.mxu1 }
 0x40c   : > { %v8299_v38 = vpop.f32.mrf.mxu0 }
 0x40d   : > { %6693 = vst.msk [vmem:[%s11307_s19 + $0x78] sm:$0xff] %vm6677_vm9, %v6656_v46  ;;  %v6654_v39 = vadd.f32 %v11302_v32, %v6543_v41  ;;  %v6564_v45 = vadd.f32 %v11294_v56, %v8299_v38  ;;  %v6603_v20 = vpop.f32.mrf.mxu1 }
 0x40e   : > { %v6312_v42 = vpop.f32.mrf.mxu0 }
 0x40f   : > { %6691 = vst.msk [vmem:[%s11307_s19 + $0x68] sm:$0xff] %vm6677_vm9, %v6654_v39  ;;  %v6659_v14 = vadd.f32 %v11302_v32, %v6564_v45  ;;  %v6556_v13 = vadd.f32 %v11297_v15, %v6312_v42  ;;  %v8352_v22 = vpop.f32.mrf.mxu1 }
 0x410   : > { %v8300_v12 = vpop.f32.mrf.mxu0 }
 0x411   : > { %6696 = vst.msk [vmem:[%s11307_s19 + $0x90] sm:$0xff] %vm6677_vm9, %v6659_v14  ;;  %v6657_v61 = vadd.f32 %v11302_v32, %v6556_v13  ;;  %v6567_v52 = vadd.f32 %v11309_v58, %v8300_v12 }
 0x412   : > { %v6315_v56 = vpop.f32.mrf.mxu0 }
 0x413   : > { %6694 = vst.msk [vmem:[%s11307_s19 + $0x80] sm:$0xff] %vm6677_vm9, %v6657_v61  ;;  %v6660_v59 = vadd.f32 %v11302_v32, %v6567_v52  ;;  %v6559_v54 = vadd.f32 %v11315_v6, %v6315_v56 }
 0x414   : > { %v8303_v5 = vpop.f32.mrf.mxu0 }
 0x415   : > { %6697 = vst.msk [vmem:[%s11307_s19 + $0x98] sm:$0xff] %vm6677_vm9, %v6660_v59  ;;  %v6658_v15 = vadd.f32 %v11302_v32, %v6559_v54  ;;  %v6580_v28 = vadd.f32 %v11323_v63, %v8303_v5 }
 0x416   : > { %v6328_v58 = vpop.f32.mrf.mxu0 }
 0x417   : > { %6695 = vst.msk [vmem:[%s11307_s19 + $0x88] sm:$0xff] %vm6677_vm9, %v6658_v15  ;;  %v6663_v26 = vadd.f32 %v11302_v32, %v6580_v28  ;;  %v6572_v23 = vadd.f32 %v11331_v48, %v6328_v58 }
 0x418   : > { %v8304_v11 = vpop.f32.mrf.mxu0 }
 0x419   : > { %6700 = vst.msk [vmem:[%s11307_s19 + $0xb0] sm:$0xff] %vm6677_vm9, %v6663_v26  ;;  %v6661_v6 = vadd.f32 %v11302_v32, %v6572_v23  ;;  %v6583_v30 = vadd.f32 %v8344_v3, %v8304_v11  ;;  %v6606_v3 = vpop.f32.mrf.mxu1 }
 0x41a   : > { %v6331_v21 = vpop.f32.mrf.mxu0 }
 0x41b   : > { %6698 = vst.msk [vmem:[%s11307_s19 + $0xa0] sm:$0xff] %vm6677_vm9, %v6661_v6  ;;  %v6664_v63 = vadd.f32 %v11302_v32, %v6583_v30  ;;  %v6575_v8 = vadd.f32 %v6574_v24, %v6331_v21  ;;  %v8355_v24 = vpop.f32.mrf.mxu1 }
 0x41c   : > { %v8307_v18 = vpop.f32.mrf.mxu0 }
 0x41d   : > { %6701 = vst.msk [vmem:[%s11307_s19 + $0xb8] sm:$0xff] %vm6677_vm9, %v6664_v63  ;;  %v6662_v4 = vadd.f32 %v11302_v32, %v6575_v8  ;;  %v6596_v10 = vadd.f32 %v8347_v40, %v8307_v18  ;;  %v6619_v40 = vpop.f32.mrf.mxu1 }
 0x41e   : > { %v6344_v48 = vpop.f32.mrf.mxu0 }
 0x41f   : > { %6699 = vst.msk [vmem:[%s11307_s19 + $0xa8] sm:$0xff] %vm6677_vm9, %v6662_v4  ;;  %v6667_v62 = vadd.f32 %v11302_v32, %v6596_v10  ;;  %v6588_v36 = vadd.f32 %v6587_v9, %v6344_v48  ;;  %v8356_v9 = vpop.f32.mrf.mxu1 }
 0x420   : > { %v8308_v55 = vpop.f32.mrf.mxu0 }
 0x421   : > { %6704 = vst.msk [vmem:[%s11307_s19 + $0xd0] sm:$0xff] %vm6677_vm9, %v6667_v62  ;;  %v6665_v37 = vadd.f32 %v11302_v32, %v6588_v36  ;;  %v6599_v16 = vadd.f32 %v8348_v34, %v8308_v55  ;;  %v6622_v34 = vpop.f32.mrf.mxu1 }
 0x422   : > { %v6347_v0 = vpop.f32.mrf.mxu0 }
 0x423   : > { %6702 = vst.msk [vmem:[%s11307_s19 + $0xc0] sm:$0xff] %vm6677_vm9, %v6665_v37  ;;  %v6668_v50 = vadd.f32 %v11302_v32, %v6599_v16  ;;  %v6591_v25 = vadd.f32 %v6590_v43, %v6347_v0 }
 0x424   : > { %v8311_v31 = vpop.f32.mrf.mxu0 }
 0x425   : > { %6705 = vst.msk [vmem:[%s11307_s19 + $0xd8] sm:$0xff] %vm6677_vm9, %v6668_v50  ;;  %v6666_v44 = vadd.f32 %v11302_v32, %v6591_v25  ;;  %v6612_v47 = vadd.f32 %v8351_v60, %v8311_v31 }
 0x426   : > { %v6360_v57 = vpop.f32.mrf.mxu0 }
 0x427   : > { %6703 = vst.msk [vmem:[%s11307_s19 + $0xc8] sm:$0xff] %vm6677_vm9, %v6666_v44  ;;  %v6671_v53 = vadd.f32 %v11302_v32, %v6612_v47  ;;  %v6604_v1 = vadd.f32 %v6603_v20, %v6360_v57 }
 0x428   : > { %v8312_v29 = vpop.f32.mrf.mxu0 }
 0x429   : > { %6708 = vst.msk [vmem:[%s11307_s19 + $0xf0] sm:$0xff] %vm6677_vm9, %v6671_v53  ;;  %v6669_v35 = vadd.f32 %v11302_v32, %v6604_v1  ;;  %v6615_v19 = vadd.f32 %v8352_v22, %v8312_v29 }
 0x42a   : > { %v6363_v27 = vpop.f32.mrf.mxu0 }
 0x42b   : > { %6706 = vst.msk [vmem:[%s11307_s19 + $0xe0] sm:$0xff] %vm6677_vm9, %v6669_v35  ;;  %v6672_v2 = vadd.f32 %v11302_v32, %v6615_v19  ;;  %v6607_v17 = vadd.f32 %v6606_v3, %v6363_v27 }
 0x42c   : > { %v8315_v7 = vpop.f32.mrf.mxu0 }
 0x42d   : > { %6709 = vst.msk [vmem:[%s11307_s19 + $0xf8] sm:$0xff] %vm6677_vm9, %v6672_v2  ;;  %v6670_v49 = vadd.f32 %v11302_v32, %v6607_v17  ;;  %v6628_v51 = vadd.f32 %v8355_v24, %v8315_v7 }
 0x42e   : > { %v6376_v33 = vpop.f32.mrf.mxu0 }
 0x42f   : > { %6707 = vst.msk [vmem:[%s11307_s19 + $0xe8] sm:$0xff] %vm6677_vm9, %v6670_v49  ;;  %v6675_v46 = vadd.f32 %v11302_v32, %v6628_v51  ;;  %v6620_v41 = vadd.f32 %v6619_v40, %v6376_v33 }
 0x430   : > { %v8316_v38 = vpop.f32.mrf.mxu0 }
 0x431   : > { %6712 = vst.msk [vmem:[%s11307_s19 + $0x110] sm:$0xff] %vm6677_vm9, %v6675_v46  ;;  %v6673_v39 = vadd.f32 %v11302_v32, %v6620_v41  ;;  %v6631_v45 = vadd.f32 %v8356_v9, %v8316_v38 }
 0x432   : > { %v6379_v42 = vpop.f32.mrf.mxu0 }
 0x433   : > { %6710 = vst.msk [vmem:[%s11307_s19 + $0x100] sm:$0xff] %vm6677_vm9, %v6673_v39  ;;  %v6676_v14 = vadd.f32 %v11302_v32, %v6631_v45  ;;  %v6623_v13 = vadd.f32 %v6622_v34, %v6379_v42 }
 0x435   : > { %6713 = vst.msk [vmem:[%s11307_s19 + $0x118] sm:$0xff] %vm6677_vm9, %v6676_v14  ;;  %v6674_v12 = vadd.f32 %v11302_v32, %v6623_v13 }
 0x437   : > { %6711 = vst.msk [vmem:[%s11307_s19 + $0x108] sm:$0xff] %vm6677_vm9, %v6674_v12 }
 0x438 PF: > { %s17_s24 = sadd.s32 1, %s8483_s24  }
 0x439   : > { %p14_p4 = scmp.ge.s32.totalorder %s17_s24, 4  }
 0x43b   :  { %16 = sbr.rel (!%p14_p4) target bundleno = 1 (0x1), region = 89 }

</bundles_post_ra>
